<compile_context>
chip_gen: v7x
topology: tpu7x:2x2x1
jax: 0.10.0
libtpu: 0.0.40
codegen_flags: <defaults>
</compile_context>

<pallas_src>
import math
import functools

import jax
import jax.numpy as jnp
from jax.experimental import pallas as pl
from jax.experimental.pallas import tpu as pltpu  # noqa: F401  (TPU backend)

# ---------------- model config (small synthetic sizes) ----------------
D_MODEL = 32
NHEAD = 4
DIM_FF = 64
NUM_LAYERS = 2
NUM_QUERIES = 8     # tgt sequence length
MEM_LEN = 16        # memory sequence length (e.g. 4x4 feature map flattened)
BATCH = 2
EPS = 1e-5
HEAD_DIM = D_MODEL // NHEAD


# ---------------------------- kernel helpers ----------------------------
def _layer_norm(x, g, b):
    # LayerNorm over last dim (eps=1e-5, elementwise affine, biased variance)
    m = jnp.mean(x, axis=-1, keepdims=True)
    v = jnp.mean((x - m) ** 2, axis=-1, keepdims=True)
    return (x - m) * jax.lax.rsqrt(v + EPS) * g + b


def _batch_bias(rows_q, rows_k, batch, nhead):
    # Additive mask separating batch elements inside the folded row dims.
    # Rows/cols are batch-interleaved: index i belongs to batch i % batch.
    # Built once (hoisted) and reused by every layer / head.
    qi = jax.lax.broadcasted_iota(jnp.int32, (nhead * rows_q, rows_k), 0)
    ki = jax.lax.broadcasted_iota(jnp.int32, (nhead * rows_q, rows_k), 1)
    same = (qi % batch) == (ki % batch)
    return jnp.where(same, jnp.float32(0.0), jnp.float32(-1e30))


def _mha(q, k, v, bias, wo, bo, *, nhead):
    # q: (Rq, D) already scaled (1/sqrt(hd) folded into the Q weights)
    # k, v: (Rk, D); bias: (nhead*Rq, Rk) batch-separation mask
    # wo: (D, D) pre-transposed output projection; bo: (1, D)
    rows, d = q.shape
    hd = d // nhead
    f32 = jnp.float32

    # Per-head scores (q_h @ k_h^T, no transpose materialized), stacked along
    # rows so the whole attention uses ONE softmax (one max/exp/sum/recip).
    s = jnp.concatenate(
        [jax.lax.dot_general(q[:, h * hd:(h + 1) * hd],
                             k[:, h * hd:(h + 1) * hd],
                             (((1,), (1,)), ((), ())),
                             preferred_element_type=f32)
         for h in range(nhead)],
        axis=0)                                            # (nhead*Rq, Rk)
    s = s + bias
    s = s - jnp.max(s, axis=-1, keepdims=True)
    p = jnp.exp(s)
    p = p * pl.reciprocal(jnp.sum(p, axis=-1, keepdims=True), approx=True)

    # Per-head PV, heads concatenated along lanes -> single output projection.
    ctx = jnp.concatenate(
        [jnp.dot(p[h * rows:(h + 1) * rows],
                 v[:, h * hd:(h + 1) * hd],
                 preferred_element_type=f32)
         for h in range(nhead)],
        axis=1)                                            # (Rq, D)
    return jnp.dot(ctx, wo, preferred_element_type=f32) + bo


# ------------------------------ fused kernel ------------------------------
def _decoder_kernel(tgt_ref, mem_ref, pos_ref, qpos_ref,
                    sa_wqkv_ref, sa_bqkv_ref, sa_wv_all_ref, sa_wo_ref, sa_bo_ref,
                    ca_wq_ref, ca_bq_ref, ca_wk_all_ref, ca_bk_all_ref,
                    ca_wv_all_ref, ca_bv_all_ref, ca_wo_ref, ca_bo_ref,
                    w1_ref, b1_ref, w2_ref, b2_ref,
                    ln1_g_ref, ln1_b_ref, ln2_g_ref, ln2_b_ref,
                    ln3_g_ref, ln3_b_ref, norm_g_ref, norm_b_ref,
                    out_ref, *, nhead, num_layers, batch):
    f32 = jnp.float32
    d = tgt_ref.shape[-1]
    x = tgt_ref[...]                 # (B*Tq, D) residual stream, VMEM-resident
    qp = qpos_ref[...]               # (B*Tq, D)
    mem = mem_ref[...]               # (B*Tk, D) cross-attn value input
    memk = mem + pos_ref[...]        # (B*Tk, D) cross-attn key input

    # ---- hoisted loop-invariant projections (wide stacked matmuls) ----
    # K/V for all layers at once; biases pre-concatenated along lanes.
    k_all = jnp.dot(memk, ca_wk_all_ref[...],
                    preferred_element_type=f32) + ca_bk_all_ref[...]   # (B*Tk, L*D)
    v_all = jnp.dot(mem, ca_wv_all_ref[...],
                    preferred_element_type=f32) + ca_bv_all_ref[...]   # (B*Tk, L*D)
    # query_pos @ Wv for all layers (used to recover V = x @ Wv + bv from the
    # packed (x+qp) @ [Wq|Wk|Wv] matmul).
    qpv_all = jnp.dot(qp, sa_wv_all_ref[...],
                      preferred_element_type=f32)                      # (B*Tq, L*D)

    # ---- batch-separation masks (built once, reused every layer) ----
    n_q = x.shape[0]
    n_k = mem.shape[0]
    self_bias = _batch_bias(n_q, n_q, batch, nhead)
    cross_bias = _batch_bias(n_q, n_k, batch, nhead)

    for li in range(num_layers):     # static unroll over the tiny layer count
        # ---- self-attention: q = k = x + query_pos, value = x ----
        xq = x + qp
        qkv = jnp.dot(xq, sa_wqkv_ref[li],
                      preferred_element_type=f32) + sa_bqkv_ref[li]    # (B*Tq, 3D)
        v = qkv[:, 2 * d:] - qpv_all[:, li * d:(li + 1) * d]           # x@Wv + bv
        sa = _mha(qkv[:, :d], qkv[:, d:2 * d], v, self_bias,
                  sa_wo_ref[li], sa_bo_ref[li], nhead=nhead)
        x = _layer_norm(x + sa, ln1_g_ref[li], ln1_b_ref[li])

        # ---- cross-attention: q = x + query_pos, k = mem + pos, v = mem ----
        q = jnp.dot(x + qp, ca_wq_ref[li],
                    preferred_element_type=f32) + ca_bq_ref[li]
        ca = _mha(q,
                  k_all[:, li * d:(li + 1) * d],
                  v_all[:, li * d:(li + 1) * d],
                  cross_bias, ca_wo_ref[li], ca_bo_ref[li], nhead=nhead)
        x = _layer_norm(x + ca, ln2_g_ref[li], ln2_b_ref[li])

        # ---- feed-forward: linear1 -> ReLU -> linear2 (dropout = identity) ----
        h = jnp.dot(x, w1_ref[li], preferred_element_type=f32) + b1_ref[li]
        h = jnp.maximum(h, 0.0)
        ff = jnp.dot(h, w2_ref[li], preferred_element_type=f32) + b2_ref[li]
        x = _layer_norm(x + ff, ln3_g_ref[li], ln3_b_ref[li])

    # final decoder norm
    x = _layer_norm(x, norm_g_ref[...], norm_b_ref[...])
    out_ref[...] = x.astype(out_ref.dtype)


# --------------------------- pallas_call wrapper ---------------------------
_WEIGHT_ORDER = (
    "sa_wqkv", "sa_bqkv", "sa_wv_all", "sa_wo", "sa_bo",
    "ca_wq", "ca_bq", "ca_wk_all", "ca_bk_all", "ca_wv_all", "ca_bv_all",
    "ca_wo", "ca_bo",
    "w1", "b1", "w2", "b2",
    "ln1_g", "ln1_b", "ln2_g", "ln2_b", "ln3_g", "ln3_b",
    "norm_g", "norm_b",
)


def transformer_decoder(packed, tgt, memory, pos, query_pos):
    # tgt/query_pos: (Tq, B, D); memory/pos: (Tk, B, D)  (PyTorch MHA layout)
    Tq, B, D = tgt.shape
    Tk = memory.shape[0]
    # Row-major dim merges only (no transposes, no data reordering): rows are
    # position-major / batch-interleaved, which the in-kernel batch mask handles.
    x = tgt.reshape(Tq * B, D)
    mem = memory.reshape(Tk * B, D)
    p = pos.reshape(Tk * B, D)
    qp = query_pos.reshape(Tq * B, D)

    weights = [packed[name] for name in _WEIGHT_ORDER]
    kernel = functools.partial(_decoder_kernel, nhead=NHEAD,
                               num_layers=NUM_LAYERS, batch=B)

    # Single gridless pallas_call: one program, everything resident in VMEM
    # (no per-batch grid steps; at these sizes the grid was pure overhead).
    out = pl.pallas_call(
        kernel,
        out_shape=jax.ShapeDtypeStruct((Tq * B, D), x.dtype),
    )(x, mem, p, qp, *weights)

    return out.reshape(Tq, B, D)[None]        # (1, Tq, B, D)


# ----------------------------- parameters -----------------------------
def init_params(key):
    # PyTorch-layout parameters (W applied as x @ W.T + b), used by the
    # pure-JAX reference.  pack_params() converts them to the kernel layout.
    def dense(k, shape):
        return jax.random.normal(k, shape, jnp.float32) * 0.02

    layers = []
    for _ in range(NUM_LAYERS):
        key, *ks = jax.random.split(key, 17)
        layer = dict(
            sa_wq=dense(ks[0], (D_MODEL, D_MODEL)),
            sa_wk=dense(ks[1], (D_MODEL, D_MODEL)),
            sa_wv=dense(ks[2], (D_MODEL, D_MODEL)),
            sa_bq=dense(ks[3], (1, D_MODEL)),
            sa_bk=dense(ks[4], (1, D_MODEL)),
            sa_bv=dense(ks[5], (1, D_MODEL)),
            sa_wo=dense(ks[6], (D_MODEL, D_MODEL)),
            sa_bo=dense(ks[7], (1, D_MODEL)),
            ca_wq=dense(ks[8], (D_MODEL, D_MODEL)),
            ca_wk=dense(ks[9], (D_MODEL, D_MODEL)),
            ca_wv=dense(ks[10], (D_MODEL, D_MODEL)),
            ca_bq=dense(ks[11], (1, D_MODEL)),
            ca_bk=dense(ks[12], (1, D_MODEL)),
            ca_bv=dense(ks[13], (1, D_MODEL)),
            ca_wo=dense(ks[14], (D_MODEL, D_MODEL)),
            ca_bo=dense(ks[15], (1, D_MODEL)),
        )
        key, k1, k2, k3, k4 = jax.random.split(key, 5)
        layer.update(
            w1=dense(k1, (DIM_FF, D_MODEL)), b1=dense(k2, (1, DIM_FF)),
            w2=dense(k3, (D_MODEL, DIM_FF)), b2=dense(k4, (1, D_MODEL)),
            ln1_g=jnp.ones((1, D_MODEL), jnp.float32), ln1_b=jnp.zeros((1, D_MODEL), jnp.float32),
            ln2_g=jnp.ones((1, D_MODEL), jnp.float32), ln2_b=jnp.zeros((1, D_MODEL), jnp.float32),
            ln3_g=jnp.ones((1, D_MODEL), jnp.float32), ln3_b=jnp.zeros((1, D_MODEL), jnp.float32),
        )
        layers.append(layer)
    return dict(
        layers=layers,
        norm_g=jnp.ones((1, D_MODEL), jnp.float32),
        norm_b=jnp.zeros((1, D_MODEL), jnp.float32),
    )


def pack_params(params):
    """Pre-transpose / pack weights for the fused kernel.

    - All projection weights transposed so the kernel does x @ W (no .T).
    - Self-attn Q/K/V share the input (x + query_pos) => packed into (D, 3D);
      the loop-invariant query_pos @ Wv is hoisted in the kernel and
      subtracted to recover V = x @ Wv + bv.
    - Cross-attn K/V weights (and biases) of ALL layers concatenated along the
      output dim so the kernel computes them once, outside the layer loop.
    - 1/sqrt(head_dim) scaling folded into the Q weights and biases.
    - Per-layer tensors stacked on a leading layer axis.
    """
    scale = 1.0 / math.sqrt(HEAD_DIM)
    Ls = params["layers"]

    def stack(fn):
        return jnp.stack([fn(L) for L in Ls], axis=0)

    def cat_lanes(fn):
        return jnp.concatenate([fn(L) for L in Ls], axis=1)

    return dict(
        sa_wqkv=stack(lambda L: jnp.concatenate(
            [L["sa_wq"].T * scale, L["sa_wk"].T, L["sa_wv"].T], axis=1)),  # (L, D, 3D)
        sa_bqkv=stack(lambda L: jnp.concatenate(
            [L["sa_bq"] * scale, L["sa_bk"], L["sa_bv"]], axis=1)),        # (L, 1, 3D)
        sa_wv_all=cat_lanes(lambda L: L["sa_wv"].T),                       # (D, L*D)
        sa_wo=stack(lambda L: L["sa_wo"].T),
        sa_bo=stack(lambda L: L["sa_bo"]),
        ca_wq=stack(lambda L: L["ca_wq"].T * scale),
        ca_bq=stack(lambda L: L["ca_bq"] * scale),
        ca_wk_all=cat_lanes(lambda L: L["ca_wk"].T),                       # (D, L*D)
        ca_bk_all=jnp.concatenate([L["ca_bk"] for L in Ls], axis=1),       # (1, L*D)
        ca_wv_all=cat_lanes(lambda L: L["ca_wv"].T),
        ca_bv_all=jnp.concatenate([L["ca_bv"] for L in Ls], axis=1),
        ca_wo=stack(lambda L: L["ca_wo"].T),
        ca_bo=stack(lambda L: L["ca_bo"]),
        w1=stack(lambda L: L["w1"].T),                                     # (L, D, Dff)
        b1=stack(lambda L: L["b1"]),
        w2=stack(lambda L: L["w2"].T),                                     # (L, Dff, D)
        b2=stack(lambda L: L["b2"]),
        ln1_g=stack(lambda L: L["ln1_g"]), ln1_b=stack(lambda L: L["ln1_b"]),
        ln2_g=stack(lambda L: L["ln2_g"]), ln2_b=stack(lambda L: L["ln2_b"]),
        ln3_g=stack(lambda L: L["ln3_g"]), ln3_b=stack(lambda L: L["ln3_b"]),
        norm_g=params["norm_g"], norm_b=params["norm_b"],
    )


# ------------------------ pure-JAX reference check ------------------------
def _ref_mha(q_in, k_in, v_in, wq, wk, wv, bq, bk, bv, wo, bo, nhead):
    B, Tq, D = q_in.shape
    hd = D // nhead
    q = q_in @ wq.T + bq[0]
    k = k_in @ wk.T + bk[0]
    v = v_in @ wv.T + bv[0]
    q = q.reshape(B, Tq, nhead, hd).transpose(0, 2, 1, 3) / math.sqrt(hd)
    k = k.reshape(B, -1, nhead, hd).transpose(0, 2, 1, 3)
    v = v.reshape(B, -1, nhead, hd).transpose(0, 2, 1, 3)
    s = jnp.einsum("bhqd,bhkd->bhqk", q, k)
    p = jax.nn.softmax(s, axis=-1)
    ctx = jnp.einsum("bhqk,bhkd->bhqd", p, v).transpose(0, 2, 1, 3).reshape(B, Tq, D)
    return ctx @ wo.T + bo[0]


def _ref_ln(x, g, b):
    m = jnp.mean(x, axis=-1, keepdims=True)
    v = jnp.mean((x - m) ** 2, axis=-1, keepdims=True)
    return (x - m) / jnp.sqrt(v + EPS) * g[0] + b[0]


def _ref_decoder(params, tgt, memory, pos, query_pos):
    x = jnp.transpose(tgt, (1, 0, 2))
    mem = jnp.transpose(memory, (1, 0, 2))
    p = jnp.transpose(pos, (1, 0, 2))
    qp = jnp.transpose(query_pos, (1, 0, 2))
    for L in params["layers"]:
        q = x + qp
        sa = _ref_mha(q, q, x, L["sa_wq"], L["sa_wk"], L["sa_wv"],
                      L["sa_bq"], L["sa_bk"], L["sa_bv"], L["sa_wo"], L["sa_bo"], NHEAD)
        x = _ref_ln(x + sa, L["ln1_g"], L["ln1_b"])
        ca = _ref_mha(x + qp, mem + p, mem, L["ca_wq"], L["ca_wk"], L["ca_wv"],
                      L["ca_bq"], L["ca_bk"], L["ca_bv"], L["ca_wo"], L["ca_bo"], NHEAD)
        x = _ref_ln(x + ca, L["ln2_g"], L["ln2_b"])
        ff = jnp.maximum(x @ L["w1"].T + L["b1"][0], 0.0) @ L["w2"].T + L["b2"][0]
        x = _ref_ln(x + ff, L["ln3_g"], L["ln3_b"])
    x = _ref_ln(x, params["norm_g"], params["norm_b"])
    return jnp.transpose(x, (1, 0, 2))[None]


# --------------------------------- main ---------------------------------
if __name__ == "__main__":
    key = jax.random.PRNGKey(0)
    kp, kt, km, kpos, kqp = jax.random.split(key, 5)
    params = init_params(kp)
    packed = pack_params(params)

    tgt = jax.random.normal(kt, (NUM_QUERIES, BATCH, D_MODEL), jnp.float32)
    memory = jax.random.normal(km, (MEM_LEN, BATCH, D_MODEL), jnp.float32)
    pos = jax.random.normal(kpos, (MEM_LEN, BATCH, D_MODEL), jnp.float32)
    query_pos = jax.random.normal(kqp, (NUM_QUERIES, BATCH, D_MODEL), jnp.float32)

    out = jax.jit(transformer_decoder)(packed, tgt, memory, pos, query_pos)
    out = jax.block_until_ready(out)

    ref = _ref_decoder(params, tgt, memory, pos, query_pos)
    assert out.shape == (1, NUM_QUERIES, BATCH, D_MODEL), out.shape
    max_err = float(jnp.max(jnp.abs(out - ref)))
    # Tolerance 1e-3: the softmax denominator uses the EUP approximate
    # reciprocal (pl.reciprocal(approx=True)); everything else is exact f32.
    assert jnp.allclose(out, ref, atol=1e-3, rtol=1e-3), max_err
    print("KERNEL_OK")
</pallas_src>

<mosaic_0001>
module attributes {stable_mosaic.version = 11 : i64} {
  func.func @_decoder_kernel(%arg0: memref<16x32xf32, #tpu.memory_space<vmem>>, %arg1: memref<32x32xf32, #tpu.memory_space<vmem>>, %arg2: memref<32x32xf32, #tpu.memory_space<vmem>>, %arg3: memref<16x32xf32, #tpu.memory_space<vmem>>, %arg4: memref<2x32x96xf32, #tpu.memory_space<vmem>>, %arg5: memref<2x1x96xf32, #tpu.memory_space<vmem>>, %arg6: memref<32x64xf32, #tpu.memory_space<vmem>>, %arg7: memref<2x32x32xf32, #tpu.memory_space<vmem>>, %arg8: memref<2x1x32xf32, #tpu.memory_space<vmem>>, %arg9: memref<2x32x32xf32, #tpu.memory_space<vmem>>, %arg10: memref<2x1x32xf32, #tpu.memory_space<vmem>>, %arg11: memref<32x64xf32, #tpu.memory_space<vmem>>, %arg12: memref<1x64xf32, #tpu.memory_space<vmem>>, %arg13: memref<32x64xf32, #tpu.memory_space<vmem>>, %arg14: memref<1x64xf32, #tpu.memory_space<vmem>>, %arg15: memref<2x32x32xf32, #tpu.memory_space<vmem>>, %arg16: memref<2x1x32xf32, #tpu.memory_space<vmem>>, %arg17: memref<2x32x64xf32, #tpu.memory_space<vmem>>, %arg18: memref<2x1x64xf32, #tpu.memory_space<vmem>>, %arg19: memref<2x64x32xf32, #tpu.memory_space<vmem>>, %arg20: memref<2x1x32xf32, #tpu.memory_space<vmem>>, %arg21: memref<2x1x32xf32, #tpu.memory_space<vmem>>, %arg22: memref<2x1x32xf32, #tpu.memory_space<vmem>>, %arg23: memref<2x1x32xf32, #tpu.memory_space<vmem>>, %arg24: memref<2x1x32xf32, #tpu.memory_space<vmem>>, %arg25: memref<2x1x32xf32, #tpu.memory_space<vmem>>, %arg26: memref<2x1x32xf32, #tpu.memory_space<vmem>>, %arg27: memref<1x32xf32, #tpu.memory_space<vmem>>, %arg28: memref<1x32xf32, #tpu.memory_space<vmem>>, %arg29: memref<16x32xf32, #tpu.memory_space<vmem>>) attributes {dimension_semantics = [], scalar_prefetch = 0 : i64, scratch_operands = 0 : i64, tpu.core_type = #tpu.core_type<tc>} {
    %c0 = arith.constant 0 : index
    %c0_0 = arith.constant 0 : index
    %0 = vector.load %arg0[%c0, %c0_0] : memref<16x32xf32, #tpu.memory_space<vmem>>, vector<16x32xf32>
    %c0_1 = arith.constant 0 : index
    %c0_2 = arith.constant 0 : index
    %1 = vector.load %arg3[%c0_1, %c0_2] : memref<16x32xf32, #tpu.memory_space<vmem>>, vector<16x32xf32>
    %c0_3 = arith.constant 0 : index
    %c0_4 = arith.constant 0 : index
    %2 = vector.load %arg1[%c0_3, %c0_4] : memref<32x32xf32, #tpu.memory_space<vmem>>, vector<32x32xf32>
    %c0_5 = arith.constant 0 : index
    %c0_6 = arith.constant 0 : index
    %3 = vector.load %arg2[%c0_5, %c0_6] : memref<32x32xf32, #tpu.memory_space<vmem>>, vector<32x32xf32>
    %4 = arith.addf %2, %3 : vector<32x32xf32>
    %c0_7 = arith.constant 0 : index
    %c0_8 = arith.constant 0 : index
    %5 = vector.load %arg11[%c0_7, %c0_8] : memref<32x64xf32, #tpu.memory_space<vmem>>, vector<32x64xf32>
    %cst = arith.constant dense<0.000000e+00> : vector<32x64xf32>
    %6 = tpu.matmul %4, %5, %cst {dimension_numbers = #tpu.dot_dimension_numbers<[1], [0], [0], [1], [0, 0, 1, 1], [], []>} : vector<32x32xf32>, vector<32x64xf32>, vector<32x64xf32> -> vector<32x64xf32>
    %c0_9 = arith.constant 0 : index
    %c0_10 = arith.constant 0 : index
    %7 = vector.load %arg12[%c0_9, %c0_10] : memref<1x64xf32, #tpu.memory_space<vmem>>, vector<1x64xf32>
    %8 = vector.broadcast %7 : vector<1x64xf32> to vector<32x64xf32>
    %9 = arith.addf %6, %8 : vector<32x64xf32>
    %c0_11 = arith.constant 0 : index
    %c0_12 = arith.constant 0 : index
    %10 = vector.load %arg13[%c0_11, %c0_12] : memref<32x64xf32, #tpu.memory_space<vmem>>, vector<32x64xf32>
    %cst_13 = arith.constant dense<0.000000e+00> : vector<32x64xf32>
    %11 = tpu.matmul %2, %10, %cst_13 {dimension_numbers = #tpu.dot_dimension_numbers<[1], [0], [0], [1], [0, 0, 1, 1], [], []>} : vector<32x32xf32>, vector<32x64xf32>, vector<32x64xf32> -> vector<32x64xf32>
    %c0_14 = arith.constant 0 : index
    %c0_15 = arith.constant 0 : index
    %12 = vector.load %arg14[%c0_14, %c0_15] : memref<1x64xf32, #tpu.memory_space<vmem>>, vector<1x64xf32>
    %13 = vector.broadcast %12 : vector<1x64xf32> to vector<32x64xf32>
    %14 = arith.addf %11, %13 : vector<32x64xf32>
    %c0_16 = arith.constant 0 : index
    %c0_17 = arith.constant 0 : index
    %15 = vector.load %arg6[%c0_16, %c0_17] : memref<32x64xf32, #tpu.memory_space<vmem>>, vector<32x64xf32>
    %cst_18 = arith.constant dense<0.000000e+00> : vector<16x64xf32>
    %16 = tpu.matmul %1, %15, %cst_18 {dimension_numbers = #tpu.dot_dimension_numbers<[1], [0], [0], [1], [0, 0, 1, 1], [], []>} : vector<16x32xf32>, vector<32x64xf32>, vector<16x64xf32> -> vector<16x64xf32>
    %17 = tpu.iota {dimensions = array<i32: 0>} : vector<64x16xi32>
    %18 = tpu.iota {dimensions = array<i32: 1>} : vector<64x16xi32>
    %c2_i32 = arith.constant 2 : i32
    %c0_i32 = arith.constant 0 : i32
    %19 = arith.cmpi eq, %c2_i32, %c0_i32 : i32
    %c1_i32 = arith.constant 1 : i32
    %20 = arith.select %19, %c1_i32, %c2_i32 : i32
    %21 = vector.broadcast %20 : i32 to vector<64x16xi32>
    %22 = arith.remsi %17, %21 : vector<64x16xi32>
    %c0_i32_19 = arith.constant 0 : i32
    %23 = vector.broadcast %c0_i32_19 : i32 to vector<64x16xi32>
    %24 = arith.cmpi ne, %22, %23 : vector<64x16xi32>
    %c0_i32_20 = arith.constant 0 : i32
    %25 = vector.broadcast %c0_i32_20 : i32 to vector<64x16xi32>
    %26 = arith.cmpi slt, %22, %25 : vector<64x16xi32>
    %c0_i32_21 = arith.constant 0 : i32
    %27 = arith.cmpi slt, %20, %c0_i32_21 : i32
    %28 = vector.broadcast %27 : i1 to vector<64x16xi1>
    %29 = vector.broadcast %28 : vector<64x16xi1> to vector<64x16xi1>
    %30 = arith.xori %26, %29 : vector<64x16xi1>
    %31 = arith.andi %30, %24 : vector<64x16xi1>
    %32 = vector.broadcast %20 : i32 to vector<64x16xi32>
    %33 = arith.addi %22, %32 : vector<64x16xi32>
    %34 = arith.select %31, %33, %22 : vector<64x16xi1>, vector<64x16xi32>
    %c2_i32_22 = arith.constant 2 : i32
    %c0_i32_23 = arith.constant 0 : i32
    %35 = arith.cmpi eq, %c2_i32_22, %c0_i32_23 : i32
    %c1_i32_24 = arith.constant 1 : i32
    %36 = arith.select %35, %c1_i32_24, %c2_i32_22 : i32
    %37 = vector.broadcast %36 : i32 to vector<64x16xi32>
    %38 = arith.remsi %18, %37 : vector<64x16xi32>
    %c0_i32_25 = arith.constant 0 : i32
    %39 = vector.broadcast %c0_i32_25 : i32 to vector<64x16xi32>
    %40 = arith.cmpi ne, %38, %39 : vector<64x16xi32>
    %c0_i32_26 = arith.constant 0 : i32
    %41 = vector.broadcast %c0_i32_26 : i32 to vector<64x16xi32>
    %42 = arith.cmpi slt, %38, %41 : vector<64x16xi32>
    %c0_i32_27 = arith.constant 0 : i32
    %43 = arith.cmpi slt, %36, %c0_i32_27 : i32
    %44 = vector.broadcast %43 : i1 to vector<64x16xi1>
    %45 = vector.broadcast %44 : vector<64x16xi1> to vector<64x16xi1>
    %46 = arith.xori %42, %45 : vector<64x16xi1>
    %47 = arith.andi %46, %40 : vector<64x16xi1>
    %48 = vector.broadcast %36 : i32 to vector<64x16xi32>
    %49 = arith.addi %38, %48 : vector<64x16xi32>
    %50 = arith.select %47, %49, %38 : vector<64x16xi1>, vector<64x16xi32>
    %51 = arith.cmpi eq, %34, %50 : vector<64x16xi32>
    %cst_28 = arith.constant 0.000000e+00 : f32
    %cst_29 = arith.constant -1.000000e+30 : f32
    %52 = vector.broadcast %cst_28 : f32 to vector<64x16xf32>
    %53 = vector.broadcast %cst_29 : f32 to vector<64x16xf32>
    %54 = arith.select %51, %52, %53 : vector<64x16xi1>, vector<64x16xf32>
    %55 = tpu.iota {dimensions = array<i32: 0>} : vector<64x32xi32>
    %56 = tpu.iota {dimensions = array<i32: 1>} : vector<64x32xi32>
    %c2_i32_30 = arith.constant 2 : i32
    %c0_i32_31 = arith.constant 0 : i32
    %57 = arith.cmpi eq, %c2_i32_30, %c0_i32_31 : i32
    %c1_i32_32 = arith.constant 1 : i32
    %58 = arith.select %57, %c1_i32_32, %c2_i32_30 : i32
    %59 = vector.broadcast %58 : i32 to vector<64x32xi32>
    %60 = arith.remsi %55, %59 : vector<64x32xi32>
    %c0_i32_33 = arith.constant 0 : i32
    %61 = vector.broadcast %c0_i32_33 : i32 to vector<64x32xi32>
    %62 = arith.cmpi ne, %60, %61 : vector<64x32xi32>
    %c0_i32_34 = arith.constant 0 : i32
    %63 = vector.broadcast %c0_i32_34 : i32 to vector<64x32xi32>
    %64 = arith.cmpi slt, %60, %63 : vector<64x32xi32>
    %c0_i32_35 = arith.constant 0 : i32
    %65 = arith.cmpi slt, %58, %c0_i32_35 : i32
    %66 = vector.broadcast %65 : i1 to vector<64x32xi1>
    %67 = vector.broadcast %66 : vector<64x32xi1> to vector<64x32xi1>
    %68 = arith.xori %64, %67 : vector<64x32xi1>
    %69 = arith.andi %68, %62 : vector<64x32xi1>
    %70 = vector.broadcast %58 : i32 to vector<64x32xi32>
    %71 = arith.addi %60, %70 : vector<64x32xi32>
    %72 = arith.select %69, %71, %60 : vector<64x32xi1>, vector<64x32xi32>
    %c2_i32_36 = arith.constant 2 : i32
    %c0_i32_37 = arith.constant 0 : i32
    %73 = arith.cmpi eq, %c2_i32_36, %c0_i32_37 : i32
    %c1_i32_38 = arith.constant 1 : i32
    %74 = arith.select %73, %c1_i32_38, %c2_i32_36 : i32
    %75 = vector.broadcast %74 : i32 to vector<64x32xi32>
    %76 = arith.remsi %56, %75 : vector<64x32xi32>
    %c0_i32_39 = arith.constant 0 : i32
    %77 = vector.broadcast %c0_i32_39 : i32 to vector<64x32xi32>
    %78 = arith.cmpi ne, %76, %77 : vector<64x32xi32>
    %c0_i32_40 = arith.constant 0 : i32
    %79 = vector.broadcast %c0_i32_40 : i32 to vector<64x32xi32>
    %80 = arith.cmpi slt, %76, %79 : vector<64x32xi32>
    %c0_i32_41 = arith.constant 0 : i32
    %81 = arith.cmpi slt, %74, %c0_i32_41 : i32
    %82 = vector.broadcast %81 : i1 to vector<64x32xi1>
    %83 = vector.broadcast %82 : vector<64x32xi1> to vector<64x32xi1>
    %84 = arith.xori %80, %83 : vector<64x32xi1>
    %85 = arith.andi %84, %78 : vector<64x32xi1>
    %86 = vector.broadcast %74 : i32 to vector<64x32xi32>
    %87 = arith.addi %76, %86 : vector<64x32xi32>
    %88 = arith.select %85, %87, %76 : vector<64x32xi1>, vector<64x32xi32>
    %89 = arith.cmpi eq, %72, %88 : vector<64x32xi32>
    %cst_42 = arith.constant 0.000000e+00 : f32
    %cst_43 = arith.constant -1.000000e+30 : f32
    %90 = vector.broadcast %cst_42 : f32 to vector<64x32xf32>
    %91 = vector.broadcast %cst_43 : f32 to vector<64x32xf32>
    %92 = arith.select %89, %90, %91 : vector<64x32xi1>, vector<64x32xf32>
    %93 = arith.addf %0, %1 : vector<16x32xf32>
    %c0_44 = arith.constant 0 : index
    %c0_45 = arith.constant 0 : index
    %c0_46 = arith.constant 0 : index
    %94 = vector.load %arg4[%c0_44, %c0_45, %c0_46] : memref<2x32x96xf32, #tpu.memory_space<vmem>>, vector<1x32x96xf32>
    %95 = vector.shape_cast %94 : vector<1x32x96xf32> to vector<32x96xf32>
    %cst_47 = arith.constant dense<0.000000e+00> : vector<16x96xf32>
    %96 = tpu.matmul %93, %95, %cst_47 {dimension_numbers = #tpu.dot_dimension_numbers<[1], [0], [0], [1], [0, 0, 1, 1], [], []>} : vector<16x32xf32>, vector<32x96xf32>, vector<16x96xf32> -> vector<16x96xf32>
    %c0_48 = arith.constant 0 : index
    %c0_49 = arith.constant 0 : index
    %c0_50 = arith.constant 0 : index
    %97 = vector.load %arg5[%c0_48, %c0_49, %c0_50] : memref<2x1x96xf32, #tpu.memory_space<vmem>>, vector<1x1x96xf32>
    %98 = vector.shape_cast %97 : vector<1x1x96xf32> to vector<1x96xf32>
    %99 = vector.broadcast %98 : vector<1x96xf32> to vector<16x96xf32>
    %100 = arith.addf %96, %99 : vector<16x96xf32>
    %101 = vector.extract_strided_slice %100 {offsets = [0, 64], sizes = [16, 32], strides = [1, 1]} : vector<16x96xf32> to vector<16x32xf32>
    %102 = vector.extract_strided_slice %16 {offsets = [0, 0], sizes = [16, 32], strides = [1, 1]} : vector<16x64xf32> to vector<16x32xf32>
    %103 = arith.subf %101, %102 : vector<16x32xf32>
    %104 = vector.extract_strided_slice %100 {offsets = [0, 0], sizes = [16, 32], strides = [1, 1]} : vector<16x96xf32> to vector<16x32xf32>
    %105 = vector.extract_strided_slice %100 {offsets = [0, 32], sizes = [16, 32], strides = [1, 1]} : vector<16x96xf32> to vector<16x32xf32>
    %c0_51 = arith.constant 0 : index
    %c0_52 = arith.constant 0 : index
    %c0_53 = arith.constant 0 : index
    %106 = vector.load %arg7[%c0_51, %c0_52, %c0_53] : memref<2x32x32xf32, #tpu.memory_space<vmem>>, vector<1x32x32xf32>
    %107 = vector.shape_cast %106 : vector<1x32x32xf32> to vector<32x32xf32>
    %c0_54 = arith.constant 0 : index
    %c0_55 = arith.constant 0 : index
    %c0_56 = arith.constant 0 : index
    %108 = vector.load %arg8[%c0_54, %c0_55, %c0_56] : memref<2x1x32xf32, #tpu.memory_space<vmem>>, vector<1x1x32xf32>
    %109 = vector.shape_cast %108 : vector<1x1x32xf32> to vector<1x32xf32>
    %110 = vector.extract_strided_slice %104 {offsets = [0, 0], sizes = [16, 8], strides = [1, 1]} : vector<16x32xf32> to vector<16x8xf32>
    %111 = vector.extract_strided_slice %105 {offsets = [0, 0], sizes = [16, 8], strides = [1, 1]} : vector<16x32xf32> to vector<16x8xf32>
    %cst_57 = arith.constant dense<0.000000e+00> : vector<16x16xf32>
    %112 = tpu.matmul %110, %111, %cst_57 {dimension_numbers = #tpu.dot_dimension_numbers<[1], [1], [0], [0], [0, 0, 1, 0], [], []>} : vector<16x8xf32>, vector<16x8xf32>, vector<16x16xf32> -> vector<16x16xf32>
    %113 = vector.extract_strided_slice %104 {offsets = [0, 8], sizes = [16, 8], strides = [1, 1]} : vector<16x32xf32> to vector<16x8xf32>
    %114 = vector.extract_strided_slice %105 {offsets = [0, 8], sizes = [16, 8], strides = [1, 1]} : vector<16x32xf32> to vector<16x8xf32>
    %cst_58 = arith.constant dense<0.000000e+00> : vector<16x16xf32>
    %115 = tpu.matmul %113, %114, %cst_58 {dimension_numbers = #tpu.dot_dimension_numbers<[1], [1], [0], [0], [0, 0, 1, 0], [], []>} : vector<16x8xf32>, vector<16x8xf32>, vector<16x16xf32> -> vector<16x16xf32>
    %116 = vector.extract_strided_slice %104 {offsets = [0, 16], sizes = [16, 8], strides = [1, 1]} : vector<16x32xf32> to vector<16x8xf32>
    %117 = vector.extract_strided_slice %105 {offsets = [0, 16], sizes = [16, 8], strides = [1, 1]} : vector<16x32xf32> to vector<16x8xf32>
    %cst_59 = arith.constant dense<0.000000e+00> : vector<16x16xf32>
    %118 = tpu.matmul %116, %117, %cst_59 {dimension_numbers = #tpu.dot_dimension_numbers<[1], [1], [0], [0], [0, 0, 1, 0], [], []>} : vector<16x8xf32>, vector<16x8xf32>, vector<16x16xf32> -> vector<16x16xf32>
    %119 = vector.extract_strided_slice %104 {offsets = [0, 24], sizes = [16, 8], strides = [1, 1]} : vector<16x32xf32> to vector<16x8xf32>
    %120 = vector.extract_strided_slice %105 {offsets = [0, 24], sizes = [16, 8], strides = [1, 1]} : vector<16x32xf32> to vector<16x8xf32>
    %cst_60 = arith.constant dense<0.000000e+00> : vector<16x16xf32>
    %121 = tpu.matmul %119, %120, %cst_60 {dimension_numbers = #tpu.dot_dimension_numbers<[1], [1], [0], [0], [0, 0, 1, 0], [], []>} : vector<16x8xf32>, vector<16x8xf32>, vector<16x16xf32> -> vector<16x16xf32>
    %122 = tpu.concatenate %112, %115, %118, %121 in 0 : vector<16x16xf32>, vector<16x16xf32>, vector<16x16xf32>, vector<16x16xf32> -> vector<64x16xf32>
    %123 = arith.addf %122, %54 : vector<64x16xf32>
    %cst_61 = arith.constant dense<0xFF800000> : vector<64xf32>
    %124 = vector.multi_reduction <maximumf>, %123, %cst_61 [1] : vector<64x16xf32> to vector<64xf32>
    %125 = vector.shape_cast %124 : vector<64xf32> to vector<64x1xf32>
    %126 = vector.broadcast %125 : vector<64x1xf32> to vector<64x16xf32>
    %127 = arith.subf %123, %126 : vector<64x16xf32>
    %128 = math.exp %127 : vector<64x16xf32>
    %cst_62 = arith.constant dense<0.000000e+00> : vector<64xf32>
    %129 = vector.multi_reduction <add>, %128, %cst_62 [1] : vector<64x16xf32> to vector<64xf32>
    %130 = vector.shape_cast %129 : vector<64xf32> to vector<64x1xf32>
    %131 = tpu.reciprocal %130 {approx = true} : vector<64x1xf32> -> vector<64x1xf32>
    %132 = vector.broadcast %131 : vector<64x1xf32> to vector<64x16xf32>
    %133 = arith.mulf %128, %132 : vector<64x16xf32>
    %134 = vector.extract_strided_slice %133 {offsets = [0, 0], sizes = [16, 16], strides = [1, 1]} : vector<64x16xf32> to vector<16x16xf32>
    %135 = vector.extract_strided_slice %103 {offsets = [0, 0], sizes = [16, 8], strides = [1, 1]} : vector<16x32xf32> to vector<16x8xf32>
    %cst_63 = arith.constant dense<0.000000e+00> : vector<16x8xf32>
    %136 = tpu.matmul %134, %135, %cst_63 {dimension_numbers = #tpu.dot_dimension_numbers<[1], [0], [0], [1], [0, 0, 1, 1], [], []>} : vector<16x16xf32>, vector<16x8xf32>, vector<16x8xf32> -> vector<16x8xf32>
    %137 = vector.extract_strided_slice %133 {offsets = [16, 0], sizes = [16, 16], strides = [1, 1]} : vector<64x16xf32> to vector<16x16xf32>
    %138 = vector.extract_strided_slice %103 {offsets = [0, 8], sizes = [16, 8], strides = [1, 1]} : vector<16x32xf32> to vector<16x8xf32>
    %cst_64 = arith.constant dense<0.000000e+00> : vector<16x8xf32>
    %139 = tpu.matmul %137, %138, %cst_64 {dimension_numbers = #tpu.dot_dimension_numbers<[1], [0], [0], [1], [0, 0, 1, 1], [], []>} : vector<16x16xf32>, vector<16x8xf32>, vector<16x8xf32> -> vector<16x8xf32>
    %140 = vector.extract_strided_slice %133 {offsets = [32, 0], sizes = [16, 16], strides = [1, 1]} : vector<64x16xf32> to vector<16x16xf32>
    %141 = vector.extract_strided_slice %103 {offsets = [0, 16], sizes = [16, 8], strides = [1, 1]} : vector<16x32xf32> to vector<16x8xf32>
    %cst_65 = arith.constant dense<0.000000e+00> : vector<16x8xf32>
    %142 = tpu.matmul %140, %141, %cst_65 {dimension_numbers = #tpu.dot_dimension_numbers<[1], [0], [0], [1], [0, 0, 1, 1], [], []>} : vector<16x16xf32>, vector<16x8xf32>, vector<16x8xf32> -> vector<16x8xf32>
    %143 = vector.extract_strided_slice %133 {offsets = [48, 0], sizes = [16, 16], strides = [1, 1]} : vector<64x16xf32> to vector<16x16xf32>
    %144 = vector.extract_strided_slice %103 {offsets = [0, 24], sizes = [16, 8], strides = [1, 1]} : vector<16x32xf32> to vector<16x8xf32>
    %cst_66 = arith.constant dense<0.000000e+00> : vector<16x8xf32>
    %145 = tpu.matmul %143, %144, %cst_66 {dimension_numbers = #tpu.dot_dimension_numbers<[1], [0], [0], [1], [0, 0, 1, 1], [], []>} : vector<16x16xf32>, vector<16x8xf32>, vector<16x8xf32> -> vector<16x8xf32>
    %146 = tpu.concatenate %136, %139, %142, %145 in 1 : vector<16x8xf32>, vector<16x8xf32>, vector<16x8xf32>, vector<16x8xf32> -> vector<16x32xf32>
    %cst_67 = arith.constant dense<0.000000e+00> : vector<16x32xf32>
    %147 = tpu.matmul %146, %107, %cst_67 {dimension_numbers = #tpu.dot_dimension_numbers<[1], [0], [0], [1], [0, 0, 1, 1], [], []>} : vector<16x32xf32>, vector<32x32xf32>, vector<16x32xf32> -> vector<16x32xf32>
    %148 = vector.broadcast %109 : vector<1x32xf32> to vector<16x32xf32>
    %149 = arith.addf %147, %148 : vector<16x32xf32>
    %150 = arith.addf %0, %149 : vector<16x32xf32>
    %c0_68 = arith.constant 0 : index
    %c0_69 = arith.constant 0 : index
    %c0_70 = arith.constant 0 : index
    %151 = vector.load %arg21[%c0_68, %c0_69, %c0_70] : memref<2x1x32xf32, #tpu.memory_space<vmem>>, vector<1x1x32xf32>
    %152 = vector.shape_cast %151 : vector<1x1x32xf32> to vector<1x32xf32>
    %c0_71 = arith.constant 0 : index
    %c0_72 = arith.constant 0 : index
    %c0_73 = arith.constant 0 : index
    %153 = vector.load %arg22[%c0_71, %c0_72, %c0_73] : memref<2x1x32xf32, #tpu.memory_space<vmem>>, vector<1x1x32xf32>
    %154 = vector.shape_cast %153 : vector<1x1x32xf32> to vector<1x32xf32>
    %cst_74 = arith.constant dense<0.000000e+00> : vector<16xf32>
    %155 = vector.multi_reduction <add>, %150, %cst_74 [1] : vector<16x32xf32> to vector<16xf32>
    %156 = vector.shape_cast %155 : vector<16xf32> to vector<16x1xf32>
    %cst_75 = arith.constant 3.200000e+01 : f32
    %157 = vector.broadcast %cst_75 : f32 to vector<16x1xf32>
    %158 = arith.divf %156, %157 : vector<16x1xf32>
    %159 = vector.broadcast %158 : vector<16x1xf32> to vector<16x32xf32>
    %160 = arith.subf %150, %159 : vector<16x32xf32>
    %161 = arith.mulf %160, %160 : vector<16x32xf32>
    %cst_76 = arith.constant dense<0.000000e+00> : vector<16xf32>
    %162 = vector.multi_reduction <add>, %161, %cst_76 [1] : vector<16x32xf32> to vector<16xf32>
    %163 = vector.shape_cast %162 : vector<16xf32> to vector<16x1xf32>
    %cst_77 = arith.constant 3.200000e+01 : f32
    %164 = vector.broadcast %cst_77 : f32 to vector<16x1xf32>
    %165 = arith.divf %163, %164 : vector<16x1xf32>
    %166 = vector.broadcast %158 : vector<16x1xf32> to vector<16x32xf32>
    %167 = arith.subf %150, %166 : vector<16x32xf32>
    %cst_78 = arith.constant 9.99999974E-6 : f32
    %168 = vector.broadcast %cst_78 : f32 to vector<16x1xf32>
    %169 = arith.addf %165, %168 : vector<16x1xf32>
    %170 = math.rsqrt %169 : vector<16x1xf32>
    %171 = vector.broadcast %170 : vector<16x1xf32> to vector<16x32xf32>
    %172 = arith.mulf %167, %171 : vector<16x32xf32>
    %173 = vector.broadcast %152 : vector<1x32xf32> to vector<16x32xf32>
    %174 = arith.mulf %172, %173 : vector<16x32xf32>
    %175 = vector.broadcast %154 : vector<1x32xf32> to vector<16x32xf32>
    %176 = arith.addf %174, %175 : vector<16x32xf32>
    %177 = arith.addf %176, %1 : vector<16x32xf32>
    %c0_79 = arith.constant 0 : index
    %c0_80 = arith.constant 0 : index
    %c0_81 = arith.constant 0 : index
    %178 = vector.load %arg9[%c0_79, %c0_80, %c0_81] : memref<2x32x32xf32, #tpu.memory_space<vmem>>, vector<1x32x32xf32>
    %179 = vector.shape_cast %178 : vector<1x32x32xf32> to vector<32x32xf32>
    %cst_82 = arith.constant dense<0.000000e+00> : vector<16x32xf32>
    %180 = tpu.matmul %177, %179, %cst_82 {dimension_numbers = #tpu.dot_dimension_numbers<[1], [0], [0], [1], [0, 0, 1, 1], [], []>} : vector<16x32xf32>, vector<32x32xf32>, vector<16x32xf32> -> vector<16x32xf32>
    %c0_83 = arith.constant 0 : index
    %c0_84 = arith.constant 0 : index
    %c0_85 = arith.constant 0 : index
    %181 = vector.load %arg10[%c0_83, %c0_84, %c0_85] : memref<2x1x32xf32, #tpu.memory_space<vmem>>, vector<1x1x32xf32>
    %182 = vector.shape_cast %181 : vector<1x1x32xf32> to vector<1x32xf32>
    %183 = vector.broadcast %182 : vector<1x32xf32> to vector<16x32xf32>
    %184 = arith.addf %180, %183 : vector<16x32xf32>
    %185 = vector.extract_strided_slice %9 {offsets = [0, 0], sizes = [32, 32], strides = [1, 1]} : vector<32x64xf32> to vector<32x32xf32>
    %186 = vector.extract_strided_slice %14 {offsets = [0, 0], sizes = [32, 32], strides = [1, 1]} : vector<32x64xf32> to vector<32x32xf32>
    %c0_86 = arith.constant 0 : index
    %c0_87 = arith.constant 0 : index
    %c0_88 = arith.constant 0 : index
    %187 = vector.load %arg15[%c0_86, %c0_87, %c0_88] : memref<2x32x32xf32, #tpu.memory_space<vmem>>, vector<1x32x32xf32>
    %188 = vector.shape_cast %187 : vector<1x32x32xf32> to vector<32x32xf32>
    %c0_89 = arith.constant 0 : index
    %c0_90 = arith.constant 0 : index
    %c0_91 = arith.constant 0 : index
    %189 = vector.load %arg16[%c0_89, %c0_90, %c0_91] : memref<2x1x32xf32, #tpu.memory_space<vmem>>, vector<1x1x32xf32>
    %190 = vector.shape_cast %189 : vector<1x1x32xf32> to vector<1x32xf32>
    %191 = vector.extract_strided_slice %184 {offsets = [0, 0], sizes = [16, 8], strides = [1, 1]} : vector<16x32xf32> to vector<16x8xf32>
    %192 = vector.extract_strided_slice %185 {offsets = [0, 0], sizes = [32, 8], strides = [1, 1]} : vector<32x32xf32> to vector<32x8xf32>
    %cst_92 = arith.constant dense<0.000000e+00> : vector<16x32xf32>
    %193 = tpu.matmul %191, %192, %cst_92 {dimension_numbers = #tpu.dot_dimension_numbers<[1], [1], [0], [0], [0, 0, 1, 0], [], []>} : vector<16x8xf32>, vector<32x8xf32>, vector<16x32xf32> -> vector<16x32xf32>
    %194 = vector.extract_strided_slice %184 {offsets = [0, 8], sizes = [16, 8], strides = [1, 1]} : vector<16x32xf32> to vector<16x8xf32>
    %195 = vector.extract_strided_slice %185 {offsets = [0, 8], sizes = [32, 8], strides = [1, 1]} : vector<32x32xf32> to vector<32x8xf32>
    %cst_93 = arith.constant dense<0.000000e+00> : vector<16x32xf32>
    %196 = tpu.matmul %194, %195, %cst_93 {dimension_numbers = #tpu.dot_dimension_numbers<[1], [1], [0], [0], [0, 0, 1, 0], [], []>} : vector<16x8xf32>, vector<32x8xf32>, vector<16x32xf32> -> vector<16x32xf32>
    %197 = vector.extract_strided_slice %184 {offsets = [0, 16], sizes = [16, 8], strides = [1, 1]} : vector<16x32xf32> to vector<16x8xf32>
    %198 = vector.extract_strided_slice %185 {offsets = [0, 16], sizes = [32, 8], strides = [1, 1]} : vector<32x32xf32> to vector<32x8xf32>
    %cst_94 = arith.constant dense<0.000000e+00> : vector<16x32xf32>
    %199 = tpu.matmul %197, %198, %cst_94 {dimension_numbers = #tpu.dot_dimension_numbers<[1], [1], [0], [0], [0, 0, 1, 0], [], []>} : vector<16x8xf32>, vector<32x8xf32>, vector<16x32xf32> -> vector<16x32xf32>
    %200 = vector.extract_strided_slice %184 {offsets = [0, 24], sizes = [16, 8], strides = [1, 1]} : vector<16x32xf32> to vector<16x8xf32>
    %201 = vector.extract_strided_slice %185 {offsets = [0, 24], sizes = [32, 8], strides = [1, 1]} : vector<32x32xf32> to vector<32x8xf32>
    %cst_95 = arith.constant dense<0.000000e+00> : vector<16x32xf32>
    %202 = tpu.matmul %200, %201, %cst_95 {dimension_numbers = #tpu.dot_dimension_numbers<[1], [1], [0], [0], [0, 0, 1, 0], [], []>} : vector<16x8xf32>, vector<32x8xf32>, vector<16x32xf32> -> vector<16x32xf32>
    %203 = tpu.concatenate %193, %196, %199, %202 in 0 : vector<16x32xf32>, vector<16x32xf32>, vector<16x32xf32>, vector<16x32xf32> -> vector<64x32xf32>
    %204 = arith.addf %203, %92 : vector<64x32xf32>
    %cst_96 = arith.constant dense<0xFF800000> : vector<64xf32>
    %205 = vector.multi_reduction <maximumf>, %204, %cst_96 [1] : vector<64x32xf32> to vector<64xf32>
    %206 = vector.shape_cast %205 : vector<64xf32> to vector<64x1xf32>
    %207 = vector.broadcast %206 : vector<64x1xf32> to vector<64x32xf32>
    %208 = arith.subf %204, %207 : vector<64x32xf32>
    %209 = math.exp %208 : vector<64x32xf32>
    %cst_97 = arith.constant dense<0.000000e+00> : vector<64xf32>
    %210 = vector.multi_reduction <add>, %209, %cst_97 [1] : vector<64x32xf32> to vector<64xf32>
    %211 = vector.shape_cast %210 : vector<64xf32> to vector<64x1xf32>
    %212 = tpu.reciprocal %211 {approx = true} : vector<64x1xf32> -> vector<64x1xf32>
    %213 = vector.broadcast %212 : vector<64x1xf32> to vector<64x32xf32>
    %214 = arith.mulf %209, %213 : vector<64x32xf32>
    %215 = vector.extract_strided_slice %214 {offsets = [0, 0], sizes = [16, 32], strides = [1, 1]} : vector<64x32xf32> to vector<16x32xf32>
    %216 = vector.extract_strided_slice %186 {offsets = [0, 0], sizes = [32, 8], strides = [1, 1]} : vector<32x32xf32> to vector<32x8xf32>
    %cst_98 = arith.constant dense<0.000000e+00> : vector<16x8xf32>
    %217 = tpu.matmul %215, %216, %cst_98 {dimension_numbers = #tpu.dot_dimension_numbers<[1], [0], [0], [1], [0, 0, 1, 1], [], []>} : vector<16x32xf32>, vector<32x8xf32>, vector<16x8xf32> -> vector<16x8xf32>
    %218 = vector.extract_strided_slice %214 {offsets = [16, 0], sizes = [16, 32], strides = [1, 1]} : vector<64x32xf32> to vector<16x32xf32>
    %219 = vector.extract_strided_slice %186 {offsets = [0, 8], sizes = [32, 8], strides = [1, 1]} : vector<32x32xf32> to vector<32x8xf32>
    %cst_99 = arith.constant dense<0.000000e+00> : vector<16x8xf32>
    %220 = tpu.matmul %218, %219, %cst_99 {dimension_numbers = #tpu.dot_dimension_numbers<[1], [0], [0], [1], [0, 0, 1, 1], [], []>} : vector<16x32xf32>, vector<32x8xf32>, vector<16x8xf32> -> vector<16x8xf32>
    %221 = vector.extract_strided_slice %214 {offsets = [32, 0], sizes = [16, 32], strides = [1, 1]} : vector<64x32xf32> to vector<16x32xf32>
    %222 = vector.extract_strided_slice %186 {offsets = [0, 16], sizes = [32, 8], strides = [1, 1]} : vector<32x32xf32> to vector<32x8xf32>
    %cst_100 = arith.constant dense<0.000000e+00> : vector<16x8xf32>
    %223 = tpu.matmul %221, %222, %cst_100 {dimension_numbers = #tpu.dot_dimension_numbers<[1], [0], [0], [1], [0, 0, 1, 1], [], []>} : vector<16x32xf32>, vector<32x8xf32>, vector<16x8xf32> -> vector<16x8xf32>
    %224 = vector.extract_strided_slice %214 {offsets = [48, 0], sizes = [16, 32], strides = [1, 1]} : vector<64x32xf32> to vector<16x32xf32>
    %225 = vector.extract_strided_slice %186 {offsets = [0, 24], sizes = [32, 8], strides = [1, 1]} : vector<32x32xf32> to vector<32x8xf32>
    %cst_101 = arith.constant dense<0.000000e+00> : vector<16x8xf32>
    %226 = tpu.matmul %224, %225, %cst_101 {dimension_numbers = #tpu.dot_dimension_numbers<[1], [0], [0], [1], [0, 0, 1, 1], [], []>} : vector<16x32xf32>, vector<32x8xf32>, vector<16x8xf32> -> vector<16x8xf32>
    %227 = tpu.concatenate %217, %220, %223, %226 in 1 : vector<16x8xf32>, vector<16x8xf32>, vector<16x8xf32>, vector<16x8xf32> -> vector<16x32xf32>
    %cst_102 = arith.constant dense<0.000000e+00> : vector<16x32xf32>
    %228 = tpu.matmul %227, %188, %cst_102 {dimension_numbers = #tpu.dot_dimension_numbers<[1], [0], [0], [1], [0, 0, 1, 1], [], []>} : vector<16x32xf32>, vector<32x32xf32>, vector<16x32xf32> -> vector<16x32xf32>
    %229 = vector.broadcast %190 : vector<1x32xf32> to vector<16x32xf32>
    %230 = arith.addf %228, %229 : vector<16x32xf32>
    %231 = arith.addf %176, %230 : vector<16x32xf32>
    %c0_103 = arith.constant 0 : index
    %c0_104 = arith.constant 0 : index
    %c0_105 = arith.constant 0 : index
    %232 = vector.load %arg23[%c0_103, %c0_104, %c0_105] : memref<2x1x32xf32, #tpu.memory_space<vmem>>, vector<1x1x32xf32>
    %233 = vector.shape_cast %232 : vector<1x1x32xf32> to vector<1x32xf32>
    %c0_106 = arith.constant 0 : index
    %c0_107 = arith.constant 0 : index
    %c0_108 = arith.constant 0 : index
    %234 = vector.load %arg24[%c0_106, %c0_107, %c0_108] : memref<2x1x32xf32, #tpu.memory_space<vmem>>, vector<1x1x32xf32>
    %235 = vector.shape_cast %234 : vector<1x1x32xf32> to vector<1x32xf32>
    %cst_109 = arith.constant dense<0.000000e+00> : vector<16xf32>
    %236 = vector.multi_reduction <add>, %231, %cst_109 [1] : vector<16x32xf32> to vector<16xf32>
    %237 = vector.shape_cast %236 : vector<16xf32> to vector<16x1xf32>
    %cst_110 = arith.constant 3.200000e+01 : f32
    %238 = vector.broadcast %cst_110 : f32 to vector<16x1xf32>
    %239 = arith.divf %237, %238 : vector<16x1xf32>
    %240 = vector.broadcast %239 : vector<16x1xf32> to vector<16x32xf32>
    %241 = arith.subf %231, %240 : vector<16x32xf32>
    %242 = arith.mulf %241, %241 : vector<16x32xf32>
    %cst_111 = arith.constant dense<0.000000e+00> : vector<16xf32>
    %243 = vector.multi_reduction <add>, %242, %cst_111 [1] : vector<16x32xf32> to vector<16xf32>
    %244 = vector.shape_cast %243 : vector<16xf32> to vector<16x1xf32>
    %cst_112 = arith.constant 3.200000e+01 : f32
    %245 = vector.broadcast %cst_112 : f32 to vector<16x1xf32>
    %246 = arith.divf %244, %245 : vector<16x1xf32>
    %247 = vector.broadcast %239 : vector<16x1xf32> to vector<16x32xf32>
    %248 = arith.subf %231, %247 : vector<16x32xf32>
    %cst_113 = arith.constant 9.99999974E-6 : f32
    %249 = vector.broadcast %cst_113 : f32 to vector<16x1xf32>
    %250 = arith.addf %246, %249 : vector<16x1xf32>
    %251 = math.rsqrt %250 : vector<16x1xf32>
    %252 = vector.broadcast %251 : vector<16x1xf32> to vector<16x32xf32>
    %253 = arith.mulf %248, %252 : vector<16x32xf32>
    %254 = vector.broadcast %233 : vector<1x32xf32> to vector<16x32xf32>
    %255 = arith.mulf %253, %254 : vector<16x32xf32>
    %256 = vector.broadcast %235 : vector<1x32xf32> to vector<16x32xf32>
    %257 = arith.addf %255, %256 : vector<16x32xf32>
    %c0_114 = arith.constant 0 : index
    %c0_115 = arith.constant 0 : index
    %c0_116 = arith.constant 0 : index
    %258 = vector.load %arg17[%c0_114, %c0_115, %c0_116] : memref<2x32x64xf32, #tpu.memory_space<vmem>>, vector<1x32x64xf32>
    %259 = vector.shape_cast %258 : vector<1x32x64xf32> to vector<32x64xf32>
    %cst_117 = arith.constant dense<0.000000e+00> : vector<16x64xf32>
    %260 = tpu.matmul %257, %259, %cst_117 {dimension_numbers = #tpu.dot_dimension_numbers<[1], [0], [0], [1], [0, 0, 1, 1], [], []>} : vector<16x32xf32>, vector<32x64xf32>, vector<16x64xf32> -> vector<16x64xf32>
    %c0_118 = arith.constant 0 : index
    %c0_119 = arith.constant 0 : index
    %c0_120 = arith.constant 0 : index
    %261 = vector.load %arg18[%c0_118, %c0_119, %c0_120] : memref<2x1x64xf32, #tpu.memory_space<vmem>>, vector<1x1x64xf32>
    %262 = vector.shape_cast %261 : vector<1x1x64xf32> to vector<1x64xf32>
    %263 = vector.broadcast %262 : vector<1x64xf32> to vector<16x64xf32>
    %264 = arith.addf %260, %263 : vector<16x64xf32>
    %cst_121 = arith.constant 0.000000e+00 : f32
    %265 = vector.broadcast %cst_121 : f32 to vector<16x64xf32>
    %266 = arith.maximumf %264, %265 : vector<16x64xf32>
    %c0_122 = arith.constant 0 : index
    %c0_123 = arith.constant 0 : index
    %c0_124 = arith.constant 0 : index
    %267 = vector.load %arg19[%c0_122, %c0_123, %c0_124] : memref<2x64x32xf32, #tpu.memory_space<vmem>>, vector<1x64x32xf32>
    %268 = vector.shape_cast %267 : vector<1x64x32xf32> to vector<64x32xf32>
    %cst_125 = arith.constant dense<0.000000e+00> : vector<16x32xf32>
    %269 = tpu.matmul %266, %268, %cst_125 {dimension_numbers = #tpu.dot_dimension_numbers<[1], [0], [0], [1], [0, 0, 1, 1], [], []>} : vector<16x64xf32>, vector<64x32xf32>, vector<16x32xf32> -> vector<16x32xf32>
    %c0_126 = arith.constant 0 : index
    %c0_127 = arith.constant 0 : index
    %c0_128 = arith.constant 0 : index
    %270 = vector.load %arg20[%c0_126, %c0_127, %c0_128] : memref<2x1x32xf32, #tpu.memory_space<vmem>>, vector<1x1x32xf32>
    %271 = vector.shape_cast %270 : vector<1x1x32xf32> to vector<1x32xf32>
    %272 = vector.broadcast %271 : vector<1x32xf32> to vector<16x32xf32>
    %273 = arith.addf %269, %272 : vector<16x32xf32>
    %274 = arith.addf %257, %273 : vector<16x32xf32>
    %c0_129 = arith.constant 0 : index
    %c0_130 = arith.constant 0 : index
    %c0_131 = arith.constant 0 : index
    %275 = vector.load %arg25[%c0_129, %c0_130, %c0_131] : memref<2x1x32xf32, #tpu.memory_space<vmem>>, vector<1x1x32xf32>
    %276 = vector.shape_cast %275 : vector<1x1x32xf32> to vector<1x32xf32>
    %c0_132 = arith.constant 0 : index
    %c0_133 = arith.constant 0 : index
    %c0_134 = arith.constant 0 : index
    %277 = vector.load %arg26[%c0_132, %c0_133, %c0_134] : memref<2x1x32xf32, #tpu.memory_space<vmem>>, vector<1x1x32xf32>
    %278 = vector.shape_cast %277 : vector<1x1x32xf32> to vector<1x32xf32>
    %cst_135 = arith.constant dense<0.000000e+00> : vector<16xf32>
    %279 = vector.multi_reduction <add>, %274, %cst_135 [1] : vector<16x32xf32> to vector<16xf32>
    %280 = vector.shape_cast %279 : vector<16xf32> to vector<16x1xf32>
    %cst_136 = arith.constant 3.200000e+01 : f32
    %281 = vector.broadcast %cst_136 : f32 to vector<16x1xf32>
    %282 = arith.divf %280, %281 : vector<16x1xf32>
    %283 = vector.broadcast %282 : vector<16x1xf32> to vector<16x32xf32>
    %284 = arith.subf %274, %283 : vector<16x32xf32>
    %285 = arith.mulf %284, %284 : vector<16x32xf32>
    %cst_137 = arith.constant dense<0.000000e+00> : vector<16xf32>
    %286 = vector.multi_reduction <add>, %285, %cst_137 [1] : vector<16x32xf32> to vector<16xf32>
    %287 = vector.shape_cast %286 : vector<16xf32> to vector<16x1xf32>
    %cst_138 = arith.constant 3.200000e+01 : f32
    %288 = vector.broadcast %cst_138 : f32 to vector<16x1xf32>
    %289 = arith.divf %287, %288 : vector<16x1xf32>
    %290 = vector.broadcast %282 : vector<16x1xf32> to vector<16x32xf32>
    %291 = arith.subf %274, %290 : vector<16x32xf32>
    %cst_139 = arith.constant 9.99999974E-6 : f32
    %292 = vector.broadcast %cst_139 : f32 to vector<16x1xf32>
    %293 = arith.addf %289, %292 : vector<16x1xf32>
    %294 = math.rsqrt %293 : vector<16x1xf32>
    %295 = vector.broadcast %294 : vector<16x1xf32> to vector<16x32xf32>
    %296 = arith.mulf %291, %295 : vector<16x32xf32>
    %297 = vector.broadcast %276 : vector<1x32xf32> to vector<16x32xf32>
    %298 = arith.mulf %296, %297 : vector<16x32xf32>
    %299 = vector.broadcast %278 : vector<1x32xf32> to vector<16x32xf32>
    %300 = arith.addf %298, %299 : vector<16x32xf32>
    %301 = arith.addf %300, %1 : vector<16x32xf32>
    %c1 = arith.constant 1 : index
    %c0_140 = arith.constant 0 : index
    %c0_141 = arith.constant 0 : index
    %302 = vector.load %arg4[%c1, %c0_140, %c0_141] : memref<2x32x96xf32, #tpu.memory_space<vmem>>, vector<1x32x96xf32>
    %303 = vector.shape_cast %302 : vector<1x32x96xf32> to vector<32x96xf32>
    %cst_142 = arith.constant dense<0.000000e+00> : vector<16x96xf32>
    %304 = tpu.matmul %301, %303, %cst_142 {dimension_numbers = #tpu.dot_dimension_numbers<[1], [0], [0], [1], [0, 0, 1, 1], [], []>} : vector<16x32xf32>, vector<32x96xf32>, vector<16x96xf32> -> vector<16x96xf32>
    %c1_143 = arith.constant 1 : index
    %c0_144 = arith.constant 0 : index
    %c0_145 = arith.constant 0 : index
    %305 = vector.load %arg5[%c1_143, %c0_144, %c0_145] : memref<2x1x96xf32, #tpu.memory_space<vmem>>, vector<1x1x96xf32>
    %306 = vector.shape_cast %305 : vector<1x1x96xf32> to vector<1x96xf32>
    %307 = vector.broadcast %306 : vector<1x96xf32> to vector<16x96xf32>
    %308 = arith.addf %304, %307 : vector<16x96xf32>
    %309 = vector.extract_strided_slice %308 {offsets = [0, 64], sizes = [16, 32], strides = [1, 1]} : vector<16x96xf32> to vector<16x32xf32>
    %310 = vector.extract_strided_slice %16 {offsets = [0, 32], sizes = [16, 32], strides = [1, 1]} : vector<16x64xf32> to vector<16x32xf32>
    %311 = arith.subf %309, %310 : vector<16x32xf32>
    %312 = vector.extract_strided_slice %308 {offsets = [0, 0], sizes = [16, 32], strides = [1, 1]} : vector<16x96xf32> to vector<16x32xf32>
    %313 = vector.extract_strided_slice %308 {offsets = [0, 32], sizes = [16, 32], strides = [1, 1]} : vector<16x96xf32> to vector<16x32xf32>
    %c1_146 = arith.constant 1 : index
    %c0_147 = arith.constant 0 : index
    %c0_148 = arith.constant 0 : index
    %314 = vector.load %arg7[%c1_146, %c0_147, %c0_148] : memref<2x32x32xf32, #tpu.memory_space<vmem>>, vector<1x32x32xf32>
    %315 = vector.shape_cast %314 : vector<1x32x32xf32> to vector<32x32xf32>
    %c1_149 = arith.constant 1 : index
    %c0_150 = arith.constant 0 : index
    %c0_151 = arith.constant 0 : index
    %316 = vector.load %arg8[%c1_149, %c0_150, %c0_151] : memref<2x1x32xf32, #tpu.memory_space<vmem>>, vector<1x1x32xf32>
    %317 = vector.shape_cast %316 : vector<1x1x32xf32> to vector<1x32xf32>
    %318 = vector.extract_strided_slice %312 {offsets = [0, 0], sizes = [16, 8], strides = [1, 1]} : vector<16x32xf32> to vector<16x8xf32>
    %319 = vector.extract_strided_slice %313 {offsets = [0, 0], sizes = [16, 8], strides = [1, 1]} : vector<16x32xf32> to vector<16x8xf32>
    %cst_152 = arith.constant dense<0.000000e+00> : vector<16x16xf32>
    %320 = tpu.matmul %318, %319, %cst_152 {dimension_numbers = #tpu.dot_dimension_numbers<[1], [1], [0], [0], [0, 0, 1, 0], [], []>} : vector<16x8xf32>, vector<16x8xf32>, vector<16x16xf32> -> vector<16x16xf32>
    %321 = vector.extract_strided_slice %312 {offsets = [0, 8], sizes = [16, 8], strides = [1, 1]} : vector<16x32xf32> to vector<16x8xf32>
    %322 = vector.extract_strided_slice %313 {offsets = [0, 8], sizes = [16, 8], strides = [1, 1]} : vector<16x32xf32> to vector<16x8xf32>
    %cst_153 = arith.constant dense<0.000000e+00> : vector<16x16xf32>
    %323 = tpu.matmul %321, %322, %cst_153 {dimension_numbers = #tpu.dot_dimension_numbers<[1], [1], [0], [0], [0, 0, 1, 0], [], []>} : vector<16x8xf32>, vector<16x8xf32>, vector<16x16xf32> -> vector<16x16xf32>
    %324 = vector.extract_strided_slice %312 {offsets = [0, 16], sizes = [16, 8], strides = [1, 1]} : vector<16x32xf32> to vector<16x8xf32>
    %325 = vector.extract_strided_slice %313 {offsets = [0, 16], sizes = [16, 8], strides = [1, 1]} : vector<16x32xf32> to vector<16x8xf32>
    %cst_154 = arith.constant dense<0.000000e+00> : vector<16x16xf32>
    %326 = tpu.matmul %324, %325, %cst_154 {dimension_numbers = #tpu.dot_dimension_numbers<[1], [1], [0], [0], [0, 0, 1, 0], [], []>} : vector<16x8xf32>, vector<16x8xf32>, vector<16x16xf32> -> vector<16x16xf32>
    %327 = vector.extract_strided_slice %312 {offsets = [0, 24], sizes = [16, 8], strides = [1, 1]} : vector<16x32xf32> to vector<16x8xf32>
    %328 = vector.extract_strided_slice %313 {offsets = [0, 24], sizes = [16, 8], strides = [1, 1]} : vector<16x32xf32> to vector<16x8xf32>
    %cst_155 = arith.constant dense<0.000000e+00> : vector<16x16xf32>
    %329 = tpu.matmul %327, %328, %cst_155 {dimension_numbers = #tpu.dot_dimension_numbers<[1], [1], [0], [0], [0, 0, 1, 0], [], []>} : vector<16x8xf32>, vector<16x8xf32>, vector<16x16xf32> -> vector<16x16xf32>
    %330 = tpu.concatenate %320, %323, %326, %329 in 0 : vector<16x16xf32>, vector<16x16xf32>, vector<16x16xf32>, vector<16x16xf32> -> vector<64x16xf32>
    %331 = arith.addf %330, %54 : vector<64x16xf32>
    %cst_156 = arith.constant dense<0xFF800000> : vector<64xf32>
    %332 = vector.multi_reduction <maximumf>, %331, %cst_156 [1] : vector<64x16xf32> to vector<64xf32>
    %333 = vector.shape_cast %332 : vector<64xf32> to vector<64x1xf32>
    %334 = vector.broadcast %333 : vector<64x1xf32> to vector<64x16xf32>
    %335 = arith.subf %331, %334 : vector<64x16xf32>
    %336 = math.exp %335 : vector<64x16xf32>
    %cst_157 = arith.constant dense<0.000000e+00> : vector<64xf32>
    %337 = vector.multi_reduction <add>, %336, %cst_157 [1] : vector<64x16xf32> to vector<64xf32>
    %338 = vector.shape_cast %337 : vector<64xf32> to vector<64x1xf32>
    %339 = tpu.reciprocal %338 {approx = true} : vector<64x1xf32> -> vector<64x1xf32>
    %340 = vector.broadcast %339 : vector<64x1xf32> to vector<64x16xf32>
    %341 = arith.mulf %336, %340 : vector<64x16xf32>
    %342 = vector.extract_strided_slice %341 {offsets = [0, 0], sizes = [16, 16], strides = [1, 1]} : vector<64x16xf32> to vector<16x16xf32>
    %343 = vector.extract_strided_slice %311 {offsets = [0, 0], sizes = [16, 8], strides = [1, 1]} : vector<16x32xf32> to vector<16x8xf32>
    %cst_158 = arith.constant dense<0.000000e+00> : vector<16x8xf32>
    %344 = tpu.matmul %342, %343, %cst_158 {dimension_numbers = #tpu.dot_dimension_numbers<[1], [0], [0], [1], [0, 0, 1, 1], [], []>} : vector<16x16xf32>, vector<16x8xf32>, vector<16x8xf32> -> vector<16x8xf32>
    %345 = vector.extract_strided_slice %341 {offsets = [16, 0], sizes = [16, 16], strides = [1, 1]} : vector<64x16xf32> to vector<16x16xf32>
    %346 = vector.extract_strided_slice %311 {offsets = [0, 8], sizes = [16, 8], strides = [1, 1]} : vector<16x32xf32> to vector<16x8xf32>
    %cst_159 = arith.constant dense<0.000000e+00> : vector<16x8xf32>
    %347 = tpu.matmul %345, %346, %cst_159 {dimension_numbers = #tpu.dot_dimension_numbers<[1], [0], [0], [1], [0, 0, 1, 1], [], []>} : vector<16x16xf32>, vector<16x8xf32>, vector<16x8xf32> -> vector<16x8xf32>
    %348 = vector.extract_strided_slice %341 {offsets = [32, 0], sizes = [16, 16], strides = [1, 1]} : vector<64x16xf32> to vector<16x16xf32>
    %349 = vector.extract_strided_slice %311 {offsets = [0, 16], sizes = [16, 8], strides = [1, 1]} : vector<16x32xf32> to vector<16x8xf32>
    %cst_160 = arith.constant dense<0.000000e+00> : vector<16x8xf32>
    %350 = tpu.matmul %348, %349, %cst_160 {dimension_numbers = #tpu.dot_dimension_numbers<[1], [0], [0], [1], [0, 0, 1, 1], [], []>} : vector<16x16xf32>, vector<16x8xf32>, vector<16x8xf32> -> vector<16x8xf32>
    %351 = vector.extract_strided_slice %341 {offsets = [48, 0], sizes = [16, 16], strides = [1, 1]} : vector<64x16xf32> to vector<16x16xf32>
    %352 = vector.extract_strided_slice %311 {offsets = [0, 24], sizes = [16, 8], strides = [1, 1]} : vector<16x32xf32> to vector<16x8xf32>
    %cst_161 = arith.constant dense<0.000000e+00> : vector<16x8xf32>
    %353 = tpu.matmul %351, %352, %cst_161 {dimension_numbers = #tpu.dot_dimension_numbers<[1], [0], [0], [1], [0, 0, 1, 1], [], []>} : vector<16x16xf32>, vector<16x8xf32>, vector<16x8xf32> -> vector<16x8xf32>
    %354 = tpu.concatenate %344, %347, %350, %353 in 1 : vector<16x8xf32>, vector<16x8xf32>, vector<16x8xf32>, vector<16x8xf32> -> vector<16x32xf32>
    %cst_162 = arith.constant dense<0.000000e+00> : vector<16x32xf32>
    %355 = tpu.matmul %354, %315, %cst_162 {dimension_numbers = #tpu.dot_dimension_numbers<[1], [0], [0], [1], [0, 0, 1, 1], [], []>} : vector<16x32xf32>, vector<32x32xf32>, vector<16x32xf32> -> vector<16x32xf32>
    %356 = vector.broadcast %317 : vector<1x32xf32> to vector<16x32xf32>
    %357 = arith.addf %355, %356 : vector<16x32xf32>
    %358 = arith.addf %300, %357 : vector<16x32xf32>
    %c1_163 = arith.constant 1 : index
    %c0_164 = arith.constant 0 : index
    %c0_165 = arith.constant 0 : index
    %359 = vector.load %arg21[%c1_163, %c0_164, %c0_165] : memref<2x1x32xf32, #tpu.memory_space<vmem>>, vector<1x1x32xf32>
    %360 = vector.shape_cast %359 : vector<1x1x32xf32> to vector<1x32xf32>
    %c1_166 = arith.constant 1 : index
    %c0_167 = arith.constant 0 : index
    %c0_168 = arith.constant 0 : index
    %361 = vector.load %arg22[%c1_166, %c0_167, %c0_168] : memref<2x1x32xf32, #tpu.memory_space<vmem>>, vector<1x1x32xf32>
    %362 = vector.shape_cast %361 : vector<1x1x32xf32> to vector<1x32xf32>
    %cst_169 = arith.constant dense<0.000000e+00> : vector<16xf32>
    %363 = vector.multi_reduction <add>, %358, %cst_169 [1] : vector<16x32xf32> to vector<16xf32>
    %364 = vector.shape_cast %363 : vector<16xf32> to vector<16x1xf32>
    %cst_170 = arith.constant 3.200000e+01 : f32
    %365 = vector.broadcast %cst_170 : f32 to vector<16x1xf32>
    %366 = arith.divf %364, %365 : vector<16x1xf32>
    %367 = vector.broadcast %366 : vector<16x1xf32> to vector<16x32xf32>
    %368 = arith.subf %358, %367 : vector<16x32xf32>
    %369 = arith.mulf %368, %368 : vector<16x32xf32>
    %cst_171 = arith.constant dense<0.000000e+00> : vector<16xf32>
    %370 = vector.multi_reduction <add>, %369, %cst_171 [1] : vector<16x32xf32> to vector<16xf32>
    %371 = vector.shape_cast %370 : vector<16xf32> to vector<16x1xf32>
    %cst_172 = arith.constant 3.200000e+01 : f32
    %372 = vector.broadcast %cst_172 : f32 to vector<16x1xf32>
    %373 = arith.divf %371, %372 : vector<16x1xf32>
    %374 = vector.broadcast %366 : vector<16x1xf32> to vector<16x32xf32>
    %375 = arith.subf %358, %374 : vector<16x32xf32>
    %cst_173 = arith.constant 9.99999974E-6 : f32
    %376 = vector.broadcast %cst_173 : f32 to vector<16x1xf32>
    %377 = arith.addf %373, %376 : vector<16x1xf32>
    %378 = math.rsqrt %377 : vector<16x1xf32>
    %379 = vector.broadcast %378 : vector<16x1xf32> to vector<16x32xf32>
    %380 = arith.mulf %375, %379 : vector<16x32xf32>
    %381 = vector.broadcast %360 : vector<1x32xf32> to vector<16x32xf32>
    %382 = arith.mulf %380, %381 : vector<16x32xf32>
    %383 = vector.broadcast %362 : vector<1x32xf32> to vector<16x32xf32>
    %384 = arith.addf %382, %383 : vector<16x32xf32>
    %385 = arith.addf %384, %1 : vector<16x32xf32>
    %c1_174 = arith.constant 1 : index
    %c0_175 = arith.constant 0 : index
    %c0_176 = arith.constant 0 : index
    %386 = vector.load %arg9[%c1_174, %c0_175, %c0_176] : memref<2x32x32xf32, #tpu.memory_space<vmem>>, vector<1x32x32xf32>
    %387 = vector.shape_cast %386 : vector<1x32x32xf32> to vector<32x32xf32>
    %cst_177 = arith.constant dense<0.000000e+00> : vector<16x32xf32>
    %388 = tpu.matmul %385, %387, %cst_177 {dimension_numbers = #tpu.dot_dimension_numbers<[1], [0], [0], [1], [0, 0, 1, 1], [], []>} : vector<16x32xf32>, vector<32x32xf32>, vector<16x32xf32> -> vector<16x32xf32>
    %c1_178 = arith.constant 1 : index
    %c0_179 = arith.constant 0 : index
    %c0_180 = arith.constant 0 : index
    %389 = vector.load %arg10[%c1_178, %c0_179, %c0_180] : memref<2x1x32xf32, #tpu.memory_space<vmem>>, vector<1x1x32xf32>
    %390 = vector.shape_cast %389 : vector<1x1x32xf32> to vector<1x32xf32>
    %391 = vector.broadcast %390 : vector<1x32xf32> to vector<16x32xf32>
    %392 = arith.addf %388, %391 : vector<16x32xf32>
    %393 = vector.extract_strided_slice %9 {offsets = [0, 32], sizes = [32, 32], strides = [1, 1]} : vector<32x64xf32> to vector<32x32xf32>
    %394 = vector.extract_strided_slice %14 {offsets = [0, 32], sizes = [32, 32], strides = [1, 1]} : vector<32x64xf32> to vector<32x32xf32>
    %c1_181 = arith.constant 1 : index
    %c0_182 = arith.constant 0 : index
    %c0_183 = arith.constant 0 : index
    %395 = vector.load %arg15[%c1_181, %c0_182, %c0_183] : memref<2x32x32xf32, #tpu.memory_space<vmem>>, vector<1x32x32xf32>
    %396 = vector.shape_cast %395 : vector<1x32x32xf32> to vector<32x32xf32>
    %c1_184 = arith.constant 1 : index
    %c0_185 = arith.constant 0 : index
    %c0_186 = arith.constant 0 : index
    %397 = vector.load %arg16[%c1_184, %c0_185, %c0_186] : memref<2x1x32xf32, #tpu.memory_space<vmem>>, vector<1x1x32xf32>
    %398 = vector.shape_cast %397 : vector<1x1x32xf32> to vector<1x32xf32>
    %399 = vector.extract_strided_slice %392 {offsets = [0, 0], sizes = [16, 8], strides = [1, 1]} : vector<16x32xf32> to vector<16x8xf32>
    %400 = vector.extract_strided_slice %393 {offsets = [0, 0], sizes = [32, 8], strides = [1, 1]} : vector<32x32xf32> to vector<32x8xf32>
    %cst_187 = arith.constant dense<0.000000e+00> : vector<16x32xf32>
    %401 = tpu.matmul %399, %400, %cst_187 {dimension_numbers = #tpu.dot_dimension_numbers<[1], [1], [0], [0], [0, 0, 1, 0], [], []>} : vector<16x8xf32>, vector<32x8xf32>, vector<16x32xf32> -> vector<16x32xf32>
    %402 = vector.extract_strided_slice %392 {offsets = [0, 8], sizes = [16, 8], strides = [1, 1]} : vector<16x32xf32> to vector<16x8xf32>
    %403 = vector.extract_strided_slice %393 {offsets = [0, 8], sizes = [32, 8], strides = [1, 1]} : vector<32x32xf32> to vector<32x8xf32>
    %cst_188 = arith.constant dense<0.000000e+00> : vector<16x32xf32>
    %404 = tpu.matmul %402, %403, %cst_188 {dimension_numbers = #tpu.dot_dimension_numbers<[1], [1], [0], [0], [0, 0, 1, 0], [], []>} : vector<16x8xf32>, vector<32x8xf32>, vector<16x32xf32> -> vector<16x32xf32>
    %405 = vector.extract_strided_slice %392 {offsets = [0, 16], sizes = [16, 8], strides = [1, 1]} : vector<16x32xf32> to vector<16x8xf32>
    %406 = vector.extract_strided_slice %393 {offsets = [0, 16], sizes = [32, 8], strides = [1, 1]} : vector<32x32xf32> to vector<32x8xf32>
    %cst_189 = arith.constant dense<0.000000e+00> : vector<16x32xf32>
    %407 = tpu.matmul %405, %406, %cst_189 {dimension_numbers = #tpu.dot_dimension_numbers<[1], [1], [0], [0], [0, 0, 1, 0], [], []>} : vector<16x8xf32>, vector<32x8xf32>, vector<16x32xf32> -> vector<16x32xf32>
    %408 = vector.extract_strided_slice %392 {offsets = [0, 24], sizes = [16, 8], strides = [1, 1]} : vector<16x32xf32> to vector<16x8xf32>
    %409 = vector.extract_strided_slice %393 {offsets = [0, 24], sizes = [32, 8], strides = [1, 1]} : vector<32x32xf32> to vector<32x8xf32>
    %cst_190 = arith.constant dense<0.000000e+00> : vector<16x32xf32>
    %410 = tpu.matmul %408, %409, %cst_190 {dimension_numbers = #tpu.dot_dimension_numbers<[1], [1], [0], [0], [0, 0, 1, 0], [], []>} : vector<16x8xf32>, vector<32x8xf32>, vector<16x32xf32> -> vector<16x32xf32>
    %411 = tpu.concatenate %401, %404, %407, %410 in 0 : vector<16x32xf32>, vector<16x32xf32>, vector<16x32xf32>, vector<16x32xf32> -> vector<64x32xf32>
    %412 = arith.addf %411, %92 : vector<64x32xf32>
    %cst_191 = arith.constant dense<0xFF800000> : vector<64xf32>
    %413 = vector.multi_reduction <maximumf>, %412, %cst_191 [1] : vector<64x32xf32> to vector<64xf32>
    %414 = vector.shape_cast %413 : vector<64xf32> to vector<64x1xf32>
    %415 = vector.broadcast %414 : vector<64x1xf32> to vector<64x32xf32>
    %416 = arith.subf %412, %415 : vector<64x32xf32>
    %417 = math.exp %416 : vector<64x32xf32>
    %cst_192 = arith.constant dense<0.000000e+00> : vector<64xf32>
    %418 = vector.multi_reduction <add>, %417, %cst_192 [1] : vector<64x32xf32> to vector<64xf32>
    %419 = vector.shape_cast %418 : vector<64xf32> to vector<64x1xf32>
    %420 = tpu.reciprocal %419 {approx = true} : vector<64x1xf32> -> vector<64x1xf32>
    %421 = vector.broadcast %420 : vector<64x1xf32> to vector<64x32xf32>
    %422 = arith.mulf %417, %421 : vector<64x32xf32>
    %423 = vector.extract_strided_slice %422 {offsets = [0, 0], sizes = [16, 32], strides = [1, 1]} : vector<64x32xf32> to vector<16x32xf32>
    %424 = vector.extract_strided_slice %394 {offsets = [0, 0], sizes = [32, 8], strides = [1, 1]} : vector<32x32xf32> to vector<32x8xf32>
    %cst_193 = arith.constant dense<0.000000e+00> : vector<16x8xf32>
    %425 = tpu.matmul %423, %424, %cst_193 {dimension_numbers = #tpu.dot_dimension_numbers<[1], [0], [0], [1], [0, 0, 1, 1], [], []>} : vector<16x32xf32>, vector<32x8xf32>, vector<16x8xf32> -> vector<16x8xf32>
    %426 = vector.extract_strided_slice %422 {offsets = [16, 0], sizes = [16, 32], strides = [1, 1]} : vector<64x32xf32> to vector<16x32xf32>
    %427 = vector.extract_strided_slice %394 {offsets = [0, 8], sizes = [32, 8], strides = [1, 1]} : vector<32x32xf32> to vector<32x8xf32>
    %cst_194 = arith.constant dense<0.000000e+00> : vector<16x8xf32>
    %428 = tpu.matmul %426, %427, %cst_194 {dimension_numbers = #tpu.dot_dimension_numbers<[1], [0], [0], [1], [0, 0, 1, 1], [], []>} : vector<16x32xf32>, vector<32x8xf32>, vector<16x8xf32> -> vector<16x8xf32>
    %429 = vector.extract_strided_slice %422 {offsets = [32, 0], sizes = [16, 32], strides = [1, 1]} : vector<64x32xf32> to vector<16x32xf32>
    %430 = vector.extract_strided_slice %394 {offsets = [0, 16], sizes = [32, 8], strides = [1, 1]} : vector<32x32xf32> to vector<32x8xf32>
    %cst_195 = arith.constant dense<0.000000e+00> : vector<16x8xf32>
    %431 = tpu.matmul %429, %430, %cst_195 {dimension_numbers = #tpu.dot_dimension_numbers<[1], [0], [0], [1], [0, 0, 1, 1], [], []>} : vector<16x32xf32>, vector<32x8xf32>, vector<16x8xf32> -> vector<16x8xf32>
    %432 = vector.extract_strided_slice %422 {offsets = [48, 0], sizes = [16, 32], strides = [1, 1]} : vector<64x32xf32> to vector<16x32xf32>
    %433 = vector.extract_strided_slice %394 {offsets = [0, 24], sizes = [32, 8], strides = [1, 1]} : vector<32x32xf32> to vector<32x8xf32>
    %cst_196 = arith.constant dense<0.000000e+00> : vector<16x8xf32>
    %434 = tpu.matmul %432, %433, %cst_196 {dimension_numbers = #tpu.dot_dimension_numbers<[1], [0], [0], [1], [0, 0, 1, 1], [], []>} : vector<16x32xf32>, vector<32x8xf32>, vector<16x8xf32> -> vector<16x8xf32>
    %435 = tpu.concatenate %425, %428, %431, %434 in 1 : vector<16x8xf32>, vector<16x8xf32>, vector<16x8xf32>, vector<16x8xf32> -> vector<16x32xf32>
    %cst_197 = arith.constant dense<0.000000e+00> : vector<16x32xf32>
    %436 = tpu.matmul %435, %396, %cst_197 {dimension_numbers = #tpu.dot_dimension_numbers<[1], [0], [0], [1], [0, 0, 1, 1], [], []>} : vector<16x32xf32>, vector<32x32xf32>, vector<16x32xf32> -> vector<16x32xf32>
    %437 = vector.broadcast %398 : vector<1x32xf32> to vector<16x32xf32>
    %438 = arith.addf %436, %437 : vector<16x32xf32>
    %439 = arith.addf %384, %438 : vector<16x32xf32>
    %c1_198 = arith.constant 1 : index
    %c0_199 = arith.constant 0 : index
    %c0_200 = arith.constant 0 : index
    %440 = vector.load %arg23[%c1_198, %c0_199, %c0_200] : memref<2x1x32xf32, #tpu.memory_space<vmem>>, vector<1x1x32xf32>
    %441 = vector.shape_cast %440 : vector<1x1x32xf32> to vector<1x32xf32>
    %c1_201 = arith.constant 1 : index
    %c0_202 = arith.constant 0 : index
    %c0_203 = arith.constant 0 : index
    %442 = vector.load %arg24[%c1_201, %c0_202, %c0_203] : memref<2x1x32xf32, #tpu.memory_space<vmem>>, vector<1x1x32xf32>
    %443 = vector.shape_cast %442 : vector<1x1x32xf32> to vector<1x32xf32>
    %cst_204 = arith.constant dense<0.000000e+00> : vector<16xf32>
    %444 = vector.multi_reduction <add>, %439, %cst_204 [1] : vector<16x32xf32> to vector<16xf32>
    %445 = vector.shape_cast %444 : vector<16xf32> to vector<16x1xf32>
    %cst_205 = arith.constant 3.200000e+01 : f32
    %446 = vector.broadcast %cst_205 : f32 to vector<16x1xf32>
    %447 = arith.divf %445, %446 : vector<16x1xf32>
    %448 = vector.broadcast %447 : vector<16x1xf32> to vector<16x32xf32>
    %449 = arith.subf %439, %448 : vector<16x32xf32>
    %450 = arith.mulf %449, %449 : vector<16x32xf32>
    %cst_206 = arith.constant dense<0.000000e+00> : vector<16xf32>
    %451 = vector.multi_reduction <add>, %450, %cst_206 [1] : vector<16x32xf32> to vector<16xf32>
    %452 = vector.shape_cast %451 : vector<16xf32> to vector<16x1xf32>
    %cst_207 = arith.constant 3.200000e+01 : f32
    %453 = vector.broadcast %cst_207 : f32 to vector<16x1xf32>
    %454 = arith.divf %452, %453 : vector<16x1xf32>
    %455 = vector.broadcast %447 : vector<16x1xf32> to vector<16x32xf32>
    %456 = arith.subf %439, %455 : vector<16x32xf32>
    %cst_208 = arith.constant 9.99999974E-6 : f32
    %457 = vector.broadcast %cst_208 : f32 to vector<16x1xf32>
    %458 = arith.addf %454, %457 : vector<16x1xf32>
    %459 = math.rsqrt %458 : vector<16x1xf32>
    %460 = vector.broadcast %459 : vector<16x1xf32> to vector<16x32xf32>
    %461 = arith.mulf %456, %460 : vector<16x32xf32>
    %462 = vector.broadcast %441 : vector<1x32xf32> to vector<16x32xf32>
    %463 = arith.mulf %461, %462 : vector<16x32xf32>
    %464 = vector.broadcast %443 : vector<1x32xf32> to vector<16x32xf32>
    %465 = arith.addf %463, %464 : vector<16x32xf32>
    %c1_209 = arith.constant 1 : index
    %c0_210 = arith.constant 0 : index
    %c0_211 = arith.constant 0 : index
    %466 = vector.load %arg17[%c1_209, %c0_210, %c0_211] : memref<2x32x64xf32, #tpu.memory_space<vmem>>, vector<1x32x64xf32>
    %467 = vector.shape_cast %466 : vector<1x32x64xf32> to vector<32x64xf32>
    %cst_212 = arith.constant dense<0.000000e+00> : vector<16x64xf32>
    %468 = tpu.matmul %465, %467, %cst_212 {dimension_numbers = #tpu.dot_dimension_numbers<[1], [0], [0], [1], [0, 0, 1, 1], [], []>} : vector<16x32xf32>, vector<32x64xf32>, vector<16x64xf32> -> vector<16x64xf32>
    %c1_213 = arith.constant 1 : index
    %c0_214 = arith.constant 0 : index
    %c0_215 = arith.constant 0 : index
    %469 = vector.load %arg18[%c1_213, %c0_214, %c0_215] : memref<2x1x64xf32, #tpu.memory_space<vmem>>, vector<1x1x64xf32>
    %470 = vector.shape_cast %469 : vector<1x1x64xf32> to vector<1x64xf32>
    %471 = vector.broadcast %470 : vector<1x64xf32> to vector<16x64xf32>
    %472 = arith.addf %468, %471 : vector<16x64xf32>
    %cst_216 = arith.constant 0.000000e+00 : f32
    %473 = vector.broadcast %cst_216 : f32 to vector<16x64xf32>
    %474 = arith.maximumf %472, %473 : vector<16x64xf32>
    %c1_217 = arith.constant 1 : index
    %c0_218 = arith.constant 0 : index
    %c0_219 = arith.constant 0 : index
    %475 = vector.load %arg19[%c1_217, %c0_218, %c0_219] : memref<2x64x32xf32, #tpu.memory_space<vmem>>, vector<1x64x32xf32>
    %476 = vector.shape_cast %475 : vector<1x64x32xf32> to vector<64x32xf32>
    %cst_220 = arith.constant dense<0.000000e+00> : vector<16x32xf32>
    %477 = tpu.matmul %474, %476, %cst_220 {dimension_numbers = #tpu.dot_dimension_numbers<[1], [0], [0], [1], [0, 0, 1, 1], [], []>} : vector<16x64xf32>, vector<64x32xf32>, vector<16x32xf32> -> vector<16x32xf32>
    %c1_221 = arith.constant 1 : index
    %c0_222 = arith.constant 0 : index
    %c0_223 = arith.constant 0 : index
    %478 = vector.load %arg20[%c1_221, %c0_222, %c0_223] : memref<2x1x32xf32, #tpu.memory_space<vmem>>, vector<1x1x32xf32>
    %479 = vector.shape_cast %478 : vector<1x1x32xf32> to vector<1x32xf32>
    %480 = vector.broadcast %479 : vector<1x32xf32> to vector<16x32xf32>
    %481 = arith.addf %477, %480 : vector<16x32xf32>
    %482 = arith.addf %465, %481 : vector<16x32xf32>
    %c1_224 = arith.constant 1 : index
    %c0_225 = arith.constant 0 : index
    %c0_226 = arith.constant 0 : index
    %483 = vector.load %arg25[%c1_224, %c0_225, %c0_226] : memref<2x1x32xf32, #tpu.memory_space<vmem>>, vector<1x1x32xf32>
    %484 = vector.shape_cast %483 : vector<1x1x32xf32> to vector<1x32xf32>
    %c1_227 = arith.constant 1 : index
    %c0_228 = arith.constant 0 : index
    %c0_229 = arith.constant 0 : index
    %485 = vector.load %arg26[%c1_227, %c0_228, %c0_229] : memref<2x1x32xf32, #tpu.memory_space<vmem>>, vector<1x1x32xf32>
    %486 = vector.shape_cast %485 : vector<1x1x32xf32> to vector<1x32xf32>
    %cst_230 = arith.constant dense<0.000000e+00> : vector<16xf32>
    %487 = vector.multi_reduction <add>, %482, %cst_230 [1] : vector<16x32xf32> to vector<16xf32>
    %488 = vector.shape_cast %487 : vector<16xf32> to vector<16x1xf32>
    %cst_231 = arith.constant 3.200000e+01 : f32
    %489 = vector.broadcast %cst_231 : f32 to vector<16x1xf32>
    %490 = arith.divf %488, %489 : vector<16x1xf32>
    %491 = vector.broadcast %490 : vector<16x1xf32> to vector<16x32xf32>
    %492 = arith.subf %482, %491 : vector<16x32xf32>
    %493 = arith.mulf %492, %492 : vector<16x32xf32>
    %cst_232 = arith.constant dense<0.000000e+00> : vector<16xf32>
    %494 = vector.multi_reduction <add>, %493, %cst_232 [1] : vector<16x32xf32> to vector<16xf32>
    %495 = vector.shape_cast %494 : vector<16xf32> to vector<16x1xf32>
    %cst_233 = arith.constant 3.200000e+01 : f32
    %496 = vector.broadcast %cst_233 : f32 to vector<16x1xf32>
    %497 = arith.divf %495, %496 : vector<16x1xf32>
    %498 = vector.broadcast %490 : vector<16x1xf32> to vector<16x32xf32>
    %499 = arith.subf %482, %498 : vector<16x32xf32>
    %cst_234 = arith.constant 9.99999974E-6 : f32
    %500 = vector.broadcast %cst_234 : f32 to vector<16x1xf32>
    %501 = arith.addf %497, %500 : vector<16x1xf32>
    %502 = math.rsqrt %501 : vector<16x1xf32>
    %503 = vector.broadcast %502 : vector<16x1xf32> to vector<16x32xf32>
    %504 = arith.mulf %499, %503 : vector<16x32xf32>
    %505 = vector.broadcast %484 : vector<1x32xf32> to vector<16x32xf32>
    %506 = arith.mulf %504, %505 : vector<16x32xf32>
    %507 = vector.broadcast %486 : vector<1x32xf32> to vector<16x32xf32>
    %508 = arith.addf %506, %507 : vector<16x32xf32>
    %c0_235 = arith.constant 0 : index
    %c0_236 = arith.constant 0 : index
    %509 = vector.load %arg27[%c0_235, %c0_236] : memref<1x32xf32, #tpu.memory_space<vmem>>, vector<1x32xf32>
    %c0_237 = arith.constant 0 : index
    %c0_238 = arith.constant 0 : index
    %510 = vector.load %arg28[%c0_237, %c0_238] : memref<1x32xf32, #tpu.memory_space<vmem>>, vector<1x32xf32>
    %cst_239 = arith.constant dense<0.000000e+00> : vector<16xf32>
    %511 = vector.multi_reduction <add>, %508, %cst_239 [1] : vector<16x32xf32> to vector<16xf32>
    %512 = vector.shape_cast %511 : vector<16xf32> to vector<16x1xf32>
    %cst_240 = arith.constant 3.200000e+01 : f32
    %513 = vector.broadcast %cst_240 : f32 to vector<16x1xf32>
    %514 = arith.divf %512, %513 : vector<16x1xf32>
    %515 = vector.broadcast %514 : vector<16x1xf32> to vector<16x32xf32>
    %516 = arith.subf %508, %515 : vector<16x32xf32>
    %517 = arith.mulf %516, %516 : vector<16x32xf32>
    %cst_241 = arith.constant dense<0.000000e+00> : vector<16xf32>
    %518 = vector.multi_reduction <add>, %517, %cst_241 [1] : vector<16x32xf32> to vector<16xf32>
    %519 = vector.shape_cast %518 : vector<16xf32> to vector<16x1xf32>
    %cst_242 = arith.constant 3.200000e+01 : f32
    %520 = vector.broadcast %cst_242 : f32 to vector<16x1xf32>
    %521 = arith.divf %519, %520 : vector<16x1xf32>
    %522 = vector.broadcast %514 : vector<16x1xf32> to vector<16x32xf32>
    %523 = arith.subf %508, %522 : vector<16x32xf32>
    %cst_243 = arith.constant 9.99999974E-6 : f32
    %524 = vector.broadcast %cst_243 : f32 to vector<16x1xf32>
    %525 = arith.addf %521, %524 : vector<16x1xf32>
    %526 = math.rsqrt %525 : vector<16x1xf32>
    %527 = vector.broadcast %526 : vector<16x1xf32> to vector<16x32xf32>
    %528 = arith.mulf %523, %527 : vector<16x32xf32>
    %529 = vector.broadcast %509 : vector<1x32xf32> to vector<16x32xf32>
    %530 = arith.mulf %528, %529 : vector<16x32xf32>
    %531 = vector.broadcast %510 : vector<1x32xf32> to vector<16x32xf32>
    %532 = arith.addf %530, %531 : vector<16x32xf32>
    %c0_244 = arith.constant 0 : index
    %c0_245 = arith.constant 0 : index
    %533 = vector.load %arg29[%c0_244, %c0_245] : memref<16x32xf32, #tpu.memory_space<vmem>>, vector<16x32xf32>
    tpu.vector_store %arg29[%c0_244, %c0_245], %532 {strides = array<i32>} : memref<16x32xf32, #tpu.memory_space<vmem>>, vector<16x32xf32>,
    return
  }
}

</mosaic_0001>

<bundles_post_ra>
// kernel: transformer_decoder.1
= control target key start
LH: loop header
LB: loop body
LE: loop exit
PB: predicated region body
PF: predicated region fallthrough
CT: control target
= control target key end

     0   :  { %s8147_s6 = smov 1   ;;  %s8148_s10 = smov 2   ;;  %s9365_s0 = inlined_call_operand.smem [shape: u32[30], index: -1, kind: input, shape index: {}] }
   0x1   :  { %s8225_s5 = sld [smem:[%s9365_s0]]   ;;  %s8149_s14 = smov 3  }
   0x2   :  { %s8230_s9 = sld [smem:[%s9365_s0 + %s8147_s6]]   ;;  %s8150_s18 = smov 4  }
   0x3   :  { %s8235_s13 = sld [smem:[%s9365_s0 + %s8148_s10]]   ;;  %s8151_s22 = smov 5  }
   0x4   :  { %s8240_s17 = sld [smem:[%s9365_s0 + %s8149_s14]]   ;;  %s8152_s26 = smov 6  }
   0x5   :  { %s8245_s21 = sld [smem:[%s9365_s0 + %s8150_s18]]   ;;  %s8153_s30 = smov 7  }
   0x6   :  { %s8250_s25 = sld [smem:[%s9365_s0 + %s8151_s22]]   ;;  %s8154_s4 = smov 8  }
   0x7   :  { %s8255_s29 = sld [smem:[%s9365_s0 + %s8152_s26]]   ;;  %s8155_s10 = smov 9  }
   0x8   :  { %9377 = sst [smem:[#allocation51_spill]] %s8230_s9  ;;  %s8156_s15 = smov 10  }
   0x9   :  { %s8260_s3 = sld [smem:[%s9365_s0 + %s8153_s30]]   ;;  %s8157_s20 = smov 11  }
   0xa   :  { %9378 = sst [smem:[#allocation52_spill]] %s8240_s17  ;;  %s8158_s26 = smov 12  }
   0xb   :  { %9379 = sst [smem:[#allocation53_spill]] %s8245_s21  ;;  %s8159_s1 = smov 13  }
   0xc   :  { %s8265_s8 = sld [smem:[%s9365_s0 + %s8154_s4]]   ;;  %s8160_s7 = smov 14  }
   0xd   :  { %s8270_s14 = sld [smem:[%s9365_s0 + %s8155_s10]]   ;;  %s8162_s22 = smov 16  }
   0xe   :  { %s8275_s19 = sld [smem:[%s9365_s0 + %s8156_s15]]   ;;  %s8161_s15 = smov 15  }
   0xf   :  { %9380 = sst [smem:[#allocation54_spill]] %s8260_s3  ;;  %s8163_s28 = smov 17  }
  0x10   :  { %s8280_s24 = sld [smem:[%s9365_s0 + %s8157_s20]]  }
  0x11   :  { %s8285_s30 = sld [smem:[%s9365_s0 + %s8158_s26]]  }
  0x12   :  { %s8290_s6 = sld [smem:[%s9365_s0 + %s8159_s1]]  }
  0x13   :  { %9381 = sst [smem:[#allocation55_spill]] %s8270_s14 }
  0x14   :  { %s8295_s12 = sld [smem:[%s9365_s0 + %s8160_s7]]   ;;  %s8164_s7 = smov 18  }
  0x15   :  { %s8300_s20 = sld [smem:[%s9365_s0 + %s8161_s15]]   ;;  %s8165_s15 = smov 19  }
  0x16   :  { %s8305_s27 = sld [smem:[%s9365_s0 + %s8162_s22]]   ;;  %s8166_s22 = smov 20  }
  0x17   :  { %9382 = sst [smem:[#allocation56_spill]] %s8285_s30 }
  0x18   :  { %s8310_s4 = sld [smem:[%s9365_s0 + %s8163_s28]]   ;;  %s8167_s28 = smov 21  }
  0x19   :  { %s8315_s14 = sld [smem:[%s9365_s0 + %s8164_s7]]   ;;  %s8168_s7 = smov 22  }
  0x1a   :  { %s8320_s3 = sld [smem:[%s9365_s0 + %s8165_s15]]   ;;  %s8169_s15 = smov 23  }
  0x1b   :  { %s8325_s30 = sld [smem:[%s9365_s0 + %s8166_s22]]   ;;  %s8170_s22 = smov 24  }
  0x1c   :  { %9383 = sst [smem:[#allocation57_spill]] %s8305_s27 }
  0x1d   :  { %s8330_s21 = sld [smem:[%s9365_s0 + %s8167_s28]]   ;;  %s8171_s28 = smov 25  }
  0x1e   :  { %s8335_s17 = sld [smem:[%s9365_s0 + %s8168_s7]]   ;;  %s8172_s7 = smov 26  }
  0x1f   :  { %9384 = sst [smem:[#allocation58_spill]] %s8315_s14 }
  0x20   :  { %9385 = sst [smem:[#allocation59_spill]] %s8320_s3 }
  0x21   :  { %s8340_s3 = sld [smem:[%s9365_s0 + %s8169_s15]]   ;;  %s8173_s15 = smov 27  }
  0x22   :  { %s8345_s9 = sld [smem:[%s9365_s0 + %s8170_s22]]   ;;  %s8174_s22 = smov 28  }
  0x23   :  { %9386 = sst [smem:[#allocation60_spill]] %s8330_s21 }
  0x24   :  { %s8350_s21 = sld [smem:[%s9365_s0 + %s8171_s28]]   ;;  %s8175_s28 = smov 29  }
  0x25   :  { %s8355_s14 = sld [smem:[%s9365_s0 + %s8172_s7]]  }
  0x26   :  { %s8365_s27 = sld [smem:[%s9365_s0 + %s8174_s22]]  }
  0x27   :  { %9387 = sst [smem:[#allocation61_spill]] %s8340_s3 }
  0x28   :  { %s8360_s3 = sld [smem:[%s9365_s0 + %s8173_s15]]  }
  0x2a   :  { %9388 = sst [smem:[#allocation62_spill]] %s8350_s21 }
  0x2b   :  { %s8370_s21 = sld [smem:[%s9365_s0 + %s8175_s28]]  }
  0x2c   :  { %64 = vsyncpa [#allocation3], 0 }
  0x2d   :  { %65 = vsyncpa [#allocation6], 0 }
  0x2e   :  { %66 = vsyncpa [#allocation9], 0 }
  0x2f   :  { %67 = vsyncpa [#allocation12], 0 }
  0x30   :  { %68 = vsyncpa [#allocation15], 0 }
  0x31   :  { %69 = vsyncpa [#allocation18], 0 }
  0x32   :  { %70 = vsyncpa [#allocation21], 0 }
  0x33   :  { %71 = vsyncpa [#allocation24], 0 }
  0x34   :  { %72 = vsyncpa [#allocation27], 0 }
  0x35   :  { %73 = vsyncpa [#allocation30], 0 }
  0x36   :  { %74 = vsyncpa [#allocation33], 0 }
  0x37   :  { %75 = vsyncpa [#allocation36], 0 }
  0x38   :  { %76 = vsyncpa [#allocation4], 0  ;;  %s8176_s7 = smov [#allocation5]   ;;  %s8177_s0 = smov [#allocation8]  }
  0x39   :  { %s96_s10 = sshll.u32 %s8176_s7, 4  ;;  %s124_s11 = sshll.u32 %s8177_s0, 4  ;;  %s97_s10 = int_to_ptr.vmem [resolvable:$true] %s96_s10  ;;  %s8372_s11 = int_to_ptr.vmem [resolvable:$true] %s124_s11 }
  0x3a   :  { %s7615_s15 = scalar_lea.hbm %s8235_s13, 512 }
  0x3b   :  { %p7616_p0 = scmp.ne.s32.totalorder %s8235_s13, %s7615_s15  ;;  %p7619_p1 = scmp.lt.u32.totalorder %s7615_s15, %s8235_s13 }
  0x3d   :  { %p7621_p2 = pnand %p7619_p1, %p7616_p0 }
  0x3f   :  { %7624 = shalt.err (!%p7621_p2)
}
  0x40   :  { %s7625_s16 = scalar_lea.vmem %s97_s10, 512  ;;  %p7630_p4 = scmp.lt.s32.totalorder %s97_s10, %s97_s10 }
  0x41   :  { %p7626_p3 = scmp.ne.s32.totalorder %s97_s10, %s7625_s16  ;;  %p7631_p5 = scmp.lt.s32.totalorder %s7625_s16, %s7625_s16 }
  0x43   :  { %p7632_p6 = por %p7631_p5, %p7630_p4 }
  0x45   :  { %p7633_p7 = pnand %p7632_p6, %p7626_p3 }
  0x47   :  { %7636 = shalt.err (!%p7633_p7)
}
  0x48   :  { %s8178_s18 = smov 128   ;;  %s8179_s22 = smov 8  }
  0x49   :  { %102 = dma.hbm_to_vmem [thread:$0]  %s8235_s13, 512, %s97_s10, [#allocation6], %s8178_s18, %s8178_s18, %s8179_s22  }
  0x4a   :  { %s7637_s23 = scalar_lea.hbm %s8255_s29, 512 }
  0x4b   :  { %p7638_p8 = scmp.ne.s32.totalorder %s8255_s29, %s7637_s23  ;;  %p7641_p9 = scmp.lt.u32.totalorder %s7637_s23, %s8255_s29 }
  0x4d   :  { %p7643_p10 = pnand %p7641_p9, %p7638_p8 }
  0x4f   :  { %7646 = shalt.err (!%p7643_p10)
}
  0x50   :  { %s7647_s26 = scalar_lea.vmem %s8372_s11, 512  ;;  %p7652_p12 = scmp.lt.s32.totalorder %s8372_s11, %s8372_s11 }
  0x51   :  { %p7648_p11 = scmp.ne.s32.totalorder %s8372_s11, %s7647_s26  ;;  %p7653_p13 = scmp.lt.s32.totalorder %s7647_s26, %s7647_s26 }
  0x53   :  { %p7654_p0 = por %p7653_p13, %p7652_p12 }
  0x55   :  { %p7655_p1 = pnand %p7654_p0, %p7648_p11 }
  0x57   :  { %7658 = shalt.err (!%p7655_p1)
}
  0x58   :  { %130 = dma.hbm_to_vmem [thread:$0]  %s8255_s29, 512, %s8372_s11, [#allocation9], %s8178_s18, %s8178_s18, %s8179_s22  }
  0x59   :  { %s8180_s13 = smov [#allocation11]   ;;  %s8181_s1 = smov [#allocation14]  }
  0x5a   :  { %s152_s28 = sshll.u32 %s8180_s13, 4  ;;  %s178_s2 = sshll.u32 %s8181_s1, 4  ;;  %s153_s28 = int_to_ptr.vmem [resolvable:$true] %s152_s28  ;;  %s8393_s2 = int_to_ptr.vmem [resolvable:$true] %s178_s2 }
  0x5b   :  { %s7659_s7 = scalar_lea.hbm %s8275_s19, 32 }
  0x5c   :  { %p7660_p2 = scmp.ne.s32.totalorder %s8275_s19, %s7659_s7  ;;  %p7663_p3 = scmp.lt.u32.totalorder %s7659_s7, %s8275_s19 }
  0x5e   :  { %p7665_p4 = pnand %p7663_p3, %p7660_p2 }
  0x60   :  { %7668 = shalt.err (!%p7665_p4)
}
  0x61   :  { %s7669_s10 = scalar_lea.vmem %s153_s28, 32  ;;  %p7674_p6 = scmp.lt.s32.totalorder %s153_s28, %s153_s28 }
  0x62   :  { %p7670_p5 = scmp.ne.s32.totalorder %s153_s28, %s7669_s10  ;;  %p7675_p7 = scmp.lt.s32.totalorder %s7669_s10, %s7669_s10 }
  0x64   :  { %p7676_p8 = por %p7675_p7, %p7674_p6 }
  0x66   :  { %p7677_p9 = pnand %p7676_p8, %p7670_p5 }
  0x68   :  { %7680 = shalt.err (!%p7677_p9)
}
  0x69   :  { %s8182_s29 = smov 16   ;;  %s8183_s0 = smov 1  }
  0x6a   :  { %158 = dma.hbm_to_vmem [thread:$0]  %s8275_s19, 32, %s153_s28, [#allocation12], %s8182_s29, %s8182_s29, %s8183_s0  }
  0x6b   :  { %s7681_s11 = scalar_lea.hbm %s8290_s6, 512 }
  0x6c   :  { %p7682_p10 = scmp.ne.s32.totalorder %s8290_s6, %s7681_s11  ;;  %p7685_p11 = scmp.lt.u32.totalorder %s7681_s11, %s8290_s6 }
  0x6e   :  { %p7687_p12 = pnand %p7685_p11, %p7682_p10 }
  0x70   :  { %7690 = shalt.err (!%p7687_p12)
}
  0x71   :  { %s7691_s15 = scalar_lea.vmem %s8393_s2, 512  ;;  %p7696_p0 = scmp.lt.s32.totalorder %s8393_s2, %s8393_s2 }
  0x72   :  { %p7692_p13 = scmp.ne.s32.totalorder %s8393_s2, %s7691_s15  ;;  %p7697_p1 = scmp.lt.s32.totalorder %s7691_s15, %s7691_s15 }
  0x74   :  { %p7698_p2 = por %p7697_p1, %p7696_p0 }
  0x76   :  { %p7699_p3 = pnand %p7698_p2, %p7692_p13 }
  0x78   :  { %7702 = shalt.err (!%p7699_p3)
}
  0x79   :  { %184 = dma.hbm_to_vmem [thread:$0]  %s8290_s6, 512, %s8393_s2, [#allocation15], %s8178_s18, %s8178_s18, %s8179_s22  }
  0x7a   :  { %s8184_s19 = smov [#allocation17]   ;;  %s8185_s23 = smov [#allocation20]  }
  0x7b   :  { %s200_s16 = sshll.u32 %s8184_s19, 4  ;;  %s224_s26 = sshll.u32 %s8185_s23, 4  ;;  %s201_s16 = int_to_ptr.vmem [resolvable:$true] %s200_s16  ;;  %s8414_s26 = int_to_ptr.vmem [resolvable:$true] %s224_s26 }
  0x7c   :  { %s7703_s13 = scalar_lea.hbm %s8300_s20, 1024 }
  0x7d   :  { %p7704_p4 = scmp.ne.s32.totalorder %s8300_s20, %s7703_s13  ;;  %p7707_p5 = scmp.lt.u32.totalorder %s7703_s13, %s8300_s20 }
  0x7f   :  { %p7709_p6 = pnand %p7707_p5, %p7704_p4 }
  0x81   :  { %7712 = shalt.err (!%p7709_p6)
}
  0x82   :  { %s7713_s28 = scalar_lea.vmem %s201_s16, 1024  ;;  %p7718_p8 = scmp.lt.s32.totalorder %s201_s16, %s201_s16 }
  0x83   :  { %p7714_p7 = scmp.ne.s32.totalorder %s201_s16, %s7713_s28  ;;  %p7719_p9 = scmp.lt.s32.totalorder %s7713_s28, %s7713_s28 }
  0x85   :  { %p7720_p10 = por %p7719_p9, %p7718_p8 }
  0x87   :  { %p7721_p11 = pnand %p7720_p10, %p7714_p7 }
  0x89   :  { %7724 = shalt.err (!%p7721_p11)
}
  0x8a   :  { %206 = dma.hbm_to_vmem [thread:$0]  %s8300_s20, 1024, %s201_s16, [#allocation18], %s8178_s18, %s8178_s18, %s8179_s22  }
  0x8b   :  { %s7725_s6 = scalar_lea.hbm %s8310_s4, 1024 }
  0x8c   :  { %p7726_p12 = scmp.ne.s32.totalorder %s8310_s4, %s7725_s6  ;;  %p7729_p13 = scmp.lt.u32.totalorder %s7725_s6, %s8310_s4 }
  0x8e   :  { %p7731_p0 = pnand %p7729_p13, %p7726_p12 }
  0x90   :  { %7734 = shalt.err (!%p7731_p0)
}
  0x91   :  { %s7735_s1 = scalar_lea.vmem %s8414_s26, 1024  ;;  %p7740_p2 = scmp.lt.s32.totalorder %s8414_s26, %s8414_s26 }
  0x92   :  { %p7736_p1 = scmp.ne.s32.totalorder %s8414_s26, %s7735_s1  ;;  %p7741_p3 = scmp.lt.s32.totalorder %s7735_s1, %s7735_s1 }
  0x94   :  { %p7742_p4 = por %p7741_p3, %p7740_p2 }
  0x96   :  { %p7743_p5 = pnand %p7742_p4, %p7736_p1 }
  0x98   :  { %7746 = shalt.err (!%p7743_p5)
}
  0x99   :  { %230 = dma.hbm_to_vmem [thread:$0]  %s8310_s4, 1024, %s8414_s26, [#allocation21], %s8178_s18, %s8178_s18, %s8179_s22  }
  0x9a   :  { %s8186_s20 = smov [#allocation23]   ;;  %s8187_s7 = smov [#allocation26]  }
  0x9b   :  { %s250_s2 = sshll.u32 %s8186_s20, 4  ;;  %s274_s10 = sshll.u32 %s8187_s7, 4  ;;  %s251_s2 = int_to_ptr.vmem [resolvable:$true] %s250_s2  ;;  %s8435_s10 = int_to_ptr.vmem [resolvable:$true] %s274_s10 }
  0x9c   :  { %s7747_s11 = scalar_lea.hbm %s8325_s30, 32 }
  0x9d   :  { %p7748_p6 = scmp.ne.s32.totalorder %s8325_s30, %s7747_s11  ;;  %p7751_p7 = scmp.lt.u32.totalorder %s7747_s11, %s8325_s30 }
  0x9f   :  { %p7753_p8 = pnand %p7751_p7, %p7748_p6 }
  0xa1   :  { %7756 = shalt.err (!%p7753_p8)
}
  0xa2   :  { %s7757_s15 = scalar_lea.vmem %s251_s2, 32  ;;  %p7762_p10 = scmp.lt.s32.totalorder %s251_s2, %s251_s2 }
  0xa3   :  { %p7758_p9 = scmp.ne.s32.totalorder %s251_s2, %s7757_s15  ;;  %p7763_p11 = scmp.lt.s32.totalorder %s7757_s15, %s7757_s15 }
  0xa5   :  { %p7764_p12 = por %p7763_p11, %p7762_p10 }
  0xa7   :  { %p7765_p13 = pnand %p7764_p12, %p7758_p9 }
  0xa9   :  { %7768 = shalt.err (!%p7765_p13)
}
  0xaa   :  { %256 = dma.hbm_to_vmem [thread:$0]  %s8325_s30, 32, %s251_s2, [#allocation24], %s8182_s29, %s8182_s29, %s8183_s0  }
  0xab   :  { %s7769_s4 = scalar_lea.hbm %s8335_s17, 32 }
  0xac   :  { %p7770_p0 = scmp.ne.s32.totalorder %s8335_s17, %s7769_s4  ;;  %p7773_p1 = scmp.lt.u32.totalorder %s7769_s4, %s8335_s17 }
  0xae   :  { %p7775_p2 = pnand %p7773_p1, %p7770_p0 }
  0xb0   :  { %7778 = shalt.err (!%p7775_p2)
}
  0xb1   :  { %s7779_s19 = scalar_lea.vmem %s8435_s10, 32  ;;  %p7784_p4 = scmp.lt.s32.totalorder %s8435_s10, %s8435_s10 }
  0xb2   :  { %p7780_p3 = scmp.ne.s32.totalorder %s8435_s10, %s7779_s19  ;;  %p7785_p5 = scmp.lt.s32.totalorder %s7779_s19, %s7779_s19 }
  0xb4   :  { %p7786_p6 = por %p7785_p5, %p7784_p4 }
  0xb6   :  { %p7787_p7 = pnand %p7786_p6, %p7780_p3 }
  0xb8   :  { %7790 = shalt.err (!%p7787_p7)
}
  0xb9   :  { %280 = dma.hbm_to_vmem [thread:$0]  %s8335_s17, 32, %s8435_s10, [#allocation27], %s8182_s29, %s8182_s29, %s8183_s0  }
  0xba   :  { %s8188_s30 = smov [#allocation29]   ;;  %s8189_s23 = smov [#allocation32]  }
  0xbb   :  { %s298_s16 = sshll.u32 %s8188_s30, 4  ;;  %s322_s26 = sshll.u32 %s8189_s23, 4  ;;  %s299_s16 = int_to_ptr.vmem [resolvable:$true] %s298_s16  ;;  %s8456_s26 = int_to_ptr.vmem [resolvable:$true] %s322_s26 }
  0xbc   :  { %s7791_s13 = scalar_lea.hbm %s8345_s9, 32 }
  0xbd   :  { %p7792_p8 = scmp.ne.s32.totalorder %s8345_s9, %s7791_s13  ;;  %p7795_p9 = scmp.lt.u32.totalorder %s7791_s13, %s8345_s9 }
  0xbf   :  { %p7797_p10 = pnand %p7795_p9, %p7792_p8 }
  0xc1   :  { %7800 = shalt.err (!%p7797_p10)
}
  0xc2   :  { %s7801_s28 = scalar_lea.vmem %s299_s16, 32  ;;  %p7806_p12 = scmp.lt.s32.totalorder %s299_s16, %s299_s16 }
  0xc3   :  { %p7802_p11 = scmp.ne.s32.totalorder %s299_s16, %s7801_s28  ;;  %p7807_p13 = scmp.lt.s32.totalorder %s7801_s28, %s7801_s28 }
  0xc5   :  { %p7808_p0 = por %p7807_p13, %p7806_p12 }
  0xc7   :  { %p7809_p1 = pnand %p7808_p0, %p7802_p11 }
  0xc9   :  { %7812 = shalt.err (!%p7809_p1)
}
  0xca   :  { %304 = dma.hbm_to_vmem [thread:$0]  %s8345_s9, 32, %s299_s16, [#allocation30], %s8182_s29, %s8182_s29, %s8183_s0  }
  0xcb   :  { %s7813_s17 = scalar_lea.hbm %s8355_s14, 32 }
  0xcc   :  { %p7814_p2 = scmp.ne.s32.totalorder %s8355_s14, %s7813_s17  ;;  %p7817_p3 = scmp.lt.u32.totalorder %s7813_s17, %s8355_s14 }
  0xce   :  { %p7819_p4 = pnand %p7817_p3, %p7814_p2 }
  0xd0   :  { %7822 = shalt.err (!%p7819_p4)
}
  0xd1   :  { %s7823_s6 = scalar_lea.vmem %s8456_s26, 32  ;;  %p7828_p6 = scmp.lt.s32.totalorder %s8456_s26, %s8456_s26 }
  0xd2   :  { %p7824_p5 = scmp.ne.s32.totalorder %s8456_s26, %s7823_s6  ;;  %p7829_p7 = scmp.lt.s32.totalorder %s7823_s6, %s7823_s6 }
  0xd4   :  { %p7830_p8 = por %p7829_p7, %p7828_p6 }
  0xd6   :  { %p7831_p9 = pnand %p7830_p8, %p7824_p5 }
  0xd8   :  { %7834 = shalt.err (!%p7831_p9)
}
  0xd9   :  { %328 = dma.hbm_to_vmem [thread:$0]  %s8355_s14, 32, %s8456_s26, [#allocation33], %s8182_s29, %s8182_s29, %s8183_s0  }
  0xda   :  { %s8190_s9 = smov [#allocation2]   ;;  %s8191_s20 = smov [#allocation7]  }
  0xdb   :  { %s82_s1 = sshll.u32 %s8190_s9, 4  ;;  %s112_s2 = sshll.u32 %s8191_s20, 4  ;;  %s83_s1 = int_to_ptr.vmem [resolvable:$true] %s82_s1  ;;  %s8477_s2 = int_to_ptr.vmem [resolvable:$true] %s112_s2 }
  0xdc   :  { %s7835_s7 = scalar_lea.hbm %s8225_s5, 256 }
  0xdd   :  { %p7836_p10 = scmp.ne.s32.totalorder %s8225_s5, %s7835_s7  ;;  %p7839_p11 = scmp.lt.u32.totalorder %s7835_s7, %s8225_s5 }
  0xdf   :  { %p7841_p12 = pnand %p7839_p11, %p7836_p10 }
  0xe1   :  { %7844 = shalt.err (!%p7841_p12)
}
  0xe2   :  { %s7845_s10 = scalar_lea.vmem %s83_s1, 256  ;;  %p7850_p0 = scmp.lt.s32.totalorder %s83_s1, %s83_s1 }
  0xe3   :  { %p7846_p13 = scmp.ne.s32.totalorder %s83_s1, %s7845_s10  ;;  %p7851_p1 = scmp.lt.s32.totalorder %s7845_s10, %s7845_s10 }
  0xe5   :  { %p7852_p2 = por %p7851_p1, %p7850_p0 }
  0xe7   :  { %p7853_p3 = pnand %p7852_p2, %p7846_p13 }
  0xe9   :  { %7856 = shalt.err (!%p7853_p3)
}
  0xea   :  { %88 = dma.hbm_to_vmem [thread:$0]  %s8225_s5, 256, %s83_s1, [#allocation3], %s8178_s18, %s8178_s18, %s8179_s22  }
  0xeb   :  { %s7857_s14 = scalar_lea.hbm %s8250_s25, 32 }
  0xec   :  { %p7858_p4 = scmp.ne.s32.totalorder %s8250_s25, %s7857_s14  ;;  %p7861_p5 = scmp.lt.u32.totalorder %s7857_s14, %s8250_s25 }
  0xee   :  { %p7863_p6 = pnand %p7861_p5, %p7858_p4 }
  0xf0   :  { %7866 = shalt.err (!%p7863_p6)
}
  0xf1   :  { %s7867_s11 = scalar_lea.vmem %s8477_s2, 32  ;;  %p7872_p8 = scmp.lt.s32.totalorder %s8477_s2, %s8477_s2 }
  0xf2   :  { %p7868_p7 = scmp.ne.s32.totalorder %s8477_s2, %s7867_s11  ;;  %p7873_p9 = scmp.lt.s32.totalorder %s7867_s11, %s7867_s11 }
  0xf4   :  { %p7874_p10 = por %p7873_p9, %p7872_p8 }
  0xf6   :  { %p7875_p11 = pnand %p7874_p10, %p7868_p7 }
  0xf8   :  { %7878 = shalt.err (!%p7875_p11)
}
  0xf9   :  { %118 = dma.hbm_to_vmem [thread:$0]  %s8250_s25, 32, %s8477_s2, [#allocation6], %s8182_s29, %s8182_s29, %s8183_s0  }
  0xfa   :  { %s8192_s5 = smov [#allocation10]   ;;  %s8193_s4 = smov [#allocation13]  }
  0xfb   :  { %s138_s15 = sshll.u32 %s8192_s5, 4  ;;  %s164_s19 = sshll.u32 %s8193_s4, 4  ;;  %s139_s15 = int_to_ptr.vmem [resolvable:$true] %s138_s15  ;;  %s8498_s19 = int_to_ptr.vmem [resolvable:$true] %s164_s19 }
  0xfc   :  { %s7879_s30 = scalar_lea.hbm %s8265_s8, 32 }
  0xfd   :  { %p7880_p12 = scmp.ne.s32.totalorder %s8265_s8, %s7879_s30  ;;  %p7883_p13 = scmp.lt.u32.totalorder %s7879_s30, %s8265_s8 }
  0xff   :  { %p7885_p0 = pnand %p7883_p13, %p7880_p12 }
 0x101   :  { %7888 = shalt.err (!%p7885_p0)
}
 0x102   :  { %s7889_s16 = scalar_lea.vmem %s139_s15, 32  ;;  %p7894_p2 = scmp.lt.s32.totalorder %s139_s15, %s139_s15 }
 0x103   :  { %p7890_p1 = scmp.ne.s32.totalorder %s139_s15, %s7889_s16  ;;  %p7895_p3 = scmp.lt.s32.totalorder %s7889_s16, %s7889_s16 }
 0x105   :  { %p7896_p4 = por %p7895_p3, %p7894_p2 }
 0x107   :  { %p7897_p5 = pnand %p7896_p4, %p7890_p1 }
 0x109   :  { %7900 = shalt.err (!%p7897_p5)
}
 0x10a   :  { %144 = dma.hbm_to_vmem [thread:$0]  %s8265_s8, 32, %s139_s15, [#allocation9], %s8182_s29, %s8182_s29, %s8183_s0  }
 0x10b   :  { %s7901_s25 = scalar_lea.hbm %s8280_s24, 512 }
 0x10c   :  { %p7902_p6 = scmp.ne.s32.totalorder %s8280_s24, %s7901_s25  ;;  %p7905_p7 = scmp.lt.u32.totalorder %s7901_s25, %s8280_s24 }
 0x10e   :  { %p7907_p8 = pnand %p7905_p7, %p7902_p6 }
 0x110   :  { %7910 = shalt.err (!%p7907_p8)
}
 0x111   :  { %s7911_s23 = scalar_lea.vmem %s8498_s19, 512  ;;  %p7916_p10 = scmp.lt.s32.totalorder %s8498_s19, %s8498_s19 }
 0x112   :  { %p7912_p9 = scmp.ne.s32.totalorder %s8498_s19, %s7911_s23  ;;  %p7917_p11 = scmp.lt.s32.totalorder %s7911_s23, %s7911_s23 }
 0x114   :  { %p7918_p12 = por %p7917_p11, %p7916_p10 }
 0x116   :  { %p7919_p13 = pnand %p7918_p12, %p7912_p9 }
 0x118   :  { %7922 = shalt.err (!%p7919_p13)
}
 0x119   :  { %170 = dma.hbm_to_vmem [thread:$0]  %s8280_s24, 512, %s8498_s19, [#allocation12], %s8178_s18, %s8178_s18, %s8179_s22  }
 0x11a   :  { %s8194_s8 = smov [#allocation16]   ;;  %s8195_s13 = smov [#allocation19]  }
 0x11b   :  { %s191_s26 = sshll.u32 %s8194_s8, 4  ;;  %s212_s28 = sshll.u32 %s8195_s13, 4  ;;  %s192_s26 = int_to_ptr.vmem [resolvable:$true] %s191_s26  ;;  %s8519_s28 = int_to_ptr.vmem [resolvable:$true] %s212_s28 }
 0x11c   :  { %s7923_s17 = scalar_lea.hbm %s8295_s12, 16 }
 0x11d   :  { %p7924_p0 = scmp.ne.s32.totalorder %s8295_s12, %s7923_s17  ;;  %p7927_p1 = scmp.lt.u32.totalorder %s7923_s17, %s8295_s12 }
 0x11f   :  { %p7929_p2 = pnand %p7927_p1, %p7924_p0 }
 0x121   :  { %7932 = shalt.err (!%p7929_p2)
}
 0x122   :  { %s7933_s6 = scalar_lea.vmem %s192_s26, 16  ;;  %s7937_s9 = scalar_lea.vmem %s192_s26, 32 }
 0x123   :  { %p7934_p3 = scmp.ne.s32.totalorder %s192_s26, %s7933_s6  ;;  %p7938_p4 = scmp.lt.s32.totalorder %s192_s26, %s192_s26 }
 0x124   :  { %p7939_p5 = scmp.lt.s32.totalorder %s7937_s9, %s7933_s6 }
 0x126   :  { %p7940_p6 = por %p7939_p5, %p7938_p4 }
 0x128   :  { %p7941_p7 = pnand %p7940_p6, %p7934_p3 }
 0x12a   :  { %7944 = shalt.err (!%p7941_p7)
}
 0x12b   :  { %s9389_s24 = sld [smem:[#allocation57_spill]] }
 0x12c   :  { %194 = dma.hbm_to_vmem [thread:$0]  %s8295_s12, 16, %s192_s26, [#allocation15]  }
 0x131   :  { %s7945_s1 = scalar_lea.hbm %s9389_s24, 32 }
 0x132   :  { %p7946_p8 = scmp.ne.s32.totalorder %s9389_s24, %s7945_s1  ;;  %p7949_p9 = scmp.lt.u32.totalorder %s7945_s1, %s9389_s24 }
 0x134   :  { %p7951_p10 = pnand %p7949_p9, %p7946_p8 }
 0x136   :  { %7954 = shalt.err (!%p7951_p10)
}
 0x137   :  { %s7955_s20 = scalar_lea.vmem %s8519_s28, 32  ;;  %p7960_p12 = scmp.lt.s32.totalorder %s8519_s28, %s8519_s28 }
 0x138   :  { %p7956_p11 = scmp.ne.s32.totalorder %s8519_s28, %s7955_s20  ;;  %p7961_p13 = scmp.lt.s32.totalorder %s7955_s20, %s7955_s20 }
 0x13a   :  { %p7962_p0 = por %p7961_p13, %p7960_p12 }
 0x13c   :  { %p7963_p1 = pnand %p7962_p0, %p7956_p11 }
 0x13e   :  { %7966 = shalt.err (!%p7963_p1)
}
 0x13f   :  { %s9390_s12 = sld [smem:[#allocation58_spill]]  ;;  %s8196_s2 = smov [#allocation22]  }
 0x140   :  { %218 = dma.hbm_to_vmem [thread:$0]  %s9389_s24, 32, %s8519_s28, [#allocation18], %s8182_s29, %s8182_s29, %s8183_s0  }
 0x141   :  { %s236_s7 = sshll.u32 %s8196_s2, 4  ;;  %s8197_s10 = smov [#allocation25]   ;;  %s237_s7 = int_to_ptr.vmem [resolvable:$true] %s236_s7 }
 0x142   :  { %s262_s14 = sshll.u32 %s8197_s10, 4  ;;  %s8537_s14 = int_to_ptr.vmem [resolvable:$true] %s262_s14 }
 0x145   :  { %s7967_s11 = scalar_lea.hbm %s9390_s12, 32 }
 0x146   :  { %p7968_p2 = scmp.ne.s32.totalorder %s9390_s12, %s7967_s11  ;;  %p7971_p3 = scmp.lt.u32.totalorder %s7967_s11, %s9390_s12 }
 0x148   :  { %p7973_p4 = pnand %p7971_p3, %p7968_p2 }
 0x14a   :  { %7976 = shalt.err (!%p7973_p4)
}
 0x14b   :  { %s7977_s5 = scalar_lea.vmem %s237_s7, 32  ;;  %p7982_p6 = scmp.lt.s32.totalorder %s237_s7, %s237_s7 }
 0x14c   :  { %p7978_p5 = scmp.ne.s32.totalorder %s237_s7, %s7977_s5  ;;  %p7983_p7 = scmp.lt.s32.totalorder %s7977_s5, %s7977_s5 }
 0x14e   :  { %p7984_p8 = por %p7983_p7, %p7982_p6 }
 0x150   :  { %p7985_p9 = pnand %p7984_p8, %p7978_p5 }
 0x152   :  { %7988 = shalt.err (!%p7985_p9)
}
 0x153   :  { %s9391_s15 = sld [smem:[#allocation60_spill]] }
 0x154   :  { %242 = dma.hbm_to_vmem [thread:$0]  %s9390_s12, 32, %s237_s7, [#allocation21], %s8182_s29, %s8182_s29, %s8183_s0  }
 0x159   :  { %s7989_s4 = scalar_lea.hbm %s9391_s15, 32 }
 0x15a   :  { %p7990_p10 = scmp.ne.s32.totalorder %s9391_s15, %s7989_s4  ;;  %p7993_p11 = scmp.lt.u32.totalorder %s7989_s4, %s9391_s15 }
 0x15c   :  { %p7995_p12 = pnand %p7993_p11, %p7990_p10 }
 0x15e   :  { %7998 = shalt.err (!%p7995_p12)
}
 0x15f   :  { %s7999_s19 = scalar_lea.vmem %s8537_s14, 32  ;;  %p8004_p0 = scmp.lt.s32.totalorder %s8537_s14, %s8537_s14 }
 0x160   :  { %p8000_p13 = scmp.ne.s32.totalorder %s8537_s14, %s7999_s19  ;;  %p8005_p1 = scmp.lt.s32.totalorder %s7999_s19, %s7999_s19 }
 0x162   :  { %p8006_p2 = por %p8005_p1, %p8004_p0 }
 0x164   :  { %p8007_p3 = pnand %p8006_p2, %p8000_p13 }
 0x166   :  { %8010 = shalt.err (!%p8007_p3)
}
 0x167   :  { %s9392_s30 = sld [smem:[#allocation61_spill]]  ;;  %s8198_s16 = smov [#allocation28]  }
 0x168   :  { %268 = dma.hbm_to_vmem [thread:$0]  %s9391_s15, 32, %s8537_s14, [#allocation24], %s8182_s29, %s8182_s29, %s8183_s0  }
 0x169   :  { %s286_s25 = sshll.u32 %s8198_s16, 4  ;;  %s8199_s23 = smov [#allocation31]   ;;  %s287_s25 = int_to_ptr.vmem [resolvable:$true] %s286_s25 }
 0x16a   :  { %s310_s8 = sshll.u32 %s8199_s23, 4  ;;  %s8558_s8 = int_to_ptr.vmem [resolvable:$true] %s310_s8 }
 0x16d   :  { %s8011_s26 = scalar_lea.hbm %s9392_s30, 32 }
 0x16e   :  { %p8012_p4 = scmp.ne.s32.totalorder %s9392_s30, %s8011_s26  ;;  %p8015_p5 = scmp.lt.u32.totalorder %s8011_s26, %s9392_s30 }
 0x170   :  { %p8017_p6 = pnand %p8015_p5, %p8012_p4 }
 0x172   :  { %8020 = shalt.err (!%p8017_p6)
}
 0x173   :  { %s8021_s13 = scalar_lea.vmem %s287_s25, 32  ;;  %p8026_p8 = scmp.lt.s32.totalorder %s287_s25, %s287_s25 }
 0x174   :  { %p8022_p7 = scmp.ne.s32.totalorder %s287_s25, %s8021_s13  ;;  %p8027_p9 = scmp.lt.s32.totalorder %s8021_s13, %s8021_s13 }
 0x176   :  { %p8028_p10 = por %p8027_p9, %p8026_p8 }
 0x178   :  { %p8029_p11 = pnand %p8028_p10, %p8022_p7 }
 0x17a   :  { %8032 = shalt.err (!%p8029_p11)
}
 0x17b   :  { %s9393_s28 = sld [smem:[#allocation62_spill]] }
 0x17c   :  { %292 = dma.hbm_to_vmem [thread:$0]  %s9392_s30, 32, %s287_s25, [#allocation27], %s8182_s29, %s8182_s29, %s8183_s0  }
 0x181   :  { %s8033_s17 = scalar_lea.hbm %s9393_s28, 32 }
 0x182   :  { %p8034_p12 = scmp.ne.s32.totalorder %s9393_s28, %s8033_s17  ;;  %p8037_p13 = scmp.lt.u32.totalorder %s8033_s17, %s9393_s28 }
 0x184   :  { %p8039_p0 = pnand %p8037_p13, %p8034_p12 }
 0x186   :  { %8042 = shalt.err (!%p8039_p0)
}
 0x187   :  { %s8043_s6 = scalar_lea.vmem %s8558_s8, 32  ;;  %p8048_p2 = scmp.lt.s32.totalorder %s8558_s8, %s8558_s8 }
 0x188   :  { %p8044_p1 = scmp.ne.s32.totalorder %s8558_s8, %s8043_s6  ;;  %p8049_p3 = scmp.lt.s32.totalorder %s8043_s6, %s8043_s6 }
 0x18a   :  { %p8050_p4 = por %p8049_p3, %p8048_p2 }
 0x18c   :  { %p8051_p5 = pnand %p8050_p4, %p8044_p1 }
 0x18e   :  { %8054 = shalt.err (!%p8051_p5)
}
 0x18f   :  { %316 = dma.hbm_to_vmem [thread:$0]  %s9393_s28, 32, %s8558_s8, [#allocation30], %s8182_s29, %s8182_s29, %s8183_s0  }
 0x190   :  { %s8200_s9 = smov [#allocation34]   ;;  %s8201_s1 = smov [#allocation35]  }
 0x191   :  { %s335_s24 = sshll.u32 %s8200_s9, 4  ;;  %s345_s20 = sshll.u32 %s8201_s1, 4  ;;  %s336_s24 = int_to_ptr.vmem [resolvable:$true] %s335_s24  ;;  %s346_s20 = int_to_ptr.vmem [resolvable:$true] %s345_s20 }
 0x192   :  { %s8055_s12 = scalar_lea.hbm %s8360_s3, 16 }
 0x193   :  { %p8056_p6 = scmp.ne.s32.totalorder %s8360_s3, %s8055_s12  ;;  %p8059_p7 = scmp.lt.u32.totalorder %s8055_s12, %s8360_s3 }
 0x195   :  { %p8061_p8 = pnand %p8059_p7, %p8056_p6 }
 0x197   :  { %8064 = shalt.err (!%p8061_p8)
}
 0x198   :  { %s8065_s2 = scalar_lea.vmem %s336_s24, 16  ;;  %s8069_s7 = scalar_lea.vmem %s336_s24, 32 }
 0x199   :  { %p8066_p9 = scmp.ne.s32.totalorder %s336_s24, %s8065_s2  ;;  %p8070_p10 = scmp.lt.s32.totalorder %s336_s24, %s336_s24 }
 0x19a   :  { %p8071_p11 = scmp.lt.s32.totalorder %s8069_s7, %s8065_s2 }
 0x19c   :  { %p8072_p12 = por %p8071_p11, %p8070_p10 }
 0x19e   :  { %p8073_p13 = pnand %p8072_p12, %p8066_p9 }
 0x1a0   :  { %8076 = shalt.err (!%p8073_p13)
}
 0x1a1   :  { %338 = dma.hbm_to_vmem [thread:$0]  %s8360_s3, 16, %s336_s24, [#allocation33]  }
 0x1a2   :  { %s8077_s0 = scalar_lea.hbm %s8365_s27, 16 }
 0x1a3   :  { %p8078_p0 = scmp.ne.s32.totalorder %s8365_s27, %s8077_s0  ;;  %p8081_p1 = scmp.lt.u32.totalorder %s8077_s0, %s8365_s27 }
 0x1a5   :  { %p8083_p2 = pnand %p8081_p1, %p8078_p0 }
 0x1a7   :  { %8086 = shalt.err (!%p8083_p2)
}
 0x1a8   :  { %s8087_s10 = scalar_lea.vmem %s346_s20, 16  ;;  %s8091_s14 = scalar_lea.vmem %s346_s20, 32 }
 0x1a9   :  { %p8088_p3 = scmp.ne.s32.totalorder %s346_s20, %s8087_s10  ;;  %p8092_p4 = scmp.lt.s32.totalorder %s346_s20, %s346_s20 }
 0x1aa   :  { %p8093_p5 = scmp.lt.s32.totalorder %s8091_s14, %s8087_s10 }
 0x1ac   :  { %p8094_p6 = por %p8093_p5, %p8092_p4 }
 0x1ae   :  { %p8095_p7 = pnand %p8094_p6, %p8088_p3 }
 0x1b0   :  { %8098 = shalt.err (!%p8095_p7)
}
 0x1b1   :  { %348 = dma.hbm_to_vmem [thread:$0]  %s8365_s27, 16, %s346_s20, [#allocation36]  }
 0x1b2   :  { %8121 = dma.done.wait [#allocation3], 256  }
 0x1b3   :  { %8122 = vsyncadd [#allocation3], 4294967040 }
 0x1b4   :  { %8123 = dma.done.wait [#allocation6], 544  }
 0x1b5   :  { %8124 = vsyncadd [#allocation6], 4294966752 }
 0x1b6   :  { %8125 = dma.done.wait [#allocation9], 544  }
 0x1b7   :  { %8126 = vsyncadd [#allocation9], 4294966752 }
 0x1b8   :  { %8127 = dma.done.wait [#allocation12], 544  }
 0x1b9   :  { %8128 = vsyncadd [#allocation12], 4294966752 }
 0x1ba   :  { %8129 = dma.done.wait [#allocation15], 528  }
 0x1bb   :  { %8130 = vsyncadd [#allocation15], 4294966768 }
 0x1bc   :  { %8131 = dma.done.wait [#allocation18], 1056  }
 0x1bd   :  { %8132 = vsyncadd [#allocation18], 4294966240 }
 0x1be   :  { %8133 = dma.done.wait [#allocation21], 1056  }
 0x1bf   :  { %8134 = vsyncadd [#allocation21], 4294966240 }
 0x1c0   :  { %8135 = dma.done.wait [#allocation24], 64  }
 0x1c1   :  { %8136 = vsyncadd [#allocation24], 4294967232 }
 0x1c2   :  { %8137 = dma.done.wait [#allocation27], 64  }
 0x1c3   :  { %8138 = vsyncadd [#allocation27], 4294967232 }
 0x1c4   :  { %8139 = dma.done.wait [#allocation30], 64  }
 0x1c5   :  { %8140 = vsyncadd [#allocation30], 4294967232 }
 0x1c6   :  { %8141 = dma.done.wait [#allocation33], 48  }
 0x1c7   :  { %8142 = vsyncadd [#allocation33], 4294967248 }
 0x1c8   :  { %8143 = dma.done.wait [#allocation36], 16  }
 0x1c9   :  { %8144 = vsyncadd [#allocation36], 4294967280  ;;  %s9394_s3 = sld [smem:[#allocation51_spill]]  ;;  %v431_v0 = vld [vmem:[#allocation13] sm:$0xff]  ;;  %v432_v1 = vld [vmem:[#allocation13 + $0x8] sm:$0xff]  ;;  %vm442_vm0 = vcmask 261120  }
 0x1ca   :  { %v433_v2 = vld [vmem:[#allocation13 + $0x10] sm:$0xff]  ;;  %v6791_v3 = vpack.c.bf16 %v432_v1, %v431_v0  ;;  %v434_v4 = vld [vmem:[#allocation13 + $0x18] sm:$0xff]  ;;  %s9395_s27 = sld [smem:[#allocation52_spill]]  ;;  %v540_v9 = vld [vmem:[#allocation14] sm:$0xff]  ;;  %s9396_s11 = sld [smem:[#allocation53_spill]]  ;;  %vm983_vm1 = vcmask 64512  }
 0x1cb   :  { %v423_v6 = vld [vmem:[#allocation5] sm:$0xff]  ;;  %v6795_v7 = vpack.c.bf16 %v434_v4, %v433_v2  ;;  %v541_v10 = vld [vmem:[#allocation14 + $0x8] sm:$0xff]  ;;  %v542_v16 = vld [vmem:[#allocation14 + $0x10] sm:$0xff]  ;;  %s9397_s5 = sld [smem:[#allocation56_spill]]  ;;  %s8202_s15 = smov 80   ;;  %vm1348_vm5 = vcmask 130048  }
 0x1cc   :  { %6792 = vmatprep.subr.bf16.mxu1 %v6791_v3  ;;  %v424_v12 = vld [vmem:[#allocation5 + $0x8] sm:$0xff]  ;;  %v6799_v13 = vpack.c.bf16 %v541_v10, %v540_v9  ;;  %v425_v15 = vld [vmem:[#allocation5 + $0x10] sm:$0xff]  ;;  %v543_v17 = vld [vmem:[#allocation14 + $0x18] sm:$0xff]  ;;  %s8203_s4 = smov 96   ;;  %s8204_s19 = smov 72   ;;  %vm1815_vm12 = vcmask 195584  }
 0x1cd   :  { %6794 = vmatpush3.bf16.msra.mxu1 %v6791_v3  ;;  %v426_v22 = vld [vmem:[#allocation5 + $0x18] sm:$0xff]  ;;  %v6803_v23 = vpack.c.bf16 %v543_v17, %v542_v16  ;;  %v8605_v31 = vld [vmem:[#allocation2] sm:$0xff]  ;;  %v648_v36 = vld [vmem:[#allocation8] sm:$0xff]  ;;  %s8205_s30 = smov 88   ;;  %s8206_s16 = smov 120   ;;  %vm3173_vm13 = vcmask 523264  }
 0x1ce   :  { %6796 = vmatprep.subr.bf16.mxu1 %v6795_v7  ;;  %v8611_v33 = vld [vmem:[#allocation2 + $0x8] sm:$0xff]  ;;  %v649_v37 = vld [vmem:[#allocation8 + $0x8] sm:$0xff]  ;;  %v5865_v53 = vld [vmem:[#allocation16] ss:$0 sm:$0xff]  ;;  %s8207_s25 = smov 112   ;;  %s8208_s23 = smov 104  }
 0x1cf   :  { %v419_v5 = vld [vmem:[%s9394_s3] sm:$0xff]  ;;  %v420_v11 = vld [vmem:[%s9394_s3 + $0x8] sm:$0xff]  ;;  %v421_v14 = vld [vmem:[%s9394_s3 + $0x10] sm:$0xff]  ;;  %v6807_v38 = vpack.c.bf16 %v649_v37, %v648_v36  ;;  %s8210_s8 = smov 64   ;;  %s8211_s26 = smov 56  }
 0x1d0   :  { %v427_v8 = vadd.f32 %v423_v6, %v419_v5  ;;  %v428_v18 = vadd.f32 %v424_v12, %v420_v11  ;;  %v8592_v19 = vld [vmem:[%s9395_s27] sm:$0xff]  ;;  %v429_v20 = vadd.f32 %v425_v15, %v421_v14  ;;  %v422_v21 = vld [vmem:[%s9394_s3 + $0x18] sm:$0xff]  ;;  %v871_v25 = vld [vmem:[%s9396_s11 + $0x8] sm:$0xff]  ;;  %s8212_s13 = smov 48   ;;  %s8213_s28 = smov 40  }
 0x1d1   :  { %6798 = vmatpush3.bf16.msra.mxu1 %v6795_v7  ;;  %6352 = vmatprep.mubr.msk.f32.mxu0 %vm442_vm0, %v8592_v19  ;;  %v870_v24 = vld [vmem:[%s9396_s11] sm:$0xff]  ;;  %v430_v26 = vadd.f32 %v426_v22, %v422_v21  ;;  %v872_v28 = vld [vmem:[%s9396_s11 + $0x10] sm:$0xff]  ;;  %v873_v29 = vld [vmem:[%s9396_s11 + $0x18] sm:$0xff]  ;;  %v868_v32 = vadd.f32 %v8592_v19, %v8605_v31  ;;  %s9400_s17 = sld [smem:[#allocation54_spill]]  ;;  %s8214_s6 = smov 24  }
 0x1d2   :  { %6324 = vmatprep.mubr.msk.f32.mxu1 %vm442_vm0, %v427_v8  ;;  %6800 = vmatprep.subr.bf16.mxu1 %v6799_v13  ;;  %v6815_v27 = vpack.c.bf16 %v871_v25, %v870_v24  ;;  %v6819_v30 = vpack.c.bf16 %v873_v29, %v872_v28  ;;  %v8614_v34 = vld [vmem:[%s9395_s27 + $0x8] sm:$0xff]  ;;  %v5860_v42 = vld [vmem:[%s9397_s5] ss:$0 sm:$0xff]  ;;  %v5872_v2 = vld [vmem:[#allocation7] ss:$0 sm:$0xff]  ;;  %s9401_s9 = sld [smem:[#allocation55_spill]] }
 0x1d3   :  { %v869_v35 = vadd.f32 %v8614_v34, %v8611_v33  ;;  %6808 = vmatprep.subr.bf16.mxu0 %v6807_v38  ;;  %v650_v39 = vld [vmem:[#allocation8 + $0x10] sm:$0xff]  ;;  %v651_v40 = vld [vmem:[#allocation8 + $0x18] sm:$0xff]  ;;  %vm8670_vm2 = vmpackc.low %vm983_vm1, %vm983_vm1  ;;  %s9402_s24 = sld [smem:[#allocation59_spill]]  ;;  %s8215_s1 = smov 32  }
 0x1d4   :  { %6325 = vmatmul.mubr.msk.f32.vlgmr.msra.gmra.mrb[0].mxu1 %vm442_vm0, %v428_v18  ;;  %6810 = vmatpush3.bf16.msra.mxu0 %v6807_v38  ;;  %v6811_v41 = vpack.c.bf16 %v651_v40, %v650_v39  ;;  %v733_v39 = vlaneseq }
 0x1d5   :  { %6802 = vmatpush3.bf16.msra.mxu1 %v6799_v13  ;;  %6327 = vmatprep.mubr.msk.f32.mxu1 %vm442_vm0, %v429_v20 }
 0x1d6   :  { %6804 = vmatprep.subr.bf16.mxu1 %v6803_v23  ;;  %6812 = vmatprep.subr.bf16.mxu0 %v6811_v41  ;;  %v734_v40 = vshrl.u32 %v733_v39, 7 }
 0x1d8   :  { %6328 = vmatmul.mubr.msk.f32.gmra.mrb[2].mxu1 %vm442_vm0, %v430_v26  ;;  %6814 = vmatpush3.bf16.msra.mxu0 %v6811_v41  ;;  %v735_v41 = vadd.s32 8, %v734_v40 }
 0x1d9   :  { %6806 = vmatpush3.bf16.msra.mxu1 %v6803_v23  ;;  %6338 = vmatprep.mubr.msk.f32.mxu1 %vm442_vm0, %v419_v5 }
 0x1da   :  { %6816 = vmatprep.subr.bf16.mxu1 %v6815_v27 }
 0x1db   :  { %6353 = vmatmul.mubr.msk.f32.vlgmr.msra.gmra.mrb[0].mxu0 %vm442_vm0, %v8614_v34 }
 0x1dc   :  { %6339 = vmatmul.mubr.msk.f32.vlgmr.msra.gmra.mrb[4].mxu1 %vm442_vm0, %v420_v11 }
 0x1dd   :  { %6818 = vmatpush3.bf16.msra.mxu1 %v6815_v27  ;;  %6341 = vmatprep.mubr.msk.f32.mxu1 %vm442_vm0, %v421_v14 }
 0x1de   :  { %6820 = vmatprep.subr.bf16.mxu1 %v6819_v30 }
 0x1e0   :  { %6342 = vmatmul.mubr.msk.f32.gmra.mrb[6].mxu1 %vm442_vm0, %v422_v21 }
 0x1e1   :  { %6822 = vmatpush3.bf16.msra.mxu1 %v6819_v30  ;;  %6363 = vmatprep.mubr.msk.f32.mxu1 %vm442_vm0, %v868_v32 }
 0x1e4   :  { %6364 = vmatmul.mubr.msk.f32.vlgmr.msra.gmra.mrb[8].mxu1 %vm442_vm0, %v869_v35 }
 0x2a7   :  { %v6326_v43 = vpop.f32.mrb[0].mxu1 }
 0x2a8   :  { %v527_v44 = vadd.f32 %v6326_v43, %v5860_v42  ;;  %v521_v45 = vpop.f32.mrb[1].mxu1  ;;  %v755_v43 = vand.u32 1, %v735_v41 }
 0x2a9   :  { %v522_v46 = vadd.f32 %v5860_v42, %v521_v45  ;;  %v737_v45 = vadd.s32 24, %v734_v40 }
 0x2ab   :  { %v6329_v47 = vpop.f32.mrb[2].mxu1  ;;  %v8624_v48 = vpack.c.bf16 %v527_v44, %v522_v46  ;;  %v8626_v49 = vpack.i.bf16 %v527_v44, %v522_v46  ;;  %v769_v46 = vand.u32 1, %v737_v45 }
 0x2ac   :  { %v537_v50 = vadd.f32 %v6329_v47, %v5860_v42  ;;  %v531_v51 = vpop.f32.mrb[3].mxu1  ;;  %v748_v47 = vand.u32 1, %v734_v40 }
 0x2ad   :  { %v532_v52 = vadd.f32 %v5860_v42, %v531_v51  ;;  %v743_v42 = vand.u32 127, %v733_v39  ;;  %v8209_v51 = vmov -1e+30  }
 0x2ae   :  { %v8664_v10 = vpop.f32.mrb[0].mxu0 }
 0x2af   :  { %v6340_v54 = vpop.f32.mrb[4].mxu1  ;;  %v8628_v55 = vpack.c.bf16 %v537_v50, %v532_v52  ;;  %v8630_v56 = vpack.i.bf16 %v537_v50, %v532_v52  ;;  %v8666_v11 = vpop.f32.mrb[1].mxu0  ;;  %v844_v44 = vand.u32 1, %v743_v42  ;;  %v736_v50 = vadd.s32 16, %v734_v40 }
 0x2b0   :  { %v635_v57 = vadd.f32 %v6340_v54, %v5865_v53  ;;  %v629_v58 = vpop.f32.mrb[5].mxu1 }
 0x2b1   :  { %v630_v59 = vadd.f32 %v5865_v53, %v629_v58  ;;  %vm853_vm3 = vcmp.eq.s32.totalorder %v755_v43, %v844_v44  ;;  %vm855_vm4 = vcmp.eq.s32.totalorder %v769_v46, %v844_v44  ;;  %vm852_vm6 = vcmp.eq.s32.totalorder %v748_v47, %v844_v44 }
 0x2b2   :  { %v8698_v52 = vsel %vm853_vm3, 0.0, %v8209_v51  ;;  %v762_v58 = vand.u32 1, %v736_v50 }
 0x2b3   :  { %v6343_v60 = vpop.f32.mrb[6].mxu1  ;;  %v8632_v61 = vpack.c.bf16 %v635_v57, %v630_v59  ;;  %v8634_v62 = vpack.i.bf16 %v635_v57, %v630_v59  ;;  %v739_v59 = vadd.s32 40, %v734_v40 }
 0x2b4   :  { %v645_v63 = vadd.f32 %v6343_v60, %v5865_v53  ;;  %v639_v0 = vpop.f32.mrb[7].mxu1  ;;  %v8701_v60 = vsel %vm855_vm4, 0.0, %v8209_v51  ;;  %vm854_vm7 = vcmp.eq.s32.totalorder %v762_v58, %v844_v44 }
 0x2b5   :  { %v640_v1 = vadd.f32 %v5865_v53, %v639_v0  ;;  %v8704_v0 = vsel %vm852_vm6, 0.0, %v8209_v51 }
 0x2b7   :  { %v6365_v3 = vpop.f32.mrb[8].mxu1  ;;  %v8636_v4 = vpack.c.bf16 %v645_v63, %v640_v1  ;;  %v8638_v5 = vpack.i.bf16 %v645_v63, %v640_v1 }
 0x2b8   :  { %v8640_v6 = vadd.f32 %v6365_v3, %v5872_v2  ;;  %v953_v7 = vpop.f32.mrb[9].mxu1 }
 0x2b9   :  { %v8642_v8 = vadd.f32 %v5872_v2, %v953_v7  ;;  %v783_v7 = vand.u32 1, %v739_v59 }
 0x2bb   :  { %6370 = vmatprep.mubr.msk.f32.mxu0 %vm983_vm1, %v8642_v8  ;;  %v7247_v9 = vpack.i.bf16 %v8640_v6, %v8642_v8  ;;  %vm857_vm8 = vcmp.eq.s32.totalorder %v783_v7, %v844_v44 }
 0x2bd   :  { %7248 = vrot.lane.b32.xlu1 %v7247_v9, %s8202_s15  ;;  %7238 = vrot.lane.b32.xlu0 %v7247_v9, %s8203_s4 }
 0x2c1   :  { %7253 = vrot.lane.b32.xlu1 %v7247_v9, %s8204_s19  ;;  %7243 = vrot.lane.b32.xlu0 %v7247_v9, %s8205_s30  ;;  %v741_v9 = vadd.s32 56, %v734_v40 }
 0x2c5   :  { %1069 = vrot.lane.b32.xlu1 %v8640_v6, %s8206_s16  ;;  %1067 = vrot.lane.b32.xlu0 %v8642_v8, %s8206_s16 }
 0x2c9   :  { %1160 = vrot.lane.b32.xlu1 %v8640_v6, %s8207_s25  ;;  %1158 = vrot.lane.b32.xlu0 %v8642_v8, %s8207_s25 }
 0x2cd   :  { %1251 = vrot.lane.b32.xlu1 %v8640_v6, %s8208_s23  ;;  %1249 = vrot.lane.b32.xlu0 %v8642_v8, %s8208_s23 }
 0x32f   :  { %v7249_v12 = vpop.permute.xlu1 %7248  ;;  %v7239_v13 = vpop.permute.xlu0 %7238 }
 0x330   :  { %v7251_v14 = vunpack.i.h.bf16 %v7249_v12  ;;  %v7250_v15 = vunpack.i.l.bf16 %v7249_v12  ;;  %v7241_v16 = vunpack.i.h.bf16 %v7239_v13  ;;  %v7240_v17 = vunpack.i.l.bf16 %v7239_v13 }
 0x332   :  { %v6823_v20 = vpack.c.bf16 %v7241_v16, %v7240_v17  ;;  %v6835_v21 = vpack.c.bf16 %v7251_v14, %v7250_v15  ;;  %v8711_v14 = vsel %vm854_vm7, 0.0, %v8209_v51  ;;  %v797_v17 = vand.u32 1, %v741_v9 }
 0x333   :  { %v7254_v22 = vpop.permute.xlu1 %7253  ;;  %v7244_v23 = vpop.permute.xlu0 %7243 }
 0x334   :  { %v7256_v24 = vunpack.i.h.bf16 %v7254_v22  ;;  %v7255_v25 = vunpack.i.l.bf16 %v7254_v22  ;;  %v7246_v26 = vunpack.i.h.bf16 %v7244_v23  ;;  %v7245_v27 = vunpack.i.l.bf16 %v7244_v23  ;;  %6825 = vmatprep.subr.msk.bf16.mxu0 %vm8670_vm2, %v6823_v20 }
 0x335   :  { %6828 = vmatpush3.bf16.xpose.msk.msra.mxu0 %vm8670_vm2, %v6823_v20  ;;  %v8718_v22 = vsel %vm857_vm8, 0.0, %v8209_v51  ;;  %vm859_vm9 = vcmp.eq.s32.totalorder %v797_v17, %v844_v44 }
 0x336   :  { %v6829_v28 = vpack.c.bf16 %v7246_v26, %v7245_v27  ;;  %6837 = vmatprep.subr.msk.bf16.mxu0 %vm8670_vm2, %v6835_v21  ;;  %v6841_v30 = vpack.c.bf16 %v7256_v24, %v7255_v25  ;;  %v8723_v27 = vsel %vm859_vm9, 0.0, %v8209_v51 }
 0x337   :  { %v1068_v29 = vpop.permute.xlu0 %1067  ;;  %v1070_v32 = vpop.permute.xlu1 %1069 }
 0x338   :  { %6831 = vmatprep.subr.msk.bf16.mxu1 %vm8670_vm2, %v6829_v28  ;;  %6377 = vmatprep.mubr.msk.f32.mxu1 %vm983_vm1, %v1068_v29 }
 0x339   :  { %6834 = vmatpush3.bf16.xpose.msk.msra.mxu1 %vm8670_vm2, %v6829_v28 }
 0x33a   :  { %6843 = vmatprep.subr.msk.bf16.mxu1 %vm8670_vm2, %v6841_v30 }
 0x33b   :  { %v1159_v35 = vpop.permute.xlu0 %1158  ;;  %v1161_v37 = vpop.permute.xlu1 %1160 }
 0x33c   :  { %6371 = vmatmul.mubr.msk.f32.vlgmr.msra.gmra.mrb[2].mxu0 %vm983_vm1, %v8640_v6 }
 0x33d   :  { %6840 = vmatpush3.bf16.xpose.msk.msra.mxu0 %vm8670_vm2, %v6835_v21  ;;  %6384 = vmatprep.mubr.msk.f32.mxu0 %vm983_vm1, %v1159_v35 }
 0x33f   :  { %v1250_v36 = vpop.permute.xlu0 %1249  ;;  %v1252_v38 = vpop.permute.xlu1 %1251 }
 0x340   :  { %6378 = vmatmul.mubr.msk.f32.vlgmr.msra.gmra.mrb[10].mxu1 %vm983_vm1, %v1070_v32  ;;  %v738_v32 = vadd.s32 32, %v734_v40 }
 0x341   :  { %6846 = vmatpush3.bf16.xpose.msk.msra.mxu1 %vm8670_vm2, %v6841_v30  ;;  %6391 = vmatprep.mubr.msk.f32.mxu1 %vm983_vm1, %v1250_v36  ;;  %v740_v36 = vadd.s32 48, %v734_v40 }
 0x342   :  { %v776_v35 = vand.u32 1, %v738_v32 }
 0x344   :  { %6385 = vmatmul.mubr.msk.f32.vlgmr.msra.gmra.mrb[4].mxu0 %vm983_vm1, %v1161_v37  ;;  %vm856_vm10 = vcmp.eq.s32.totalorder %v776_v35, %v844_v44  ;;  %v790_v37 = vand.u32 1, %v740_v36 }
 0x346   :  { %vm858_vm11 = vcmp.eq.s32.totalorder %v790_v37, %v844_v44 }
 0x347   :  { %v8735_v41 = vsel %vm858_vm11, 0.0, %v8209_v51 }
 0x348   :  { %6392 = vmatmul.mubr.msk.f32.vlgmr.msra.gmra.mrb[12].mxu1 %vm983_vm1, %v1252_v38  ;;  %v8732_v38 = vsel %vm856_vm10, 0.0, %v8209_v51 }
 0x40f   :  { %v6372_v53 = vpop.f32.mrb[2].mxu0 }
 0x410   :  { %v1341_v54 = vadd.f32 %v6372_v53, %v8698_v52  ;;  %v1058_v57 = vpop.f32.mrb[3].mxu0 }
 0x411   :  { %v8708_v12 = vadd.f32 %v1058_v57, %v8704_v0 }
 0x412   :  { %v1352_v63 = vsel %vm1348_vm5, %v1341_v54, -inf }
 0x413   :  { %v6379_v1 = vpop.f32.mrb[10].mxu1  ;;  %1353 = vmax.xlane.f32.xlu1 %v1352_v63  ;;  %v1349_v21 = vsel %vm1348_vm5, %v8708_v12, -inf }
 0x414   :  { %v1343_v2 = vadd.f32 %v6379_v1, %v8701_v60  ;;  %v1149_v3 = vpop.f32.mrb[11].mxu1 }
 0x415   :  { %v8714_v20 = vadd.f32 %v1149_v3, %v8711_v14 }
 0x416   :  { %v1358_v13 = vsel %vm1348_vm5, %v1343_v2, -inf }
 0x417   :  { %1359 = vmax.xlane.f32.xlu0 %v1358_v13  ;;  %v6386_v15 = vpop.f32.mrb[4].mxu0  ;;  %v1355_v26 = vsel %vm1348_vm5, %v8714_v20, -inf }
 0x418   :  { %v1240_v16 = vpop.f32.mrb[5].mxu0  ;;  %v1345_v25 = vadd.f32 %v6386_v15, %v8718_v22 }
 0x419   :  { %v1344_v39 = vadd.f32 %v1240_v16, %v8732_v38 }
 0x41a   :  { %v1364_v29 = vsel %vm1348_vm5, %v1345_v25, -inf }
 0x41b   :  { %v6393_v23 = vpop.f32.mrb[12].mxu1  ;;  %1350 = vmax.xlane.f32.xlu0 %v1349_v21  ;;  %v1361_v43 = vsel %vm1348_vm5, %v1344_v39, -inf }
 0x41c   :  { %v1331_v24 = vpop.f32.mrb[13].mxu1  ;;  %v1347_v28 = vadd.f32 %v6393_v23, %v8723_v27 }
 0x41d   :  { %v8738_v42 = vadd.f32 %v1331_v24, %v8735_v41 }
 0x41e   :  { %v1370_v30 = vsel %vm1348_vm5, %v1347_v28, -inf }
 0x41f   :  { %1356 = vmax.xlane.f32.xlu0 %v1355_v26  ;;  %v1367_v40 = vsel %vm1348_vm5, %v8738_v42, -inf }
 0x423   :  { %1365 = vmax.xlane.f32.xlu0 %v1364_v29 }
 0x424   :  { %964 = vrot.lane.b32.xlu1 %v8666_v11, %s8210_s8 }
 0x427   :  { %1371 = vmax.xlane.f32.xlu0 %v1370_v30 }
 0x43d   :  { %966 = vrot.lane.b32.xlu0 %v8664_v10, %s8210_s8 }
 0x448   :  { %1362 = vmax.xlane.f32.xlu1 %v1361_v43 }
 0x44c   :  { %1368 = vmax.xlane.f32.xlu1 %v1367_v40 }
 0x4a0   :  { %v1354_v45 = vpop.xlane.xlu1 %1353 }
 0x4a1   :  { %v1374_v46 = vsub.f32 %v1341_v54, %v1354_v45 }
 0x4a3   :  { %v1383_v47 = vmul.f32 1.442695, %v1374_v46 }
 0x4a4   :  { %v1360_v50 = vpop.xlane.xlu0 %1359  ;;  %v965_v13 = vpop.permute.xlu1 %964 }
 0x4a5   :  { %7457 = vpow2.f32 %v1383_v47  ;;  %v1376_v44 = vsub.f32 %v1343_v2, %v1360_v50  ;;  %v970_v17 = vsub.f32 %v8642_v8, %v965_v13 }
 0x4a7   :  { %v1387_v53 = vmul.f32 1.442695, %v1376_v44 }
 0x4a8   :  { %v1351_v57 = vpop.xlane.xlu0 %1350 }
 0x4a9   :  { %7459 = vpow2.f32 %v1387_v53  ;;  %v1373_v8 = vsub.f32 %v8708_v12, %v1351_v57 }
 0x4ab   :  { %v1381_v29 = vmul.f32 1.442695, %v1373_v8  ;;  %v973_v8 = vld [vmem:[%s9400_s17 + $0x8] sm:$0xff] }
 0x4ac   :  { %v1357_v51 = vpop.xlane.xlu0 %1356 }
 0x4af   :  { %v8743_v58 = vpop.eup %7457 }
 0x4b0   :  { %v1366_v59 = vpop.xlane.xlu0 %1365  ;;  %v1400_v63 = vsel %vm1348_vm5, %v8743_v58, 0.0 }
 0x4b1   :  { %v1378_v1 = vsub.f32 %v1345_v25, %v1366_v59  ;;  %1401 = vadd.xlane.f32.xlu0 %v1400_v63 }
 0x4b3   :  { %v8747_v3 = vpop.eup %7459  ;;  %v1391_v7 = vmul.f32 1.442695, %v1378_v1 }
 0x4b4   :  { %v1372_v54 = vpop.xlane.xlu0 %1371  ;;  %v1406_v9 = vsel %vm1348_vm5, %v8747_v3, 0.0 }
 0x4b5   :  { %7461 = vpow2.f32 %v1391_v7  ;;  %v1380_v2 = vsub.f32 %v1347_v28, %v1372_v54  ;;  %1407 = vadd.xlane.f32.xlu0 %v1406_v9 }
 0x4b7   :  { %v1395_v15 = vmul.f32 1.442695, %v1380_v2 }
 0x4b8   :  { %v967_v16 = vpop.permute.xlu0 %966 }
 0x4b9   :  { %7463 = vpow2.f32 %v1395_v15  ;;  %v971_v21 = vsub.f32 %v8640_v6, %v967_v16  ;;  %v1375_v6 = vsub.f32 %v8714_v20, %v1357_v51 }
 0x4ba   :  { %7465 = vpow2.f32 %v1381_v29 }
 0x4bb   :  { %v7257_v23 = vpack.i.bf16 %v971_v21, %v970_v17  ;;  %v1385_v30 = vmul.f32 1.442695, %v1375_v6 }
 0x4bd   :  { %7258 = vrot.lane.b32.xlu1 %v7257_v23, %s8210_s8  ;;  %7467 = vpow2.f32 %v1385_v30 }
 0x4bf   :  { %v8754_v24 = vpop.eup %7461 }
 0x4c0   :  { %v1412_v25 = vsel %vm1348_vm5, %v8754_v24, 0.0 }
 0x4c1   :  { %1413 = vadd.xlane.f32.xlu0 %v1412_v25 }
 0x4c3   :  { %v8758_v26 = vpop.eup %7463 }
 0x4c4   :  { %v1418_v28 = vsel %vm1348_vm5, %v8758_v26, 0.0  ;;  %v7466_v32 = vpop.eup %7465 }
 0x4c5   :  { %1419 = vadd.xlane.f32.xlu0 %v1418_v28  ;;  %v1397_v35 = vsel %vm1348_vm5, %v7466_v32, 0.0  ;;  %v972_v28 = vld [vmem:[%s9400_s17] sm:$0xff] }
 0x4c7   :  { %v7468_v36 = vpop.eup %7467 }
 0x4c8   :  { %v1403_v37 = vsel %vm1348_vm5, %v7468_v36, 0.0 }
 0x4d5   :  { %v1363_v12 = vpop.xlane.xlu1 %1362 }
 0x4d6   :  { %v1377_v43 = vsub.f32 %v1344_v39, %v1363_v12 }
 0x4d8   :  { %v1389_v40 = vmul.f32 1.442695, %v1377_v43 }
 0x4d9   :  { %v1369_v20 = vpop.xlane.xlu1 %1368 }
 0x4da   :  { %v1379_v45 = vsub.f32 %v8738_v42, %v1369_v20  ;;  %7469 = vpow2.f32 %v1389_v40 }
 0x4db   :  { %7263 = vrot.lane.b32.xlu0 %v7257_v23, %s8211_s26 }
 0x4dc   :  { %v1393_v46 = vmul.f32 1.442695, %v1379_v45 }
 0x4de   :  { %7471 = vpow2.f32 %v1393_v46 }
 0x4e1   :  { %1398 = vadd.xlane.f32.xlu1 %v1397_v35 }
 0x4e4   :  { %v8769_v47 = vpop.eup %7469 }
 0x4e5   :  { %1404 = vadd.xlane.f32.xlu1 %v1403_v37  ;;  %v1409_v50 = vsel %vm1348_vm5, %v8769_v47, 0.0  ;;  %v6863_v37 = vpack.c.bf16 %v973_v8, %v972_v28 }
 0x4e8   :  { %v8773_v44 = vpop.eup %7471 }
 0x4e9   :  { %v1415_v53 = vsel %vm1348_vm5, %v8773_v44, 0.0 }
 0x4f6   :  { %7268 = vrot.lane.b32.xlu1 %v7257_v23, %s8212_s13 }
 0x51a   :  { %1410 = vadd.xlane.f32.xlu1 %v1409_v50 }
 0x51e   :  { %1416 = vadd.xlane.f32.xlu1 %v1415_v53 }
 0x52f   :  { %7273 = vrot.lane.b32.xlu1 %v7257_v23, %s8213_s28  ;;  %v7259_v39 = vpop.permute.xlu1 %7258 }
 0x530   :  { %v7261_v42 = vunpack.i.h.bf16 %v7259_v39  ;;  %v7260_v57 = vunpack.i.l.bf16 %v7259_v39  ;;  %v974_v39 = vld [vmem:[%s9400_s17 + $0x10] sm:$0xff] }
 0x532   :  { %v6847_v51 = vpack.c.bf16 %v7261_v42, %v7260_v57 }
 0x534   :  { %6848 = vmatprep.subr.bf16.mxu0 %v6847_v51 }
 0x535   :  { %6850 = vmatpush3.bf16.msra.mxu0 %v6847_v51 }
 0x53e   :  { %v1402_v59 = vpop.xlane.xlu0 %1401 }
 0x53f   :  { %7473 = vrcp.f32 %v1402_v59 }
 0x542   :  { %v1408_v63 = vpop.xlane.xlu0 %1407 }
 0x549   :  { %v7474_v25 = vpop.eup %7473 }
 0x54a   :  { %v1430_v35 = vmul.f32 %v7474_v25, %v8743_v58 }
 0x54e   :  { %v1414_v1 = vpop.xlane.xlu0 %1413 }
 0x552   :  { %v1420_v7 = vpop.xlane.xlu0 %1419 }
 0x556   :  { %v7264_v54 = vpop.permute.xlu0 %7263 }
 0x557   :  { %v7266_v9 = vunpack.i.h.bf16 %v7264_v54  ;;  %v7265_v2 = vunpack.i.l.bf16 %v7264_v54 }
 0x559   :  { %v6851_v13 = vpack.c.bf16 %v7266_v9, %v7265_v2 }
 0x55b   :  { %6852 = vmatprep.subr.bf16.mxu1 %v6851_v13 }
 0x55c   :  { %6854 = vmatpush3.bf16.msra.mxu1 %v6851_v13 }
 0x56e   :  { %v1399_v15 = vpop.xlane.xlu1 %1398 }
 0x56f   :  { %7475 = vrcp.f32 %v1399_v15 }
 0x570   :  { %7477 = vrcp.f32 %v1408_v63 }
 0x572   :  { %v1405_v16 = vpop.xlane.xlu1 %1404 }
 0x573   :  { %7479 = vrcp.f32 %v1405_v16 }
 0x574   :  { %7481 = vrcp.f32 %v1414_v1 }
 0x576   :  { %v7269_v17 = vpop.permute.xlu1 %7268 }
 0x577   :  { %v7271_v21 = vunpack.i.h.bf16 %v7269_v17  ;;  %v7270_v23 = vunpack.i.l.bf16 %v7269_v17 }
 0x579   :  { %v7476_v29 = vpop.eup %7475  ;;  %v6855_v6 = vpack.c.bf16 %v7271_v21, %v7270_v23 }
 0x57a   :  { %v1429_v30 = vmul.f32 %v7476_v29, %v7466_v32  ;;  %v7478_v12 = vpop.eup %7477 }
 0x57b   :  { %6856 = vmatprep.subr.bf16.mxu0 %v6855_v6  ;;  %v1432_v40 = vmul.f32 %v7478_v12, %v8747_v3  ;;  %v5899_v12 = vld [vmem:[#allocation10] ss:$0 sm:$0xff] }
 0x57c   :  { %6398 = vmatprep.mubr.msk.f32.mxu0 %vm1348_vm5, %v1429_v30 }
 0x57d   :  { %v7480_v43 = vpop.eup %7479  ;;  %6399 = vmatmul.mubr.msk.f32.vlgmr.msra.gmra.mrb[6].mxu0 %vm1348_vm5, %v1430_v35 }
 0x57e   :  { %6858 = vmatpush3.bf16.msra.mxu0 %v6855_v6  ;;  %v1431_v20 = vmul.f32 %v7480_v43, %v7468_v36  ;;  %v7482_v53 = vpop.eup %7481  ;;  %v975_v36 = vld [vmem:[%s9400_s17 + $0x18] sm:$0xff] }
 0x57f   :  { %6864 = vmatprep.subr.bf16.mxu0 %v6863_v37  ;;  %v1434_v51 = vmul.f32 %v7482_v53, %v8754_v24  ;;  %v6867_v59 = vpack.c.bf16 %v975_v36, %v974_v39  ;;  %v1955_v53 = vld [vmem:[%s9401_s9 + $0x8] sm:$0xff]  ;;  %v1956_v39 = vld [vmem:[%s9401_s9 + $0x10] sm:$0xff]  ;;  %v1957_v36 = vld [vmem:[%s9401_s9 + $0x18] sm:$0xff] }
 0x580   :  { %6405 = vmatprep.mubr.msk.f32.mxu1 %vm1348_vm5, %v1431_v20 }
 0x581   :  { %6406 = vmatmul.mubr.msk.f32.vlgmr.msra.gmra.mrb[14].mxu1 %vm1348_vm5, %v1432_v40 }
 0x5a7   :  { %v1411_v58 = vpop.xlane.xlu1 %1410 }
 0x5a8   :  { %7483 = vrcp.f32 %v1411_v58 }
 0x5a9   :  { %7485 = vrcp.f32 %v1420_v7 }
 0x5ab   :  { %v1417_v32 = vpop.xlane.xlu1 %1416 }
 0x5ac   :  { %7487 = vrcp.f32 %v1417_v32 }
 0x5af   :  { %v7274_v45 = vpop.permute.xlu1 %7273 }
 0x5b0   :  { %v7276_v46 = vunpack.i.h.bf16 %v7274_v45  ;;  %v7275_v50 = vunpack.i.l.bf16 %v7274_v45 }
 0x5b2   :  { %v7484_v42 = vpop.eup %7483  ;;  %v6859_v57 = vpack.c.bf16 %v7276_v46, %v7275_v50  ;;  %v1954_v50 = vld [vmem:[%s9401_s9] sm:$0xff] }
 0x5b3   :  { %v1433_v3 = vmul.f32 %v7484_v42, %v8769_v47  ;;  %v7486_v63 = vpop.eup %7485  ;;  %v6875_v42 = vpack.c.bf16 %v1957_v36, %v1956_v39 }
 0x5b4   :  { %6860 = vmatprep.subr.bf16.mxu1 %v6859_v57  ;;  %v1436_v54 = vmul.f32 %v7486_v63, %v8758_v26 }
 0x5b5   :  { %6412 = vmatprep.mubr.msk.f32.mxu0 %vm1348_vm5, %v1433_v3  ;;  %6862 = vmatpush3.bf16.msra.mxu1 %v6859_v57 }
 0x5b6   :  { %v7488_v1 = vpop.eup %7487  ;;  %6413 = vmatmul.mubr.msk.f32.vlgmr.msra.gmra.mrb[8].mxu0 %vm1348_vm5, %v1434_v51 }
 0x5b7   :  { %6866 = vmatpush3.bf16.msra.mxu0 %v6863_v37  ;;  %v1435_v7 = vmul.f32 %v7488_v1, %v8773_v44 }
 0x5b8   :  { %6868 = vmatprep.subr.bf16.mxu0 %v6867_v59 }
 0x5b9   :  { %6419 = vmatprep.mubr.msk.f32.mxu1 %vm1348_vm5, %v1435_v7 }
 0x5ba   :  { %6420 = vmatmul.mubr.msk.f32.vlgmr.msra.gmra.mrb[16].mxu1 %vm1348_vm5, %v1436_v54 }
 0x5bb   :  { %6870 = vmatpush3.bf16.msra.mxu0 %v6867_v59 }
 0x5bc   :  { %6881 = vmatprep.subr.msk.bf16.mxu0 %vm8670_vm2, %v8624_v48 }
 0x650   :  { %v6400_v24 = vpop.f32.mrb[6].mxu0 }
 0x651   :  { %v1517_v47 = vpop.f32.mrb[7].mxu0 }
 0x654   :  { %v6407_v9 = vpop.f32.mrb[14].mxu1 }
 0x655   :  { %1791 = vrot.lane.b32.xlu1 %v6407_v9, %s8179_s22  ;;  %v1604_v2 = vpop.f32.mrb[15].mxu1 }
 0x656   :  { %1789 = vrot.lane.b32.xlu0 %v1604_v2, %s8179_s22 }
 0x689   :  { %v6414_v44 = vpop.f32.mrb[8].mxu0 }
 0x68a   :  { %1799 = vrot.lane.b32.xlu1 %v6414_v44, %s8182_s29  ;;  %v1691_v26 = vpop.f32.mrb[9].mxu0 }
 0x68b   :  { %1797 = vrot.lane.b32.xlu0 %v1691_v26, %s8182_s29 }
 0x68d   :  { %v6421_v13 = vpop.f32.mrb[16].mxu1 }
 0x68e   :  { %v1778_v15 = vpop.f32.mrb[17].mxu1  ;;  %1807 = vrot.lane.b32.xlu1 %v6421_v13, %s8214_s6 }
 0x68f   :  { %1805 = vrot.lane.b32.xlu0 %v1778_v15, %s8214_s6 }
 0x6c7   :  { %v1792_v16 = vpop.permute.xlu1 %1791 }
 0x6c8   :  { %v1790_v17 = vpop.permute.xlu0 %1789  ;;  %v1812_v8 = vsel %vm983_vm1, %v6400_v24, %v1792_v16 }
 0x6c9   :  { %v1811_v25 = vsel %vm983_vm1, %v1517_v47, %v1790_v17 }
 0x6fc   :  { %v1800_v21 = vpop.permute.xlu1 %1799 }
 0x6fd   :  { %v1798_v23 = vpop.permute.xlu0 %1797  ;;  %v1814_v30 = vsel %vm1348_vm5, %v1812_v8, %v1800_v21 }
 0x6fe   :  { %v1813_v29 = vsel %vm1348_vm5, %v1811_v25, %v1798_v23 }
 0x700   :  { %v1808_v28 = vpop.permute.xlu1 %1807 }
 0x701   :  { %v1806_v6 = vpop.permute.xlu0 %1805  ;;  %v1817_v37 = vsel %vm1815_vm12, %v1814_v30, %v1808_v28  ;;  %v5903_v30 = vld [vmem:[#allocation26] ss:$0 sm:$0xff] }
 0x702   :  { %v1816_v35 = vsel %vm1815_vm12, %v1813_v29, %v1806_v6  ;;  %v5902_v29 = vld [vmem:[#allocation25] ss:$0 sm:$0xff] }
 0x703   :  { %6430 = vmatprep.mubr.msk.f32.mxu0 %vm442_vm0, %v1816_v35 }
 0x704   :  { %6431 = vmatmul.mubr.msk.f32.vlgmr.msra.gmra.mrb[10].mxu0 %vm442_vm0, %v1817_v37 }
 0x705   :  { %6884 = vmatpush3.bf16.xpose.msk.msra.mxu0 %vm8670_vm2, %v8624_v48 }
 0x706   :  { %6887 = vmatprep.subr.msk.bf16.mxu0 %vm8670_vm2, %v8628_v55 }
 0x70d   :  { %6890 = vmatpush3.bf16.xpose.msk.msra.mxu0 %vm8670_vm2, %v8628_v55  ;;  %v6871_v55 = vpack.c.bf16 %v1955_v53, %v1954_v50 }
 0x70f   :  { %6872 = vmatprep.subr.bf16.mxu1 %v6871_v55 }
 0x710   :  { %6874 = vmatpush3.bf16.msra.mxu1 %v6871_v55 }
 0x711   :  { %6876 = vmatprep.subr.bf16.mxu1 %v6875_v42 }
 0x714   :  { %6878 = vmatpush3.bf16.msra.mxu1 %v6875_v42 }
 0x7d7   :  { %v6432_v43 = vpop.f32.mrb[10].mxu0 }
 0x7d8   :  { %v1902_v20 = vadd.f32 %v6432_v43, %v5899_v12  ;;  %v1896_v40 = vpop.f32.mrb[11].mxu0 }
 0x7d9   :  { %v1897_v58 = vadd.f32 %v5899_v12, %v1896_v40 }
 0x7da   :  { %v1906_v32 = vadd.f32 %v1902_v20, %v8611_v33 }
 0x7db   :  { %v1905_v45 = vadd.f32 %v1897_v58, %v8605_v31 }
 0x7dc   :  { %v1912_v48 = vsel %vm442_vm0, %v1906_v32, 0.0 }
 0x7dd   :  { %1913 = vadd.xlane.f32.xlu1 %v1912_v48  ;;  %v1909_v46 = vsel %vm442_vm0, %v1905_v45, 0.0 }
 0x7de   :  { %1910 = vadd.xlane.f32.xlu0 %v1909_v46 }
 0x7ee   :  { %7278 = vrot.lane.b32.xlu1 %v8626_v49, %s8206_s16 }
 0x7f2   :  { %7288 = vrot.lane.b32.xlu1 %v8626_v49, %s8207_s25 }
 0x7f6   :  { %7293 = vrot.lane.b32.xlu1 %v8626_v49, %s8208_s23 }
 0x86a   :  { %v1914_v31 = vpop.xlane.xlu1 %1913 }
 0x86b   :  { %v1917_v33 = vmul.f32 0.03125, %v1914_v31  ;;  %v1911_v57 = vpop.xlane.xlu0 %1910 }
 0x86c   :  { %v1916_v3 = vmul.f32 0.03125, %v1911_v57 }
 0x86d   :  { %v1919_v51 = vsub.f32 %v1906_v32, %v1917_v33 }
 0x86e   :  { %v1918_v59 = vsub.f32 %v1905_v45, %v1916_v3  ;;  %v7279_v63 = vpop.permute.xlu1 %7278 }
 0x86f   :  { %v7281_v1 = vunpack.i.h.bf16 %v7279_v63  ;;  %v7280_v7 = vunpack.i.l.bf16 %v7279_v63  ;;  %v1921_v2 = vmul.f32 %v1919_v51, %v1919_v51 }
 0x870   :  { %v1920_v54 = vmul.f32 %v1918_v59, %v1918_v59 }
 0x871   :  { %v6891_v24 = vpack.c.bf16 %v7281_v1, %v7280_v7  ;;  %v1925_v15 = vsel %vm442_vm0, %v1921_v2, 0.0 }
 0x872   :  { %v7289_v47 = vpop.permute.xlu1 %7288  ;;  %v1922_v9 = vsel %vm442_vm0, %v1920_v54, 0.0 }
 0x873   :  { %v7291_v44 = vunpack.i.h.bf16 %v7289_v47  ;;  %v7290_v26 = vunpack.i.l.bf16 %v7289_v47  ;;  %6893 = vmatprep.subr.msk.bf16.mxu1 %vm8670_vm2, %v6891_v24  ;;  %1923 = vadd.xlane.f32.xlu0 %v1922_v9 }
 0x875   :  { %v6903_v13 = vpack.c.bf16 %v7291_v44, %v7290_v26 }
 0x876   :  { %v7294_v53 = vpop.permute.xlu1 %7293 }
 0x877   :  { %6905 = vmatprep.subr.msk.bf16.mxu0 %vm8670_vm2, %v6903_v13  ;;  %1926 = vadd.xlane.f32.xlu0 %v1925_v15  ;;  %v7295_v55 = vunpack.i.l.bf16 %v7294_v53 }
 0x88d   :  { %7283 = vrot.lane.b32.xlu0 %v8630_v56, %s8206_s16 }
 0x900   :  { %v1924_v16 = vpop.xlane.xlu0 %1923 }
 0x901   :  { %v1928_v17 = vmul.f32 0.03125, %v1924_v16 }
 0x903   :  { %v1930_v21 = vadd.f32 1e-05, %v1928_v17 }
 0x904   :  { %v1927_v23 = vpop.xlane.xlu0 %1926 }
 0x905   :  { %7489 = vrsqrt.f32 %v1930_v21  ;;  %v1929_v25 = vmul.f32 0.03125, %v1927_v23 }
 0x907   :  { %v1931_v28 = vadd.f32 1e-05, %v1929_v25 }
 0x908   :  { %v7284_v20 = vpop.permute.xlu0 %7283 }
 0x909   :  { %7491 = vrsqrt.f32 %v1931_v28  ;;  %v7286_v32 = vunpack.i.h.bf16 %v7284_v20  ;;  %v7285_v45 = vunpack.i.l.bf16 %v7284_v20 }
 0x90b   :  { %v6897_v50 = vpack.c.bf16 %v7286_v32, %v7285_v45 }
 0x90f   :  { %v7490_v8 = vpop.eup %7489 }
 0x910   :  { %v1934_v6 = vmul.f32 %v7490_v8, %v1918_v59 }
 0x912   :  { %v1942_v35 = vmul.f32 %v5902_v29, %v1934_v6 }
 0x913   :  { %v7492_v37 = vpop.eup %7491 }
 0x914   :  { %v1935_v12 = vmul.f32 %v7492_v37, %v1919_v51  ;;  %v8844_v43 = vadd.f32 %v5903_v30, %v1942_v35 }
 0x916   :  { %v1943_v40 = vmul.f32 %v5902_v29, %v1935_v12  ;;  %v1952_v58 = vadd.f32 %v8844_v43, %v8592_v19  ;;  %v7296_v19 = vunpack.i.h.bf16 %v7294_v53 }
 0x918   :  { %v8848_v48 = vadd.f32 %v5903_v30, %v1943_v40  ;;  %6441 = vmatprep.mubr.msk.f32.mxu1 %vm442_vm0, %v1952_v58  ;;  %v6915_v39 = vpack.c.bf16 %v7296_v19, %v7295_v55 }
 0x91a   :  { %v1953_v46 = vadd.f32 %v8848_v48, %v8614_v34  ;;  %v5904_v34 = vld [vmem:[#allocation11] ss:$0 sm:$0xff] }
 0x91c   :  { %6442 = vmatmul.mubr.msk.f32.vlgmr.msra.gmra.mrb[18].mxu1 %vm442_vm0, %v1953_v46 }
 0x91d   :  { %6896 = vmatpush3.bf16.xpose.msk.msra.mxu1 %vm8670_vm2, %v6891_v24 }
 0x91e   :  { %6899 = vmatprep.subr.msk.bf16.mxu1 %vm8670_vm2, %v6897_v50 }
 0x925   :  { %6902 = vmatpush3.bf16.xpose.msk.msra.mxu1 %vm8670_vm2, %v6897_v50 }
 0x926   :  { %6917 = vmatprep.subr.msk.bf16.mxu1 %vm8670_vm2, %v6915_v39 }
 0x9ef   :  { %v6443_v36 = vpop.f32.mrb[18].mxu1 }
 0x9f0   :  { %v2043_v42 = vadd.f32 %v6443_v36, %v5904_v34  ;;  %v2037_v31 = vpop.f32.mrb[19].mxu1 }
 0x9f1   :  { %v2038_v33 = vadd.f32 %v5904_v34, %v2037_v31 }
 0x9f2   :  { %2146 = vrot.lane.b32.xlu1 %v2043_v42, %s8206_s16 }
 0x9f3   :  { %2144 = vrot.lane.b32.xlu0 %v2038_v33, %s8206_s16  ;;  %6452 = vmatprep.mubr.msk.f32.mxu0 %vm983_vm1, %v2038_v33 }
 0x9f4   :  { %6453 = vmatmul.mubr.msk.f32.vlgmr.msra.gmra.mrb[12].mxu0 %vm983_vm1, %v2043_v42 }
 0x9f5   :  { %6908 = vmatpush3.bf16.xpose.msk.msra.mxu0 %vm8670_vm2, %v6903_v13 }
 0x9f6   :  { %7303 = vrot.lane.b32.xlu1 %v8630_v56, %s8208_s23 }
 0x9f7   :  { %7298 = vrot.lane.b32.xlu0 %v8630_v56, %s8207_s25 }
 0x9fa   :  { %2245 = vrot.lane.b32.xlu1 %v2043_v42, %s8207_s25 }
 0x9fb   :  { %2243 = vrot.lane.b32.xlu0 %v2038_v33, %s8207_s25 }
 0x9fe   :  { %2344 = vrot.lane.b32.xlu1 %v2043_v42, %s8208_s23 }
 0x9ff   :  { %2342 = vrot.lane.b32.xlu0 %v2038_v33, %s8208_s23 }
 0xa64   :  { %v2147_v57 = vpop.permute.xlu1 %2146 }
 0xa65   :  { %v2145_v3 = vpop.permute.xlu0 %2144 }
 0xa66   :  { %6463 = vmatprep.mubr.msk.f32.mxu1 %vm983_vm1, %v2145_v3 }
 0xa67   :  { %6464 = vmatmul.mubr.msk.f32.vlgmr.msra.gmra.mrb[20].mxu1 %vm983_vm1, %v2147_v57 }
 0xa68   :  { %6920 = vmatpush3.bf16.xpose.msk.msra.mxu1 %vm8670_vm2, %v6915_v39  ;;  %v7304_v51 = vpop.permute.xlu1 %7303 }
 0xa69   :  { %v7306_v59 = vunpack.i.h.bf16 %v7304_v51  ;;  %v7305_v63 = vunpack.i.l.bf16 %v7304_v51  ;;  %v7299_v1 = vpop.permute.xlu0 %7298 }
 0xa6a   :  { %v7301_v7 = vunpack.i.h.bf16 %v7299_v1  ;;  %v7300_v54 = vunpack.i.l.bf16 %v7299_v1 }
 0xa6b   :  { %v6921_v24 = vpack.c.bf16 %v7306_v59, %v7305_v63 }
 0xa6c   :  { %v6909_v47 = vpack.c.bf16 %v7301_v7, %v7300_v54  ;;  %v2246_v2 = vpop.permute.xlu1 %2245 }
 0xa6d   :  { %v2244_v9 = vpop.permute.xlu0 %2243  ;;  %6923 = vmatprep.subr.msk.bf16.mxu1 %vm8670_vm2, %v6921_v24 }
 0xa6e   :  { %6911 = vmatprep.subr.msk.bf16.mxu0 %vm8670_vm2, %v6909_v47  ;;  %6474 = vmatprep.mubr.msk.f32.mxu0 %vm983_vm1, %v2244_v9 }
 0xa6f   :  { %6914 = vmatpush3.bf16.xpose.msk.msra.mxu0 %vm8670_vm2, %v6909_v47 }
 0xa70   :  { %6926 = vmatpush3.bf16.xpose.msk.msra.mxu1 %vm8670_vm2, %v6921_v24  ;;  %6928 = vmatprep.subr.bf16.mxu0 %v8632_v61  ;;  %v2345_v26 = vpop.permute.xlu1 %2344 }
 0xa71   :  { %v2343_v44 = vpop.permute.xlu0 %2342 }
 0xa72   :  { %6485 = vmatprep.mubr.msk.f32.mxu1 %vm983_vm1, %v2343_v44 }
 0xa76   :  { %6475 = vmatmul.mubr.msk.f32.vlgmr.msra.gmra.mrb[14].mxu0 %vm983_vm1, %v2246_v2 }
 0xa77   :  { %6486 = vmatmul.mubr.msk.f32.vlgmr.msra.gmra.mrb[22].mxu1 %vm983_vm1, %v2345_v26  ;;  %6930 = vmatpush3.bf16.msra.mxu0 %v8632_v61 }
 0xa78   :  { %6932 = vmatprep.subr.bf16.mxu0 %v8636_v4 }
 0xa7b   :  { %6934 = vmatpush3.bf16.msra.mxu0 %v8636_v4 }
 0xac7   :  { %v6454_v13 = vpop.f32.mrb[12].mxu0 }
 0xac8   :  { %v2442_v15 = vadd.f32 %v6454_v13, %v8698_v52  ;;  %v2135_v16 = vpop.f32.mrb[13].mxu0 }
 0xac9   :  { %v2441_v17 = vadd.f32 %v2135_v16, %v8704_v0 }
 0xaca   :  { %v2452_v21 = vsel %vm442_vm0, %v2442_v15, -inf }
 0xacb   :  { %2453 = vmax.xlane.f32.xlu1 %v2452_v21  ;;  %v2449_v23 = vsel %vm442_vm0, %v2441_v17, -inf }
 0xacc   :  { %2450 = vmax.xlane.f32.xlu0 %v2449_v23 }
 0xb3a   :  { %v6465_v25 = vpop.f32.mrb[20].mxu1 }
 0xb3b   :  { %v2444_v28 = vadd.f32 %v6465_v25, %v8701_v60  ;;  %v2234_v61 = vpop.f32.mrb[21].mxu1 }
 0xb3c   :  { %v2443_v8 = vadd.f32 %v2234_v61, %v8711_v14 }
 0xb3d   :  { %v2458_v4 = vsel %vm442_vm0, %v2444_v28, -inf }
 0xb3e   :  { %2459 = vmax.xlane.f32.xlu0 %v2458_v4  ;;  %v2455_v29 = vsel %vm442_vm0, %v2443_v8, -inf }
 0xb42   :  { %2456 = vmax.xlane.f32.xlu0 %v2455_v29 }
 0xb49   :  { %v6476_v6 = vpop.f32.mrb[14].mxu0 }
 0xb4a   :  { %v2446_v30 = vadd.f32 %v6476_v6, %v8718_v22  ;;  %v6487_v35 = vpop.f32.mrb[22].mxu1  ;;  %v2333_v37 = vpop.f32.mrb[15].mxu0 }
 0xb4b   :  { %v2445_v12 = vadd.f32 %v2333_v37, %v8732_v38  ;;  %v2432_v20 = vpop.f32.mrb[23].mxu1  ;;  %v2448_v40 = vadd.f32 %v6487_v35, %v8723_v27 }
 0xb4c   :  { %v2464_v58 = vsel %vm442_vm0, %v2446_v30, -inf  ;;  %v2447_v32 = vadd.f32 %v2432_v20, %v8735_v41 }
 0xb4d   :  { %2465 = vmax.xlane.f32.xlu0 %v2464_v58  ;;  %v2461_v45 = vsel %vm442_vm0, %v2445_v12, -inf  ;;  %v2470_v46 = vsel %vm442_vm0, %v2448_v40, -inf }
 0xb4e   :  { %2462 = vmax.xlane.f32.xlu1 %v2461_v45  ;;  %v2467_v50 = vsel %vm442_vm0, %v2447_v32, -inf }
 0xb51   :  { %2471 = vmax.xlane.f32.xlu0 %v2470_v46 }
 0xb52   :  { %2468 = vmax.xlane.f32.xlu1 %v2467_v50 }
 0xb58   :  { %v2454_v53 = vpop.xlane.xlu1 %2453 }
 0xb59   :  { %v2474_v19 = vsub.f32 %v2442_v15, %v2454_v53  ;;  %v2451_v39 = vpop.xlane.xlu0 %2450 }
 0xb5a   :  { %v2473_v34 = vsub.f32 %v2441_v17, %v2451_v39 }
 0xb5b   :  { %v2483_v55 = vmul.f32 1.442695, %v2474_v19 }
 0xb5c   :  { %v2481_v36 = vmul.f32 1.442695, %v2473_v34 }
 0xb5d   :  { %7493 = vpow2.f32 %v2483_v55 }
 0xb5e   :  { %7495 = vpow2.f32 %v2481_v36 }
 0xb63   :  { %7308 = vrot.lane.b32.xlu1 %v8634_v62, %s8206_s16 }
 0xb67   :  { %7313 = vrot.lane.b32.xlu0 %v8638_v5, %s8206_s16  ;;  %7318 = vrot.lane.b32.xlu1 %v8634_v62, %s8207_s25  ;;  %v8920_v42 = vpop.eup %7493 }
 0xb68   :  { %v2500_v31 = vsel %vm442_vm0, %v8920_v42, 0.0  ;;  %v8924_v33 = vpop.eup %7495 }
 0xb69   :  { %v2497_v57 = vsel %vm442_vm0, %v8924_v33, 0.0 }
 0xb6b   :  { %7323 = vrot.lane.b32.xlu1 %v8634_v62, %s8208_s23 }
 0xb86   :  { %2501 = vadd.xlane.f32.xlu0 %v2500_v31 }
 0xb8f   :  { %2498 = vadd.xlane.f32.xlu1 %v2497_v57 }
 0xbcb   :  { %v2460_v3 = vpop.xlane.xlu0 %2459 }
 0xbcc   :  { %v2476_v51 = vsub.f32 %v2444_v28, %v2460_v3 }
 0xbce   :  { %v2487_v59 = vmul.f32 1.442695, %v2476_v51 }
 0xbcf   :  { %v2457_v63 = vpop.xlane.xlu0 %2456 }
 0xbd0   :  { %7497 = vpow2.f32 %v2487_v59  ;;  %v2475_v1 = vsub.f32 %v2443_v8, %v2457_v63 }
 0xbd2   :  { %v2485_v7 = vmul.f32 1.442695, %v2475_v1 }
 0xbd4   :  { %7499 = vpow2.f32 %v2485_v7 }
 0xbda   :  { %v8928_v54 = vpop.eup %7497  ;;  %v2466_v24 = vpop.xlane.xlu0 %2465 }
 0xbdb   :  { %v2478_v47 = vsub.f32 %v2446_v30, %v2466_v24  ;;  %v2463_v9 = vpop.xlane.xlu1 %2462  ;;  %v2506_v2 = vsel %vm442_vm0, %v8928_v54, 0.0 }
 0xbdc   :  { %v2477_v44 = vsub.f32 %v2445_v12, %v2463_v9  ;;  %2507 = vadd.xlane.f32.xlu0 %v2506_v2 }
 0xbdd   :  { %v2491_v26 = vmul.f32 1.442695, %v2478_v47 }
 0xbde   :  { %v8932_v13 = vpop.eup %7499  ;;  %v2489_v15 = vmul.f32 1.442695, %v2477_v44  ;;  %v2472_v16 = vpop.xlane.xlu0 %2471 }
 0xbdf   :  { %7501 = vpow2.f32 %v2491_v26  ;;  %v2480_v17 = vsub.f32 %v2448_v40, %v2472_v16  ;;  %v2469_v21 = vpop.xlane.xlu1 %2468  ;;  %v2503_v23 = vsel %vm442_vm0, %v8932_v13, 0.0 }
 0xbe0   :  { %7503 = vpow2.f32 %v2489_v15  ;;  %v2479_v25 = vsub.f32 %v2447_v32, %v2469_v21  ;;  %2504 = vadd.xlane.f32.xlu1 %v2503_v23 }
 0xbe1   :  { %v2495_v28 = vmul.f32 1.442695, %v2480_v17 }
 0xbe2   :  { %v2493_v61 = vmul.f32 1.442695, %v2479_v25  ;;  %v7314_v8 = vpop.permute.xlu0 %7313 }
 0xbe3   :  { %7505 = vpow2.f32 %v2495_v28  ;;  %v7316_v4 = vunpack.i.h.bf16 %v7314_v8  ;;  %v7309_v29 = vpop.permute.xlu1 %7308  ;;  %v7315_v6 = vunpack.i.l.bf16 %v7314_v8 }
 0xbe4   :  { %7507 = vpow2.f32 %v2493_v61  ;;  %v7311_v30 = vunpack.i.h.bf16 %v7309_v29  ;;  %v7310_v35 = vunpack.i.l.bf16 %v7309_v29 }
 0xbe5   :  { %v6939_v58 = vpack.c.bf16 %v7316_v4, %v7315_v6 }
 0xbe6   :  { %v6935_v37 = vpack.c.bf16 %v7311_v30, %v7310_v35 }
 0xbe7   :  { %v7319_v12 = vpop.permute.xlu1 %7318 }
 0xbe8   :  { %v7321_v20 = vunpack.i.h.bf16 %v7319_v12  ;;  %v7320_v40 = vunpack.i.l.bf16 %v7319_v12  ;;  %6936 = vmatprep.subr.bf16.mxu1 %v6935_v37 }
 0xbe9   :  { %v8936_v45 = vpop.eup %7501  ;;  %6938 = vmatpush3.bf16.msra.mxu1 %v6935_v37 }
 0xbea   :  { %v8938_v32 = vpop.eup %7503  ;;  %6940 = vmatprep.subr.bf16.mxu1 %v6939_v58  ;;  %v2512_v46 = vsel %vm442_vm0, %v8936_v45, 0.0  ;;  %v6943_v50 = vpack.c.bf16 %v7321_v20, %v7320_v40 }
 0xbeb   :  { %2513 = vadd.xlane.f32.xlu0 %v2512_v46  ;;  %v7324_v53 = vpop.permute.xlu1 %7323  ;;  %v2509_v19 = vsel %vm442_vm0, %v8938_v32, 0.0  ;;  %v2047_v46 = vld [vmem:[#allocation17 + $0x8] sm:$0xff] }
 0xbec   :  { %v7326_v55 = vunpack.i.h.bf16 %v7324_v53  ;;  %v7325_v39 = vunpack.i.l.bf16 %v7324_v53  ;;  %2510 = vadd.xlane.f32.xlu1 %v2509_v19  ;;  %6944 = vmatprep.subr.bf16.mxu0 %v6943_v50  ;;  %v2048_v19 = vld [vmem:[#allocation17 + $0x10] sm:$0xff] }
 0xbed   :  { %v7506_v34 = vpop.eup %7505  ;;  %6942 = vmatpush3.bf16.msra.mxu1 %v6939_v58 }
 0xbee   :  { %v7508_v36 = vpop.eup %7507  ;;  %v2518_v31 = vsel %vm442_vm0, %v7506_v34, 0.0  ;;  %v6951_v57 = vpack.c.bf16 %v7326_v55, %v7325_v39  ;;  %v2049_v55 = vld [vmem:[#allocation17 + $0x18] sm:$0xff] }
 0xbef   :  { %2519 = vadd.xlane.f32.xlu0 %v2518_v31  ;;  %v2515_v3 = vsel %vm442_vm0, %v7508_v36, 0.0  ;;  %v6963_v39 = vpack.c.bf16 %v2049_v55, %v2048_v19  ;;  %v3162_v55 = vld [vmem:[%s9402_s24 + $0x20] sm:$0xff] }
 0xbf0   :  { %2516 = vadd.xlane.f32.xlu1 %v2515_v3  ;;  %6952 = vmatprep.subr.bf16.mxu1 %v6951_v57 }
 0xc01   :  { %7333 = vrot.lane.b32.xlu1 %v8638_v5, %s8208_s23 }
 0xc05   :  { %7328 = vrot.lane.b32.xlu0 %v8638_v5, %s8207_s25 }
 0xc13   :  { %v2502_v51 = vpop.xlane.xlu0 %2501 }
 0xc14   :  { %7509 = vrcp.f32 %v2502_v51 }
 0xc1c   :  { %v2499_v59 = vpop.xlane.xlu1 %2498 }
 0xc1d   :  { %7511 = vrcp.f32 %v2499_v59 }
 0xc1e   :  { %v7510_v63 = vpop.eup %7509 }
 0xc1f   :  { %v2530_v24 = vmul.f32 %v7510_v63, %v8920_v42 }
 0xc27   :  { %v7512_v1 = vpop.eup %7511 }
 0xc28   :  { %v2529_v7 = vmul.f32 %v7512_v1, %v8924_v33 }
 0xc2a   :  { %6496 = vmatprep.mubr.msk.f32.mxu0 %vm442_vm0, %v2529_v7 }
 0xc2b   :  { %6497 = vmatmul.mubr.msk.f32.vlgmr.msra.gmra.mrb[16].mxu0 %vm442_vm0, %v2530_v24 }
 0xc2c   :  { %6946 = vmatpush3.bf16.msra.mxu0 %v6943_v50 }
 0xc69   :  { %v2508_v47 = vpop.xlane.xlu0 %2507 }
 0xc6a   :  { %7513 = vrcp.f32 %v2508_v47 }
 0xc6d   :  { %v2505_v9 = vpop.xlane.xlu1 %2504 }
 0xc6e   :  { %7515 = vrcp.f32 %v2505_v9 }
 0xc74   :  { %v7514_v2 = vpop.eup %7513 }
 0xc75   :  { %v2532_v33 = vmul.f32 %v7514_v2, %v8928_v54 }
 0xc78   :  { %v7516_v44 = vpop.eup %7515  ;;  %v2514_v26 = vpop.xlane.xlu0 %2513 }
 0xc79   :  { %7517 = vrcp.f32 %v2514_v26  ;;  %v2511_v15 = vpop.xlane.xlu1 %2510  ;;  %v2531_v16 = vmul.f32 %v7516_v44, %v8932_v13 }
 0xc7a   :  { %7519 = vrcp.f32 %v2511_v15  ;;  %v5939_v15 = vld [vmem:[#allocation19] ss:$0 sm:$0xff] }
 0xc7b   :  { %6507 = vmatprep.mubr.msk.f32.mxu1 %vm442_vm0, %v2531_v16 }
 0xc7c   :  { %v2520_v42 = vpop.xlane.xlu0 %2519  ;;  %6508 = vmatmul.mubr.msk.f32.vlgmr.msra.gmra.mrb[24].mxu1 %vm442_vm0, %v2532_v33 }
 0xc7d   :  { %7521 = vrcp.f32 %v2520_v42  ;;  %6954 = vmatpush3.bf16.msra.mxu1 %v6951_v57  ;;  %v2517_v17 = vpop.xlane.xlu1 %2516 }
 0xc7e   :  { %7523 = vrcp.f32 %v2517_v17 }
 0xc80   :  { %v7329_v21 = vpop.permute.xlu0 %7328 }
 0xc81   :  { %v7331_v23 = vunpack.i.h.bf16 %v7329_v21  ;;  %v7330_v25 = vunpack.i.l.bf16 %v7329_v21  ;;  %v7334_v28 = vpop.permute.xlu1 %7333 }
 0xc82   :  { %v7336_v61 = vunpack.i.h.bf16 %v7334_v28  ;;  %v7335_v8 = vunpack.i.l.bf16 %v7334_v28 }
 0xc83   :  { %v7518_v4 = vpop.eup %7517  ;;  %v6947_v13 = vpack.c.bf16 %v7331_v23, %v7330_v25 }
 0xc84   :  { %v7520_v29 = vpop.eup %7519  ;;  %v6955_v6 = vpack.c.bf16 %v7336_v61, %v7335_v8  ;;  %v2534_v35 = vmul.f32 %v7518_v4, %v8936_v45 }
 0xc85   :  { %6948 = vmatprep.subr.bf16.mxu0 %v6947_v13  ;;  %v2533_v54 = vmul.f32 %v7520_v29, %v8938_v32  ;;  %v2046_v32 = vld [vmem:[#allocation17] sm:$0xff] }
 0xc86   :  { %6950 = vmatpush3.bf16.msra.mxu0 %v6947_v13  ;;  %6956 = vmatprep.subr.bf16.mxu1 %v6955_v6  ;;  %v6959_v50 = vpack.c.bf16 %v2047_v46, %v2046_v32  ;;  %v3158_v32 = vld [vmem:[%s9402_s24] sm:$0xff]  ;;  %v3159_v46 = vld [vmem:[%s9402_s24 + $0x8] sm:$0xff] }
 0xc87   :  { %v7522_v30 = vpop.eup %7521  ;;  %6518 = vmatprep.mubr.msk.f32.mxu0 %vm442_vm0, %v2533_v54  ;;  %6958 = vmatpush3.bf16.msra.mxu1 %v6955_v6 }
 0xc88   :  { %v7524_v37 = vpop.eup %7523  ;;  %v2536_v20 = vmul.f32 %v7522_v30, %v7506_v34  ;;  %6960 = vmatprep.subr.bf16.mxu0 %v6959_v50 }
 0xc89   :  { %6519 = vmatmul.mubr.msk.f32.vlgmr.msra.gmra.mrb[18].mxu0 %vm442_vm0, %v2534_v35  ;;  %v2535_v12 = vmul.f32 %v7524_v37, %v7508_v36  ;;  %v3064_v35 = vld [vmem:[#allocation20] sm:$0xff]  ;;  %v3065_v37 = vld [vmem:[#allocation20 + $0x8] sm:$0xff] }
 0xc8a   :  { %6962 = vmatpush3.bf16.msra.mxu0 %v6959_v50  ;;  %v3160_v50 = vld [vmem:[%s9402_s24 + $0x10] sm:$0xff] }
 0xc8b   :  { %6529 = vmatprep.mubr.msk.f32.mxu1 %vm442_vm0, %v2535_v12  ;;  %6964 = vmatprep.subr.bf16.mxu0 %v6963_v39  ;;  %v3066_v12 = vld [vmem:[#allocation20 + $0x10] sm:$0xff] }
 0xc8c   :  { %6530 = vmatmul.mubr.msk.f32.vlgmr.msra.gmra.mrb[26].mxu1 %vm442_vm0, %v2536_v20  ;;  %v6967_v20 = vpack.c.bf16 %v3065_v37, %v3064_v35 }
 0xc8e   :  { %6966 = vmatpush3.bf16.msra.mxu0 %v6963_v39  ;;  %6968 = vmatprep.subr.bf16.mxu1 %v6967_v20  ;;  %v3163_v39 = vld [vmem:[%s9402_s24 + $0x28] sm:$0xff] }
 0xc8f   :  { %6970 = vmatpush3.bf16.msra.mxu1 %v6967_v20 }
 0xcfe   :  { %v6498_v40 = vpop.f32.mrb[16].mxu0 }
 0xcff   :  { %v2609_v58 = vpop.f32.mrb[17].mxu0 }
 0xd4f   :  { %v6509_v53 = vpop.f32.mrb[24].mxu1 }
 0xd50   :  { %2905 = vrot.lane.b32.xlu1 %v6509_v53, %s8179_s22  ;;  %v2706_v45 = vpop.f32.mrb[25].mxu1  ;;  %v6975_v53 = vpack.c.bf16 %v3159_v46, %v3158_v32 }
 0xd51   :  { %2903 = vrot.lane.b32.xlu0 %v2706_v45, %s8179_s22  ;;  %v3161_v45 = vld [vmem:[%s9402_s24 + $0x18] sm:$0xff] }
 0xd52   :  { %v6979_v19 = vpack.c.bf16 %v3161_v45, %v3160_v50  ;;  %6976 = vmatprep.subr.bf16.mxu0 %v6975_v53 }
 0xd5c   :  { %v6520_v34 = vpop.f32.mrb[18].mxu0 }
 0xd5d   :  { %v2799_v36 = vpop.f32.mrb[19].mxu0  ;;  %2913 = vrot.lane.b32.xlu1 %v6520_v34, %s8182_s29  ;;  %v6983_v34 = vpack.c.bf16 %v3163_v39, %v3162_v55  ;;  %v5953_v55 = vld [vmem:[%s9396_s11 + $0x28] sm:$0xff]  ;;  %v5954_v39 = vld [vmem:[%s9396_s11 + $0x30] sm:$0xff] }
 0xd5e   :  { %2911 = vrot.lane.b32.xlu0 %v2799_v36, %s8182_s29 }
 0xd5f   :  { %v6531_v31 = vpop.f32.mrb[26].mxu1 }
 0xd60   :  { %v2892_v57 = vpop.f32.mrb[27].mxu1 }
 0xd61   :  { %2921 = vrot.lane.b32.xlu1 %v6531_v31, %s8214_s6 }
 0xd62   :  { %2919 = vrot.lane.b32.xlu0 %v2892_v57, %s8214_s6 }
 0xdc2   :  { %v2906_v3 = vpop.permute.xlu1 %2905 }
 0xdc3   :  { %v2904_v51 = vpop.permute.xlu0 %2903  ;;  %v2926_v24 = vsel %vm983_vm1, %v6498_v40, %v2906_v3  ;;  %v3067_v40 = vld [vmem:[#allocation20 + $0x18] sm:$0xff] }
 0xdc4   :  { %v2925_v1 = vsel %vm983_vm1, %v2609_v58, %v2904_v51  ;;  %v6971_v58 = vpack.c.bf16 %v3067_v40, %v3066_v12 }
 0xdc6   :  { %6972 = vmatprep.subr.bf16.mxu1 %v6971_v58 }
 0xdc7   :  { %6974 = vmatpush3.bf16.msra.mxu1 %v6971_v58 }
 0xdcf   :  { %v2914_v59 = vpop.permute.xlu1 %2913 }
 0xdd0   :  { %v2912_v63 = vpop.permute.xlu0 %2911  ;;  %v2928_v2 = vsel %vm1348_vm5, %v2926_v24, %v2914_v59  ;;  %v5943_v24 = vld [vmem:[#allocation29] ss:$0 sm:$0xff] }
 0xdd1   :  { %v2927_v47 = vsel %vm1348_vm5, %v2925_v1, %v2912_v63  ;;  %v5942_v1 = vld [vmem:[#allocation28] ss:$0 sm:$0xff] }
 0xdd3   :  { %v2922_v7 = vpop.permute.xlu1 %2921 }
 0xdd4   :  { %v2920_v9 = vpop.permute.xlu0 %2919  ;;  %v2930_v26 = vsel %vm1815_vm12, %v2928_v2, %v2922_v7 }
 0xdd5   :  { %v2929_v44 = vsel %vm1815_vm12, %v2927_v47, %v2920_v9 }
 0xdd6   :  { %6540 = vmatprep.mubr.msk.f32.mxu0 %vm442_vm0, %v2929_v44 }
 0xdd7   :  { %6541 = vmatmul.mubr.msk.f32.vlgmr.msra.gmra.mrb[20].mxu0 %vm442_vm0, %v2930_v26 }
 0xdd8   :  { %6978 = vmatpush3.bf16.msra.mxu0 %v6975_v53 }
 0xdd9   :  { %6980 = vmatprep.subr.bf16.mxu0 %v6979_v19 }
 0xddc   :  { %6982 = vmatpush3.bf16.msra.mxu0 %v6979_v19  ;;  %v5952_v19 = vld [vmem:[%s9396_s11 + $0x20] sm:$0xff] }
 0xddd   :  { %6984 = vmatprep.subr.bf16.mxu0 %v6983_v34 }
 0xde0   :  { %6986 = vmatpush3.bf16.msra.mxu0 %v6983_v34  ;;  %v6991_v34 = vpack.c.bf16 %v5953_v55, %v5952_v19 }
 0xde2   :  { %6992 = vmatprep.subr.bf16.mxu1 %v6991_v34 }
 0xeaa   :  { %v6542_v16 = vpop.f32.mrb[20].mxu0 }
 0xeab   :  { %v3015_v33 = vadd.f32 %v6542_v16, %v5939_v15  ;;  %v3009_v42 = vpop.f32.mrb[21].mxu0  ;;  %v3164_v16 = vld [vmem:[%s9402_s24 + $0x30] sm:$0xff] }
 0xeac   :  { %v3010_v17 = vadd.f32 %v5939_v15, %v3009_v42 }
 0xead   :  { %v3019_v21 = vadd.f32 %v3015_v33, %v8848_v48  ;;  %v3165_v33 = vld [vmem:[%s9402_s24 + $0x38] sm:$0xff] }
 0xeae   :  { %v3018_v23 = vadd.f32 %v3010_v17, %v8844_v43  ;;  %v6987_v42 = vpack.c.bf16 %v3165_v33, %v3164_v16  ;;  %v5944_v17 = vld [vmem:[#allocation22] ss:$0 sm:$0xff] }
 0xeaf   :  { %v3025_v25 = vsel %vm442_vm0, %v3019_v21, 0.0 }
 0xeb0   :  { %3026 = vadd.xlane.f32.xlu1 %v3025_v25  ;;  %v3022_v28 = vsel %vm442_vm0, %v3018_v23, 0.0  ;;  %6988 = vmatprep.subr.bf16.mxu0 %v6987_v42 }
 0xeb1   :  { %3023 = vadd.xlane.f32.xlu0 %v3022_v28  ;;  %6990 = vmatpush3.bf16.msra.mxu0 %v6987_v42  ;;  %v9009_v42 = vld [vmem:[%s9395_s27] sm:$0xff] }
 0xf3d   :  { %v3027_v61 = vpop.xlane.xlu1 %3026 }
 0xf3e   :  { %v3029_v8 = vmul.f32 0.03125, %v3027_v61  ;;  %v3024_v4 = vpop.xlane.xlu0 %3023 }
 0xf3f   :  { %v3028_v13 = vmul.f32 0.03125, %v3024_v4  ;;  %v5947_v4 = vld [vmem:[#allocation23] ss:$0 sm:$0xff] }
 0xf40   :  { %v3031_v29 = vsub.f32 %v3019_v21, %v3029_v8 }
 0xf41   :  { %v3030_v6 = vsub.f32 %v3018_v23, %v3028_v13 }
 0xf42   :  { %v3033_v48 = vmul.f32 %v3031_v29, %v3031_v29 }
 0xf43   :  { %v3032_v54 = vmul.f32 %v3030_v6, %v3030_v6 }
 0xf44   :  { %v3037_v43 = vsel %vm442_vm0, %v3033_v48, 0.0 }
 0xf45   :  { %v3034_v30 = vsel %vm442_vm0, %v3032_v54, 0.0 }
 0xf46   :  { %3035 = vadd.xlane.f32.xlu0 %v3034_v30 }
 0xf4a   :  { %3038 = vadd.xlane.f32.xlu0 %v3037_v43 }
 0xfd3   :  { %v3036_v36 = vpop.xlane.xlu0 %3035 }
 0xfd4   :  { %v3040_v31 = vmul.f32 0.03125, %v3036_v36  ;;  %v5955_v36 = vld [vmem:[%s9396_s11 + $0x38] sm:$0xff] }
 0xfd6   :  { %v3042_v57 = vadd.f32 1e-05, %v3040_v31  ;;  %v6995_v31 = vpack.c.bf16 %v5955_v36, %v5954_v39 }
 0xfd7   :  { %v3039_v3 = vpop.xlane.xlu0 %3038 }
 0xfd8   :  { %7525 = vrsqrt.f32 %v3042_v57  ;;  %v3041_v51 = vmul.f32 0.03125, %v3039_v3 }
 0xfda   :  { %v3043_v59 = vadd.f32 1e-05, %v3041_v51 }
 0xfdc   :  { %7527 = vrsqrt.f32 %v3043_v59 }
 0xfe2   :  { %v7526_v63 = vpop.eup %7525 }
 0xfe3   :  { %v3046_v7 = vmul.f32 %v7526_v63, %v3030_v6 }
 0xfe5   :  { %v3054_v47 = vmul.f32 %v5942_v1, %v3046_v7 }
 0xfe6   :  { %v7528_v9 = vpop.eup %7527 }
 0xfe7   :  { %v3047_v2 = vmul.f32 %v7528_v9, %v3031_v29  ;;  %v3062_v44 = vadd.f32 %v5943_v24, %v3054_v47 }
 0xfe9   :  { %v3055_v26 = vmul.f32 %v5942_v1, %v3047_v2  ;;  %6551 = vmatprep.mubr.msk.f32.mxu1 %vm442_vm0, %v3062_v44  ;;  %v5951_v2 = vld [vmem:[#allocation32] ss:$0 sm:$0xff] }
 0xfeb   :  { %v3063_v15 = vadd.f32 %v5943_v24, %v3055_v26  ;;  %v5950_v24 = vld [vmem:[#allocation31] ss:$0 sm:$0xff] }
 0xfed   :  { %6552 = vmatmul.mubr.msk.f32.vlgmr.msra.gmra.mrb[28].mxu1 %vm442_vm0, %v3063_v15 }
 0xfee   :  { %6994 = vmatpush3.bf16.msra.mxu1 %v6991_v34 }
 0xfef   :  { %6996 = vmatprep.subr.bf16.mxu1 %v6995_v31 }
 0xff2   :  { %6998 = vmatpush3.bf16.msra.mxu1 %v6995_v31 }
0x10c0   :  { %v6553_v21 = vpop.f32.mrb[28].mxu1 }
0x10c1   :  { %v3153_v23 = vadd.f32 %v6553_v21, %v5944_v17  ;;  %v3147_v25 = vpop.f32.mrb[29].mxu1  ;;  %v9014_v21 = vld [vmem:[%s9395_s27 + $0x8] sm:$0xff] }
0x10c2   :  { %v3148_v28 = vadd.f32 %v5944_v17, %v3147_v25  ;;  %v5956_v25 = vld [vmem:[#allocation7 + $0x1] ss:$0 sm:$0xff] }
0x10c3   :  { %v3157_v8 = vmax.f32 %v3153_v23, 0.0 }
0x10c4   :  { %v3156_v61 = vmax.f32 %v3148_v28, 0.0 }
0x10c6   :  { %6570 = vmatprep.mubr.msk.f32.mxu0 %vm3173_vm13, %v3156_v61 }
0x10c7   :  { %6571 = vmatmul.mubr.msk.f32.vlgmr.msra.gmra.mrb[22].mxu0 %vm3173_vm13, %v3157_v8 }
0x119a   :  { %v6572_v13 = vpop.f32.mrb[22].mxu0 }
0x119b   :  { %v3252_v29 = vadd.f32 %v6572_v13, %v5947_v4  ;;  %v3246_v6 = vpop.f32.mrb[23].mxu0 }
0x119c   :  { %v3247_v54 = vadd.f32 %v5947_v4, %v3246_v6 }
0x119d   :  { %v3256_v30 = vadd.f32 %v3252_v29, %v3063_v15 }
0x119e   :  { %v3255_v48 = vadd.f32 %v3247_v54, %v3062_v44 }
0x119f   :  { %v3262_v43 = vsel %vm442_vm0, %v3256_v30, 0.0 }
0x11a0   :  { %3263 = vadd.xlane.f32.xlu0 %v3262_v43  ;;  %v3259_v35 = vsel %vm442_vm0, %v3255_v48, 0.0 }
0x11a1   :  { %3260 = vadd.xlane.f32.xlu1 %v3259_v35 }
0x122d   :  { %v3264_v37 = vpop.xlane.xlu0 %3263 }
0x122e   :  { %v3266_v12 = vmul.f32 0.03125, %v3264_v37  ;;  %v3261_v20 = vpop.xlane.xlu1 %3260 }
0x122f   :  { %v3265_v40 = vmul.f32 0.03125, %v3261_v20 }
0x1230   :  { %v3268_v58 = vsub.f32 %v3256_v30, %v3266_v12 }
0x1231   :  { %v3267_v32 = vsub.f32 %v3255_v48, %v3265_v40 }
0x1232   :  { %v3270_v46 = vmul.f32 %v3268_v58, %v3268_v58 }
0x1233   :  { %v3269_v50 = vmul.f32 %v3267_v32, %v3267_v32 }
0x1234   :  { %v3274_v53 = vsel %vm442_vm0, %v3270_v46, 0.0 }
0x1235   :  { %3275 = vadd.xlane.f32.xlu0 %v3274_v53  ;;  %v3271_v45 = vsel %vm442_vm0, %v3269_v50, 0.0 }
0x1236   :  { %3272 = vadd.xlane.f32.xlu1 %v3271_v45 }
0x12c2   :  { %v3276_v57 = vpop.xlane.xlu0 %3275 }
0x12c3   :  { %v3278_v3 = vmul.f32 0.03125, %v3276_v57  ;;  %v3273_v51 = vpop.xlane.xlu1 %3272 }
0x12c4   :  { %v3277_v59 = vmul.f32 0.03125, %v3273_v51 }
0x12c5   :  { %v3280_v63 = vadd.f32 1e-05, %v3278_v3 }
0x12c6   :  { %v3279_v1 = vadd.f32 1e-05, %v3277_v59 }
0x12c7   :  { %7529 = vrsqrt.f32 %v3280_v63 }
0x12c8   :  { %7531 = vrsqrt.f32 %v3279_v1 }
0x12d1   :  { %v7530_v7 = vpop.eup %7529 }
0x12d2   :  { %v7532_v47 = vpop.eup %7531  ;;  %v3284_v9 = vmul.f32 %v7530_v7, %v3268_v58 }
0x12d3   :  { %v3283_v44 = vmul.f32 %v7532_v47, %v3267_v32 }
0x12d4   :  { %v3292_v26 = vmul.f32 %v5950_v24, %v3284_v9 }
0x12d5   :  { %v3291_v15 = vmul.f32 %v5950_v24, %v3283_v44 }
0x12d6   :  { %v9004_v16 = vadd.f32 %v5951_v2, %v3292_v26 }
0x12d7   :  { %v9006_v33 = vadd.f32 %v5951_v2, %v3291_v15 }
0x12d8   :  { %v3302_v23 = vadd.f32 %v9014_v21, %v9004_v16 }
0x12d9   :  { %v3301_v17 = vadd.f32 %v9009_v42, %v9006_v33 }
0x12db   :  { %6581 = vmatprep.mubr.msk.f32.mxu1 %vm442_vm0, %v3301_v17 }
0x12dc   :  { %6582 = vmatmul.mubr.msk.f32.vlgmr.msra.gmra.mrb[30].mxu1 %vm442_vm0, %v3302_v23 }
0x13af   :  { %v6583_v28 = vpop.f32.mrb[30].mxu1 }
0x13b0   :  { %v9020_v61 = vadd.f32 %v6583_v28, %v5956_v25  ;;  %v3388_v8 = vpop.f32.mrb[31].mxu1 }
0x13b1   :  { %v9022_v4 = vadd.f32 %v5956_v25, %v3388_v8 }
0x13b3   :  { %6588 = vmatprep.mubr.msk.f32.mxu1 %vm983_vm1, %v9022_v4  ;;  %v7342_v13 = vpack.i.bf16 %v9020_v61, %v9022_v4 }
0x13b5   :  { %7343 = vrot.lane.b32.xlu0 %v7342_v13, %s8205_s30  ;;  %7338 = vrot.lane.b32.xlu1 %v7342_v13, %s8203_s4 }
0x13b9   :  { %3501 = vrot.lane.b32.xlu0 %v9022_v4, %s8206_s16  ;;  %7348 = vrot.lane.b32.xlu1 %v7342_v13, %s8202_s15 }
0x13bd   :  { %3592 = vrot.lane.b32.xlu0 %v9022_v4, %s8207_s25  ;;  %7353 = vrot.lane.b32.xlu1 %v7342_v13, %s8204_s19 }
0x13c1   :  { %3683 = vrot.lane.b32.xlu0 %v9022_v4, %s8208_s23  ;;  %3503 = vrot.lane.b32.xlu1 %v9020_v61, %s8206_s16 }
0x13c5   :  { %3594 = vrot.lane.b32.xlu1 %v9020_v61, %s8207_s25 }
0x13c9   :  { %3685 = vrot.lane.b32.xlu1 %v9020_v61, %s8208_s23 }
0x1427   :  { %v7344_v29 = vpop.permute.xlu0 %7343  ;;  %v7339_v6 = vpop.permute.xlu1 %7338 }
0x1428   :  { %v7346_v54 = vunpack.i.h.bf16 %v7344_v29  ;;  %v7345_v30 = vunpack.i.l.bf16 %v7344_v29  ;;  %v7341_v48 = vunpack.i.h.bf16 %v7339_v6  ;;  %v7340_v43 = vunpack.i.l.bf16 %v7339_v6 }
0x142a   :  { %v7005_v35 = vpack.c.bf16 %v7346_v54, %v7345_v30  ;;  %v6999_v37 = vpack.c.bf16 %v7341_v48, %v7340_v43 }
0x142b   :  { %v3502_v12 = vpop.permute.xlu0 %3501  ;;  %v7349_v20 = vpop.permute.xlu1 %7348 }
0x142c   :  { %v7351_v40 = vunpack.i.h.bf16 %v7349_v20  ;;  %v7350_v58 = vunpack.i.l.bf16 %v7349_v20  ;;  %7001 = vmatprep.subr.msk.bf16.mxu1 %vm8670_vm2, %v6999_v37  ;;  %7007 = vmatprep.subr.msk.bf16.mxu0 %vm8670_vm2, %v7005_v35 }
0x142d   :  { %6595 = vmatprep.mubr.msk.f32.mxu0 %vm983_vm1, %v3502_v12  ;;  %7004 = vmatpush3.bf16.xpose.msk.msra.mxu1 %vm8670_vm2, %v6999_v37 }
0x142e   :  { %v7011_v32 = vpack.c.bf16 %v7351_v40, %v7350_v58  ;;  %7010 = vmatpush3.bf16.xpose.msk.msra.mxu0 %vm8670_vm2, %v7005_v35 }
0x142f   :  { %v3593_v46 = vpop.permute.xlu0 %3592  ;;  %v7354_v50 = vpop.permute.xlu1 %7353 }
0x1430   :  { %v7356_v53 = vunpack.i.h.bf16 %v7354_v50  ;;  %v7355_v45 = vunpack.i.l.bf16 %v7354_v50  ;;  %7013 = vmatprep.subr.msk.bf16.mxu1 %vm8670_vm2, %v7011_v32 }
0x1432   :  { %v7017_v19 = vpack.c.bf16 %v7356_v53, %v7355_v45 }
0x1433   :  { %v3504_v55 = vpop.permute.xlu1 %3503  ;;  %v3684_v39 = vpop.permute.xlu0 %3683 }
0x1434   :  { %6589 = vmatmul.mubr.msk.f32.vlgmr.msra.gmra.mrb[32].mxu1 %vm983_vm1, %v9020_v61  ;;  %7019 = vmatprep.subr.msk.bf16.mxu0 %vm8670_vm2, %v7017_v19 }
0x1435   :  { %6596 = vmatmul.mubr.msk.f32.vlgmr.msra.gmra.mrb[24].mxu0 %vm983_vm1, %v3504_v55  ;;  %7016 = vmatpush3.bf16.xpose.msk.msra.mxu1 %vm8670_vm2, %v7011_v32 }
0x1436   :  { %6602 = vmatprep.mubr.msk.f32.mxu1 %vm983_vm1, %v3593_v46  ;;  %7022 = vmatpush3.bf16.xpose.msk.msra.mxu0 %vm8670_vm2, %v7017_v19 }
0x1437   :  { %6609 = vmatprep.mubr.msk.f32.mxu0 %vm983_vm1, %v3684_v39  ;;  %v3595_v34 = vpop.permute.xlu1 %3594 }
0x143b   :  { %v3686_v36 = vpop.permute.xlu1 %3685 }
0x143c   :  { %6603 = vmatmul.mubr.msk.f32.vlgmr.msra.gmra.mrb[34].mxu1 %vm983_vm1, %v3595_v34 }
0x143d   :  { %6610 = vmatmul.mubr.msk.f32.vlgmr.msra.gmra.mrb[26].mxu0 %vm983_vm1, %v3686_v36 }
0x1507   :  { %v6590_v31 = vpop.f32.mrb[32].mxu1 }
0x1508   :  { %v3775_v57 = vadd.f32 %v6590_v31, %v8698_v52  ;;  %v6597_v3 = vpop.f32.mrb[24].mxu0  ;;  %v3492_v51 = vpop.f32.mrb[33].mxu1 }
0x1509   :  { %v3777_v59 = vadd.f32 %v6597_v3, %v8701_v60  ;;  %v3583_v63 = vpop.f32.mrb[25].mxu0  ;;  %v9072_v7 = vadd.f32 %v3492_v51, %v8704_v0 }
0x150a   :  { %v3785_v1 = vsel %vm1348_vm5, %v3775_v57, -inf  ;;  %v9076_v47 = vadd.f32 %v3583_v63, %v8711_v14 }
0x150b   :  { %v3791_v24 = vsel %vm1348_vm5, %v3777_v59, -inf  ;;  %3786 = vmax.xlane.f32.xlu1 %v3785_v1  ;;  %v3782_v9 = vsel %vm1348_vm5, %v9072_v7, -inf }
0x150c   :  { %3792 = vmax.xlane.f32.xlu0 %v3791_v24  ;;  %v3788_v23 = vsel %vm1348_vm5, %v9076_v47, -inf }
0x150f   :  { %v6604_v2 = vpop.f32.mrb[34].mxu1 }
0x1510   :  { %v6611_v44 = vpop.f32.mrb[26].mxu0  ;;  %3783 = vmax.xlane.f32.xlu0 %v3782_v9  ;;  %v3674_v26 = vpop.f32.mrb[35].mxu1  ;;  %v3779_v17 = vadd.f32 %v6604_v2, %v8718_v22 }
0x1511   :  { %v3765_v15 = vpop.f32.mrb[27].mxu0  ;;  %v3781_v25 = vadd.f32 %v6611_v44, %v8723_v27  ;;  %v3778_v13 = vadd.f32 %v3674_v26, %v8732_v38 }
0x1512   :  { %v3797_v28 = vsel %vm1348_vm5, %v3779_v17, -inf  ;;  %v3780_v29 = vadd.f32 %v3765_v15, %v8735_v41 }
0x1513   :  { %v3803_v8 = vsel %vm1348_vm5, %v3781_v25, -inf  ;;  %v3794_v6 = vsel %vm1348_vm5, %v3778_v13, -inf }
0x1514   :  { %3789 = vmax.xlane.f32.xlu0 %v3788_v23  ;;  %v3800_v54 = vsel %vm1348_vm5, %v3780_v29, -inf }
0x1518   :  { %3798 = vmax.xlane.f32.xlu0 %v3797_v28 }
0x151c   :  { %3804 = vmax.xlane.f32.xlu0 %v3803_v8  ;;  %3397 = vrot.lane.b32.xlu1 %v8666_v11, %s8215_s1 }
0x1532   :  { %3399 = vrot.lane.b32.xlu0 %v8664_v10, %s8215_s1 }
0x1540   :  { %3795 = vmax.xlane.f32.xlu1 %v3794_v6 }
0x1544   :  { %3801 = vmax.xlane.f32.xlu1 %v3800_v54 }
0x1598   :  { %v3787_v30 = vpop.xlane.xlu1 %3786 }
0x1599   :  { %v3793_v48 = vpop.xlane.xlu0 %3792  ;;  %v3807_v43 = vsub.f32 %v3775_v57, %v3787_v30 }
0x159a   :  { %v3809_v35 = vsub.f32 %v3777_v59, %v3793_v48 }
0x159b   :  { %v3816_v37 = vmul.f32 1.442695, %v3807_v43 }
0x159c   :  { %v3820_v12 = vmul.f32 1.442695, %v3809_v35  ;;  %v3398_v19 = vpop.permute.xlu1 %3397 }
0x159d   :  { %7533 = vpow2.f32 %v3816_v37  ;;  %v3784_v11 = vpop.xlane.xlu0 %3783  ;;  %v3403_v36 = vsub.f32 %v9022_v4, %v3398_v19 }
0x159e   :  { %7535 = vpow2.f32 %v3820_v12  ;;  %v3806_v4 = vsub.f32 %v9072_v7, %v3784_v11 }
0x15a0   :  { %v3814_v1 = vmul.f32 1.442695, %v3806_v4 }
0x15a1   :  { %v3790_v10 = vpop.xlane.xlu0 %3789 }
0x15a5   :  { %v3799_v20 = vpop.xlane.xlu0 %3798 }
0x15a6   :  { %v3811_v40 = vsub.f32 %v3779_v17, %v3799_v20 }
0x15a7   :  { %v9092_v58 = vpop.eup %7533 }
0x15a8   :  { %v3824_v32 = vmul.f32 1.442695, %v3811_v40  ;;  %v3833_v46 = vsel %vm1348_vm5, %v9092_v58, 0.0  ;;  %v9096_v50 = vpop.eup %7535 }
0x15a9   :  { %v3805_v53 = vpop.xlane.xlu0 %3804  ;;  %3834 = vadd.xlane.f32.xlu0 %v3833_v46  ;;  %v3839_v39 = vsel %vm1348_vm5, %v9096_v50, 0.0 }
0x15aa   :  { %7537 = vpow2.f32 %v3824_v32  ;;  %v3813_v45 = vsub.f32 %v3781_v25, %v3805_v53 }
0x15ac   :  { %v3828_v55 = vmul.f32 1.442695, %v3813_v45 }
0x15ad   :  { %v3400_v34 = vpop.permute.xlu0 %3399  ;;  %3840 = vadd.xlane.f32.xlu0 %v3839_v39 }
0x15ae   :  { %7539 = vpow2.f32 %v3828_v55  ;;  %v3404_v31 = vsub.f32 %v9020_v61, %v3400_v34  ;;  %v3808_v61 = vsub.f32 %v9076_v47, %v3790_v10 }
0x15af   :  { %7541 = vpow2.f32 %v3814_v1 }
0x15b0   :  { %v7357_v57 = vpack.i.bf16 %v3404_v31, %v3403_v36  ;;  %v3818_v24 = vmul.f32 1.442695, %v3808_v61 }
0x15b2   :  { %7358 = vrot.lane.b32.xlu1 %v7357_v57, %s8210_s8  ;;  %7543 = vpow2.f32 %v3818_v24 }
0x15b4   :  { %v9103_v3 = vpop.eup %7537 }
0x15b5   :  { %v3845_v51 = vsel %vm1348_vm5, %v9103_v3, 0.0 }
0x15b6   :  { %3846 = vadd.xlane.f32.xlu0 %v3845_v51 }
0x15b8   :  { %v9107_v59 = vpop.eup %7539 }
0x15b9   :  { %v3851_v63 = vsel %vm1348_vm5, %v9107_v59, 0.0  ;;  %v7542_v9 = vpop.eup %7541 }
0x15ba   :  { %3852 = vadd.xlane.f32.xlu0 %v3851_v63  ;;  %v3830_v2 = vsel %vm1348_vm5, %v7542_v9, 0.0 }
0x15bc   :  { %v7544_v44 = vpop.eup %7543 }
0x15bd   :  { %v3836_v26 = vsel %vm1348_vm5, %v7544_v44, 0.0 }
0x15cd   :  { %v3796_v15 = vpop.xlane.xlu1 %3795 }
0x15ce   :  { %v3810_v7 = vsub.f32 %v3778_v13, %v3796_v15 }
0x15d0   :  { %7363 = vrot.lane.b32.xlu0 %v7357_v57, %s8211_s26  ;;  %v3822_v23 = vmul.f32 1.442695, %v3810_v7 }
0x15d1   :  { %v3802_v17 = vpop.xlane.xlu1 %3801 }
0x15d2   :  { %v3812_v47 = vsub.f32 %v3780_v29, %v3802_v17  ;;  %7545 = vpow2.f32 %v3822_v23 }
0x15d4   :  { %v3826_v25 = vmul.f32 1.442695, %v3812_v47 }
0x15d6   :  { %3831 = vadd.xlane.f32.xlu1 %v3830_v2  ;;  %7547 = vpow2.f32 %v3826_v25  ;;  %v5959_v25 = vld [vmem:[%s9400_s17 + $0x20] sm:$0xff] }
0x15da   :  { %3837 = vadd.xlane.f32.xlu1 %v3836_v26 }
0x15dc   :  { %v7546_v28 = vpop.eup %7545 }
0x15dd   :  { %v3842_v8 = vsel %vm1348_vm5, %v7546_v28, 0.0 }
0x15e0   :  { %v9118_v6 = vpop.eup %7547 }
0x15e1   :  { %v3848_v54 = vsel %vm1348_vm5, %v9118_v6, 0.0 }
0x15eb   :  { %7368 = vrot.lane.b32.xlu1 %v7357_v57, %s8212_s13 }
0x160f   :  { %3843 = vadd.xlane.f32.xlu1 %v3842_v8 }
0x1613   :  { %3849 = vadd.xlane.f32.xlu1 %v3848_v54 }
0x1624   :  { %7373 = vrot.lane.b32.xlu1 %v7357_v57, %s8213_s28  ;;  %v7359_v30 = vpop.permute.xlu1 %7358 }
0x1625   :  { %v7361_v13 = vunpack.i.h.bf16 %v7359_v30  ;;  %v7360_v48 = vunpack.i.l.bf16 %v7359_v30 }
0x1627   :  { %v7023_v43 = vpack.c.bf16 %v7361_v13, %v7360_v48  ;;  %v5962_v48 = vld [vmem:[%s9400_s17 + $0x38] sm:$0xff] }
0x1629   :  { %7024 = vmatprep.subr.bf16.mxu1 %v7023_v43 }
0x162a   :  { %7026 = vmatpush3.bf16.msra.mxu1 %v7023_v43 }
0x1636   :  { %v3835_v29 = vpop.xlane.xlu0 %3834 }
0x1637   :  { %7549 = vrcp.f32 %v3835_v29 }
0x163a   :  { %v3841_v35 = vpop.xlane.xlu0 %3840 }
0x1641   :  { %v7550_v55 = vpop.eup %7549 }
0x1642   :  { %v3863_v31 = vmul.f32 %v7550_v55, %v9092_v58 }
0x1643   :  { %v3847_v37 = vpop.xlane.xlu0 %3846 }
0x1647   :  { %v3853_v12 = vpop.xlane.xlu0 %3852 }
0x164b   :  { %v7364_v11 = vpop.permute.xlu0 %7363 }
0x164c   :  { %v7366_v10 = vunpack.i.h.bf16 %v7364_v11  ;;  %v7365_v20 = vunpack.i.l.bf16 %v7364_v11 }
0x164e   :  { %v7027_v40 = vpack.c.bf16 %v7366_v10, %v7365_v20 }
0x1650   :  { %7028 = vmatprep.subr.bf16.mxu1 %v7027_v40 }
0x1663   :  { %v3832_v32 = vpop.xlane.xlu1 %3831 }
0x1664   :  { %7551 = vrcp.f32 %v3832_v32 }
0x1665   :  { %7553 = vrcp.f32 %v3841_v35 }
0x1667   :  { %v3838_v46 = vpop.xlane.xlu1 %3837 }
0x1668   :  { %7555 = vrcp.f32 %v3838_v46 }
0x1669   :  { %7557 = vrcp.f32 %v3847_v37 }
0x166b   :  { %v7369_v53 = vpop.permute.xlu1 %7368 }
0x166c   :  { %v7371_v45 = vunpack.i.h.bf16 %v7369_v53  ;;  %v7370_v19 = vunpack.i.l.bf16 %v7369_v53 }
0x166e   :  { %v7552_v39 = vpop.eup %7551  ;;  %v7031_v34 = vpack.c.bf16 %v7371_v45, %v7370_v19 }
0x166f   :  { %v3862_v36 = vmul.f32 %v7552_v39, %v7542_v9  ;;  %v7554_v57 = vpop.eup %7553 }
0x1670   :  { %7032 = vmatprep.subr.bf16.mxu0 %v7031_v34  ;;  %v3865_v4 = vmul.f32 %v7554_v57, %v9096_v50 }
0x1671   :  { %6616 = vmatprep.mubr.msk.f32.mxu1 %vm1348_vm5, %v3862_v36  ;;  %7034 = vmatpush3.bf16.msra.mxu0 %v7031_v34  ;;  %v5987_v34 = vld [vmem:[#allocation10 + $0x1] ss:$0 sm:$0xff] }
0x1672   :  { %v7556_v51 = vpop.eup %7555  ;;  %6617 = vmatmul.mubr.msk.f32.vlgmr.msra.gmra.mrb[36].mxu1 %vm1348_vm5, %v3863_v31 }
0x1673   :  { %7030 = vmatpush3.bf16.msra.mxu1 %v7027_v40  ;;  %v3864_v63 = vmul.f32 %v7556_v51, %v7544_v44  ;;  %v7558_v2 = vpop.eup %7557 }
0x1674   :  { %v3867_v50 = vmul.f32 %v7558_v2, %v9103_v3  ;;  %v5960_v3 = vld [vmem:[%s9400_s17 + $0x28] sm:$0xff] }
0x1675   :  { %6623 = vmatprep.mubr.msk.f32.mxu1 %vm1348_vm5, %v3864_v63 }
0x1676   :  { %6624 = vmatmul.mubr.msk.f32.vlgmr.msra.gmra.mrb[38].mxu1 %vm1348_vm5, %v3865_v4 }
0x169c   :  { %v3844_v1 = vpop.xlane.xlu1 %3843 }
0x169d   :  { %7559 = vrcp.f32 %v3844_v1 }
0x169e   :  { %7561 = vrcp.f32 %v3853_v12 }
0x16a0   :  { %v3850_v58 = vpop.xlane.xlu1 %3849 }
0x16a1   :  { %7563 = vrcp.f32 %v3850_v58 }
0x16a4   :  { %v7374_v61 = vpop.permute.xlu1 %7373 }
0x16a5   :  { %v7376_v24 = vunpack.i.h.bf16 %v7374_v61  ;;  %v7375_v9 = vunpack.i.l.bf16 %v7374_v61 }
0x16a7   :  { %v7560_v26 = vpop.eup %7559  ;;  %v7035_v44 = vpack.c.bf16 %v7376_v24, %v7375_v9 }
0x16a8   :  { %v3866_v15 = vmul.f32 %v7560_v26, %v7546_v28  ;;  %v7562_v7 = vpop.eup %7561  ;;  %v7039_v28 = vpack.c.bf16 %v5960_v3, %v5959_v25 }
0x16a9   :  { %7036 = vmatprep.subr.bf16.mxu1 %v7035_v44  ;;  %v3869_v47 = vmul.f32 %v7562_v7, %v9107_v59 }
0x16aa   :  { %6630 = vmatprep.mubr.msk.f32.mxu0 %vm1348_vm5, %v3866_v15  ;;  %7038 = vmatpush3.bf16.msra.mxu1 %v7035_v44 }
0x16ab   :  { %v7564_v17 = vpop.eup %7563  ;;  %6631 = vmatmul.mubr.msk.f32.vlgmr.msra.gmra.mrb[28].mxu0 %vm1348_vm5, %v3867_v50  ;;  %7040 = vmatprep.subr.bf16.mxu0 %v7039_v28 }
0x16ac   :  { %v3868_v23 = vmul.f32 %v7564_v17, %v9118_v6  ;;  %7042 = vmatpush3.bf16.msra.mxu0 %v7039_v28  ;;  %v5961_v6 = vld [vmem:[%s9400_s17 + $0x30] sm:$0xff] }
0x16ad   :  { %v7043_v59 = vpack.c.bf16 %v5962_v48, %v5961_v6  ;;  %v5994_v6 = vld [vmem:[%s9401_s9 + $0x30] sm:$0xff]  ;;  %v5995_v48 = vld [vmem:[%s9401_s9 + $0x38] sm:$0xff] }
0x16ae   :  { %6637 = vmatprep.mubr.msk.f32.mxu1 %vm1348_vm5, %v3868_v23 }
0x16af   :  { %6638 = vmatmul.mubr.msk.f32.vlgmr.msra.gmra.mrb[40].mxu1 %vm1348_vm5, %v3869_v47  ;;  %7044 = vmatprep.subr.bf16.mxu0 %v7043_v59 }
0x16b0   :  { %7046 = vmatpush3.bf16.msra.mxu0 %v7043_v59  ;;  %v7051_v59 = vpack.c.bf16 %v5995_v48, %v5994_v6 }
0x1745   :  { %v6618_v8 = vpop.f32.mrb[36].mxu1 }
0x1746   :  { %v3950_v54 = vpop.f32.mrb[37].mxu1 }
0x1749   :  { %v6625_v30 = vpop.f32.mrb[38].mxu1 }
0x174a   :  { %4224 = vrot.lane.b32.xlu1 %v6625_v30, %s8179_s22  ;;  %v4037_v13 = vpop.f32.mrb[39].mxu1  ;;  %v5993_v30 = vld [vmem:[%s9401_s9 + $0x28] sm:$0xff] }
0x174b   :  { %4222 = vrot.lane.b32.xlu0 %v4037_v13, %s8179_s22 }
0x177e   :  { %v6632_v43 = vpop.f32.mrb[28].mxu0 }
0x177f   :  { %v4124_v29 = vpop.f32.mrb[29].mxu0  ;;  %4232 = vrot.lane.b32.xlu1 %v6632_v43, %s8182_s29 }
0x1780   :  { %4230 = vrot.lane.b32.xlu0 %v4124_v29, %s8182_s29 }
0x1782   :  { %v6639_v35 = vpop.f32.mrb[40].mxu1 }
0x1783   :  { %4240 = vrot.lane.b32.xlu1 %v6639_v35, %s8214_s6  ;;  %v4211_v37 = vpop.f32.mrb[41].mxu1 }
0x1784   :  { %4238 = vrot.lane.b32.xlu0 %v4211_v37, %s8214_s6 }
0x17bc   :  { %v4225_v12 = vpop.permute.xlu1 %4224 }
0x17bd   :  { %v4223_v11 = vpop.permute.xlu0 %4222  ;;  %v4245_v46 = vsel %vm983_vm1, %v6618_v8, %v4225_v12 }
0x17be   :  { %v4244_v40 = vsel %vm983_vm1, %v3950_v54, %v4223_v11  ;;  %v5992_v54 = vld [vmem:[%s9401_s9 + $0x20] sm:$0xff] }
0x17bf   :  { %v7047_v13 = vpack.c.bf16 %v5993_v30, %v5992_v54 }
0x17c1   :  { %7048 = vmatprep.subr.bf16.mxu1 %v7047_v13 }
0x17c2   :  { %7050 = vmatpush3.bf16.msra.mxu1 %v7047_v13 }
0x17c3   :  { %7052 = vmatprep.subr.bf16.mxu1 %v7051_v59 }
0x17c6   :  { %7054 = vmatpush3.bf16.msra.mxu1 %v7051_v59 }
0x17f1   :  { %v4233_v10 = vpop.permute.xlu1 %4232 }
0x17f2   :  { %v4231_v20 = vpop.permute.xlu0 %4230  ;;  %v4247_v19 = vsel %vm1348_vm5, %v4245_v46, %v4233_v10 }
0x17f3   :  { %v4246_v53 = vsel %vm1348_vm5, %v4244_v40, %v4231_v20 }
0x17f5   :  { %v4241_v32 = vpop.permute.xlu1 %4240 }
0x17f6   :  { %v4239_v45 = vpop.permute.xlu0 %4238  ;;  %v4249_v39 = vsel %vm1815_vm12, %v4247_v19, %v4241_v32 }
0x17f7   :  { %v4248_v55 = vsel %vm1815_vm12, %v4246_v53, %v4239_v45 }
0x17f8   :  { %6648 = vmatprep.mubr.msk.f32.mxu0 %vm442_vm0, %v4248_v55  ;;  %v5990_v55 = vld [vmem:[#allocation25 + $0x1] ss:$0 sm:$0xff] }
0x17f9   :  { %6649 = vmatmul.mubr.msk.f32.vlgmr.msra.gmra.mrb[30].mxu0 %vm442_vm0, %v4249_v39 }
0x18cc   :  { %v6650_v36 = vpop.f32.mrb[30].mxu0 }
0x18cd   :  { %v4334_v31 = vadd.f32 %v6650_v36, %v5987_v34  ;;  %v4328_v57 = vpop.f32.mrb[31].mxu0 }
0x18ce   :  { %v4329_v51 = vadd.f32 %v5987_v34, %v4328_v57  ;;  %v5991_v34 = vld [vmem:[#allocation26 + $0x1] ss:$0 sm:$0xff] }
0x18cf   :  { %v4338_v63 = vadd.f32 %v4334_v31, %v9004_v16 }
0x18d0   :  { %v4337_v4 = vadd.f32 %v4329_v51, %v9006_v33 }
0x18d1   :  { %v4346_v1 = vsel %vm442_vm0, %v4338_v63, 0.0 }
0x18d2   :  { %4347 = vadd.xlane.f32.xlu1 %v4346_v1  ;;  %v4343_v58 = vsel %vm442_vm0, %v4337_v4, 0.0 }
0x18d3   :  { %4344 = vadd.xlane.f32.xlu0 %v4343_v58 }
0x18e3   :  { %7378 = vrot.lane.b32.xlu1 %v8626_v49, %s8203_s4 }
0x18e7   :  { %7388 = vrot.lane.b32.xlu1 %v8630_v56, %s8203_s4 }
0x18eb   :  { %7393 = vrot.lane.b32.xlu1 %v8630_v56, %s8205_s30 }
0x18ef   :  { %7403 = vrot.lane.b32.xlu1 %v8626_v49, %s8204_s19 }
0x195f   :  { %v4348_v16 = vpop.xlane.xlu1 %4347 }
0x1960   :  { %v4350_v33 = vmul.f32 0.03125, %v4348_v16  ;;  %v4345_v61 = vpop.xlane.xlu0 %4344 }
0x1961   :  { %v4349_v24 = vmul.f32 0.03125, %v4345_v61 }
0x1962   :  { %v4352_v9 = vsub.f32 %v4338_v63, %v4350_v33 }
0x1963   :  { %v4351_v2 = vsub.f32 %v4337_v4, %v4349_v24  ;;  %v7379_v26 = vpop.permute.xlu1 %7378 }
0x1964   :  { %v7381_v44 = vunpack.i.h.bf16 %v7379_v26  ;;  %v7380_v15 = vunpack.i.l.bf16 %v7379_v26  ;;  %v4354_v47 = vmul.f32 %v4352_v9, %v4352_v9 }
0x1965   :  { %v4353_v50 = vmul.f32 %v4351_v2, %v4351_v2 }
0x1966   :  { %v7055_v7 = vpack.c.bf16 %v7381_v44, %v7380_v15  ;;  %v4358_v8 = vsel %vm442_vm0, %v4354_v47, 0.0 }
0x1967   :  { %v7389_v17 = vpop.permute.xlu1 %7388  ;;  %v4355_v23 = vsel %vm442_vm0, %v4353_v50, 0.0 }
0x1968   :  { %v7391_v25 = vunpack.i.h.bf16 %v7389_v17  ;;  %v7390_v3 = vunpack.i.l.bf16 %v7389_v17  ;;  %7057 = vmatprep.subr.msk.bf16.mxu0 %vm8670_vm2, %v7055_v7  ;;  %4356 = vadd.xlane.f32.xlu0 %v4355_v23 }
0x1969   :  { %7060 = vmatpush3.bf16.xpose.msk.msra.mxu0 %vm8670_vm2, %v7055_v7 }
0x196a   :  { %v7061_v28 = vpack.c.bf16 %v7391_v25, %v7390_v3 }
0x196b   :  { %v7394_v63 = vpop.permute.xlu1 %7393 }
0x196c   :  { %7063 = vmatprep.subr.msk.bf16.mxu0 %vm8670_vm2, %v7061_v28  ;;  %4359 = vadd.xlane.f32.xlu0 %v4358_v8  ;;  %v7396_v58 = vunpack.i.h.bf16 %v7394_v63  ;;  %v7395_v16 = vunpack.i.l.bf16 %v7394_v63 }
0x196e   :  { %v7073_v24 = vpack.c.bf16 %v7396_v58, %v7395_v16 }
0x1971   :  { %7066 = vmatpush3.bf16.xpose.msk.msra.mxu0 %vm8670_vm2, %v7061_v28 }
0x1982   :  { %7383 = vrot.lane.b32.xlu0 %v8626_v49, %s8205_s30 }
0x1986   :  { %7398 = vrot.lane.b32.xlu0 %v8626_v49, %s8202_s15 }
0x19f5   :  { %v4357_v43 = vpop.xlane.xlu0 %4356 }
0x19f6   :  { %v4361_v29 = vmul.f32 0.03125, %v4357_v43 }
0x19f8   :  { %v4363_v35 = vadd.f32 1e-05, %v4361_v29 }
0x19f9   :  { %v4360_v37 = vpop.xlane.xlu0 %4359 }
0x19fa   :  { %7565 = vrsqrt.f32 %v4363_v35  ;;  %v4362_v12 = vmul.f32 0.03125, %v4360_v37 }
0x19fc   :  { %v4364_v11 = vadd.f32 1e-05, %v4362_v12 }
0x19fd   :  { %v7384_v10 = vpop.permute.xlu0 %7383 }
0x19fe   :  { %7567 = vrsqrt.f32 %v4364_v11  ;;  %v7386_v20 = vunpack.i.h.bf16 %v7384_v10  ;;  %v7385_v40 = vunpack.i.l.bf16 %v7384_v10 }
0x1a00   :  { %v7067_v32 = vpack.c.bf16 %v7386_v20, %v7385_v40 }
0x1a01   :  { %v7399_v46 = vpop.permute.xlu0 %7398 }
0x1a02   :  { %v7401_v53 = vunpack.i.h.bf16 %v7399_v46  ;;  %v7400_v45 = vunpack.i.l.bf16 %v7399_v46  ;;  %7069 = vmatprep.subr.msk.bf16.mxu1 %vm8670_vm2, %v7067_v32 }
0x1a04   :  { %v7566_v19 = vpop.eup %7565  ;;  %v7079_v49 = vpack.c.bf16 %v7401_v53, %v7400_v45 }
0x1a05   :  { %v4367_v39 = vmul.f32 %v7566_v19, %v4351_v2 }
0x1a06   :  { %7081 = vmatprep.subr.msk.bf16.mxu0 %vm8670_vm2, %v7079_v49 }
0x1a07   :  { %v4375_v36 = vmul.f32 %v5990_v55, %v4367_v39 }
0x1a08   :  { %v7568_v31 = vpop.eup %7567 }
0x1a09   :  { %v4368_v57 = vmul.f32 %v7568_v31, %v4352_v9  ;;  %v9188_v51 = vadd.f32 %v5991_v34, %v4375_v36  ;;  %v7404_v9 = vpop.permute.xlu1 %7403 }
0x1a0a   :  { %v7405_v2 = vunpack.i.l.bf16 %v7404_v9 }
0x1a0b   :  { %v4376_v4 = vmul.f32 %v5990_v55, %v4368_v57  ;;  %v4385_v1 = vadd.f32 %v9009_v42, %v9188_v51  ;;  %v7406_v42 = vunpack.i.h.bf16 %v7404_v9 }
0x1a0d   :  { %v9192_v33 = vadd.f32 %v5991_v34, %v4376_v4  ;;  %6659 = vmatprep.mubr.msk.f32.mxu1 %vm442_vm0, %v4385_v1  ;;  %v7091_v26 = vpack.c.bf16 %v7406_v42, %v7405_v2 }
0x1a0f   :  { %v4386_v61 = vadd.f32 %v9014_v21, %v9192_v33  ;;  %v5996_v21 = vld [vmem:[#allocation11 + $0x1] ss:$0 sm:$0xff] }
0x1a11   :  { %6660 = vmatmul.mubr.msk.f32.vlgmr.msra.gmra.mrb[42].mxu1 %vm442_vm0, %v4386_v61 }
0x1a12   :  { %7072 = vmatpush3.bf16.xpose.msk.msra.mxu1 %vm8670_vm2, %v7067_v32 }
0x1a13   :  { %7075 = vmatprep.subr.msk.bf16.mxu1 %vm8670_vm2, %v7073_v24 }
0x1a1a   :  { %7078 = vmatpush3.bf16.xpose.msk.msra.mxu1 %vm8670_vm2, %v7073_v24 }
0x1a1b   :  { %7093 = vmatprep.subr.msk.bf16.mxu1 %vm8670_vm2, %v7091_v26 }
0x1ae4   :  { %v6661_v44 = vpop.f32.mrb[42].mxu1 }
0x1ae5   :  { %v4478_v15 = vadd.f32 %v6661_v44, %v5996_v21  ;;  %v4472_v50 = vpop.f32.mrb[43].mxu1 }
0x1ae6   :  { %v4473_v7 = vadd.f32 %v5996_v21, %v4472_v50 }
0x1ae7   :  { %4587 = vrot.lane.b32.xlu1 %v4478_v15, %s8206_s16 }
0x1ae8   :  { %4585 = vrot.lane.b32.xlu0 %v4473_v7, %s8206_s16  ;;  %6670 = vmatprep.mubr.msk.f32.mxu0 %vm983_vm1, %v4473_v7 }
0x1ae9   :  { %6671 = vmatmul.mubr.msk.f32.vlgmr.msra.gmra.mrb[32].mxu0 %vm983_vm1, %v4478_v15 }
0x1aea   :  { %7084 = vmatpush3.bf16.xpose.msk.msra.mxu0 %vm8670_vm2, %v7079_v49 }
0x1aeb   :  { %7413 = vrot.lane.b32.xlu1 %v8630_v56, %s8204_s19 }
0x1aec   :  { %7408 = vrot.lane.b32.xlu0 %v8630_v56, %s8202_s15 }
0x1aef   :  { %4686 = vrot.lane.b32.xlu1 %v4478_v15, %s8207_s25 }
0x1af0   :  { %4684 = vrot.lane.b32.xlu0 %v4473_v7, %s8207_s25 }
0x1af3   :  { %4785 = vrot.lane.b32.xlu1 %v4478_v15, %s8208_s23 }
0x1af4   :  { %4783 = vrot.lane.b32.xlu0 %v4473_v7, %s8208_s23 }
0x1b59   :  { %v4588_v17 = vpop.permute.xlu1 %4587 }
0x1b5a   :  { %v4586_v23 = vpop.permute.xlu0 %4585 }
0x1b5b   :  { %6681 = vmatprep.mubr.msk.f32.mxu1 %vm983_vm1, %v4586_v23 }
0x1b5c   :  { %6682 = vmatmul.mubr.msk.f32.vlgmr.msra.gmra.mrb[44].mxu1 %vm983_vm1, %v4588_v17 }
0x1b5d   :  { %7096 = vmatpush3.bf16.xpose.msk.msra.mxu1 %vm8670_vm2, %v7091_v26  ;;  %v7414_v47 = vpop.permute.xlu1 %7413 }
0x1b5e   :  { %v7416_v25 = vunpack.i.h.bf16 %v7414_v47  ;;  %v7415_v56 = vunpack.i.l.bf16 %v7414_v47  ;;  %v7409_v3 = vpop.permute.xlu0 %7408 }
0x1b5f   :  { %v7411_v28 = vunpack.i.h.bf16 %v7409_v3  ;;  %v7410_v8 = vunpack.i.l.bf16 %v7409_v3 }
0x1b60   :  { %v7097_v54 = vpack.c.bf16 %v7416_v25, %v7415_v56 }
0x1b61   :  { %v7085_v30 = vpack.c.bf16 %v7411_v28, %v7410_v8  ;;  %v4687_v6 = vpop.permute.xlu1 %4686 }
0x1b62   :  { %v4685_v13 = vpop.permute.xlu0 %4684  ;;  %7099 = vmatprep.subr.msk.bf16.mxu1 %vm8670_vm2, %v7097_v54 }
0x1b63   :  { %7087 = vmatprep.subr.msk.bf16.mxu0 %vm8670_vm2, %v7085_v30  ;;  %6692 = vmatprep.mubr.msk.f32.mxu0 %vm983_vm1, %v4685_v13 }
0x1b64   :  { %7090 = vmatpush3.bf16.xpose.msk.msra.mxu0 %vm8670_vm2, %v7085_v30 }
0x1b65   :  { %7102 = vmatpush3.bf16.xpose.msk.msra.mxu1 %vm8670_vm2, %v7097_v54  ;;  %v4786_v59 = vpop.permute.xlu1 %4785 }
0x1b66   :  { %v4784_v48 = vpop.permute.xlu0 %4783 }
0x1b67   :  { %6703 = vmatprep.mubr.msk.f32.mxu1 %vm983_vm1, %v4784_v48 }
0x1b6b   :  { %6693 = vmatmul.mubr.msk.f32.vlgmr.msra.gmra.mrb[34].mxu0 %vm983_vm1, %v4687_v6 }
0x1b6c   :  { %6704 = vmatmul.mubr.msk.f32.vlgmr.msra.gmra.mrb[46].mxu1 %vm983_vm1, %v4786_v59 }
0x1bbc   :  { %v6672_v43 = vpop.f32.mrb[32].mxu0 }
0x1bbd   :  { %v4883_v29 = vadd.f32 %v6672_v43, %v8698_v52  ;;  %v4576_v35 = vpop.f32.mrb[33].mxu0 }
0x1bbe   :  { %v4882_v37 = vadd.f32 %v4576_v35, %v8704_v0 }
0x1bbf   :  { %v4893_v12 = vsel %vm442_vm0, %v4883_v29, -inf }
0x1bc0   :  { %4894 = vmax.xlane.f32.xlu1 %v4893_v12  ;;  %v4890_v18 = vsel %vm442_vm0, %v4882_v37, -inf }
0x1bc1   :  { %4891 = vmax.xlane.f32.xlu0 %v4890_v18 }
0x1c2f   :  { %v6683_v11 = vpop.f32.mrb[44].mxu1 }
0x1c30   :  { %v4885_v10 = vadd.f32 %v6683_v11, %v8701_v60  ;;  %v4675_v20 = vpop.f32.mrb[45].mxu1 }
0x1c31   :  { %v4884_v40 = vadd.f32 %v4675_v20, %v8711_v14 }
0x1c32   :  { %v4899_v32 = vsel %vm442_vm0, %v4885_v10, -inf }
0x1c33   :  { %4900 = vmax.xlane.f32.xlu0 %v4899_v32  ;;  %v4896_v52 = vsel %vm442_vm0, %v4884_v40, -inf }
0x1c37   :  { %4897 = vmax.xlane.f32.xlu0 %v4896_v52 }
0x1c3e   :  { %v6694_v46 = vpop.f32.mrb[34].mxu0 }
0x1c3f   :  { %v4887_v0 = vadd.f32 %v6694_v46, %v8718_v22  ;;  %v6705_v53 = vpop.f32.mrb[46].mxu1  ;;  %v4774_v45 = vpop.f32.mrb[35].mxu0 }
0x1c40   :  { %v4886_v19 = vadd.f32 %v4774_v45, %v8732_v38  ;;  %v4873_v49 = vpop.f32.mrb[47].mxu1  ;;  %v4889_v55 = vadd.f32 %v6705_v53, %v8723_v27 }
0x1c41   :  { %v4905_v60 = vsel %vm442_vm0, %v4887_v0, -inf  ;;  %v4888_v14 = vadd.f32 %v4873_v49, %v8735_v41 }
0x1c42   :  { %4906 = vmax.xlane.f32.xlu0 %v4905_v60  ;;  %v4902_v39 = vsel %vm442_vm0, %v4886_v19, -inf  ;;  %v4911_v34 = vsel %vm442_vm0, %v4889_v55, -inf }
0x1c43   :  { %4903 = vmax.xlane.f32.xlu1 %v4902_v39  ;;  %v4908_v22 = vsel %vm442_vm0, %v4888_v14, -inf }
0x1c46   :  { %4912 = vmax.xlane.f32.xlu0 %v4911_v34 }
0x1c47   :  { %4909 = vmax.xlane.f32.xlu1 %v4908_v22 }
0x1c4d   :  { %v4895_v27 = vpop.xlane.xlu1 %4894 }
0x1c4e   :  { %v4915_v38 = vsub.f32 %v4883_v29, %v4895_v27  ;;  %v4892_v36 = vpop.xlane.xlu0 %4891 }
0x1c4f   :  { %v4914_v31 = vsub.f32 %v4882_v37, %v4892_v36 }
0x1c50   :  { %v4924_v41 = vmul.f32 1.442695, %v4915_v38 }
0x1c51   :  { %v4922_v57 = vmul.f32 1.442695, %v4914_v31 }
0x1c52   :  { %7569 = vpow2.f32 %v4924_v41 }
0x1c53   :  { %7571 = vpow2.f32 %v4922_v57 }
0x1c58   :  { %7418 = vrot.lane.b32.xlu1 %v8634_v62, %s8203_s4 }
0x1c5c   :  { %7423 = vrot.lane.b32.xlu0 %v8634_v62, %s8205_s30  ;;  %7428 = vrot.lane.b32.xlu1 %v8638_v5, %s8203_s4  ;;  %v9264_v63 = vpop.eup %7569 }
0x1c5d   :  { %v4941_v4 = vsel %vm442_vm0, %v9264_v63, 0.0  ;;  %v9268_v1 = vpop.eup %7571 }
0x1c5e   :  { %v4938_v58 = vsel %vm442_vm0, %v9268_v1, 0.0 }
0x1c60   :  { %7438 = vrot.lane.b32.xlu0 %v8634_v62, %s8202_s15  ;;  %7433 = vrot.lane.b32.xlu1 %v8638_v5, %s8205_s30 }
0x1c64   :  { %7443 = vrot.lane.b32.xlu1 %v8634_v62, %s8204_s19 }
0x1c7f   :  { %4942 = vadd.xlane.f32.xlu0 %v4941_v4 }
0x1c88   :  { %4939 = vadd.xlane.f32.xlu1 %v4938_v58 }
0x1cc0   :  { %v4901_v62 = vpop.xlane.xlu0 %4900 }
0x1cc1   :  { %v4917_v16 = vsub.f32 %v4885_v10, %v4901_v62 }
0x1cc3   :  { %v4928_v61 = vmul.f32 1.442695, %v4917_v16 }
0x1cc4   :  { %v4898_v24 = vpop.xlane.xlu0 %4897 }
0x1cc5   :  { %7573 = vpow2.f32 %v4928_v61  ;;  %v4916_v9 = vsub.f32 %v4884_v40, %v4898_v24 }
0x1cc7   :  { %v4926_v42 = vmul.f32 1.442695, %v4916_v9 }
0x1cc9   :  { %7575 = vpow2.f32 %v4926_v42 }
0x1ccf   :  { %v9272_v2 = vpop.eup %7573  ;;  %v4907_v26 = vpop.xlane.xlu0 %4906 }
0x1cd0   :  { %v4919_v21 = vsub.f32 %v4887_v0, %v4907_v26  ;;  %v4904_v44 = vpop.xlane.xlu1 %4903  ;;  %v4947_v15 = vsel %vm442_vm0, %v9272_v2, 0.0 }
0x1cd1   :  { %v4918_v50 = vsub.f32 %v4886_v19, %v4904_v44  ;;  %4948 = vadd.xlane.f32.xlu0 %v4947_v15 }
0x1cd2   :  { %v4932_v7 = vmul.f32 1.442695, %v4919_v21 }
0x1cd3   :  { %v9276_v17 = vpop.eup %7575  ;;  %v4930_v23 = vmul.f32 1.442695, %v4918_v50  ;;  %v4913_v47 = vpop.xlane.xlu0 %4912 }
0x1cd4   :  { %7577 = vpow2.f32 %v4932_v7  ;;  %v4921_v25 = vsub.f32 %v4889_v55, %v4913_v47  ;;  %v4910_v56 = vpop.xlane.xlu1 %4909  ;;  %v4944_v3 = vsel %vm442_vm0, %v9276_v17, 0.0 }
0x1cd5   :  { %7579 = vpow2.f32 %v4930_v23  ;;  %v4920_v28 = vsub.f32 %v4888_v14, %v4910_v56  ;;  %4945 = vadd.xlane.f32.xlu1 %v4944_v3 }
0x1cd6   :  { %v4936_v8 = vmul.f32 1.442695, %v4921_v25 }
0x1cd7   :  { %v4934_v54 = vmul.f32 1.442695, %v4920_v28  ;;  %v7424_v30 = vpop.permute.xlu0 %7423 }
0x1cd8   :  { %7581 = vpow2.f32 %v4936_v8  ;;  %v7426_v13 = vunpack.i.h.bf16 %v7424_v30  ;;  %v7425_v6 = vunpack.i.l.bf16 %v7424_v30  ;;  %v7419_v48 = vpop.permute.xlu1 %7418 }
0x1cd9   :  { %7583 = vpow2.f32 %v4934_v54  ;;  %v7421_v59 = vunpack.i.h.bf16 %v7419_v48  ;;  %v7420_v43 = vunpack.i.l.bf16 %v7419_v48 }
0x1cda   :  { %v7111_v29 = vpack.c.bf16 %v7426_v13, %v7425_v6 }
0x1cdb   :  { %v7103_v35 = vpack.c.bf16 %v7421_v59, %v7420_v43  ;;  %v7439_v37 = vpop.permute.xlu0 %7438  ;;  %v4482_v59 = vld [vmem:[#allocation17 + $0x20] sm:$0xff]  ;;  %v4483_v43 = vld [vmem:[#allocation17 + $0x28] sm:$0xff] }
0x1cdc   :  { %7112 = vmatprep.subr.bf16.mxu1 %v7111_v29  ;;  %v7429_v12 = vpop.permute.xlu1 %7428  ;;  %v7441_v18 = vunpack.i.h.bf16 %v7439_v37  ;;  %v7440_v11 = vunpack.i.l.bf16 %v7439_v37 }
0x1cdd   :  { %v7431_v10 = vunpack.i.h.bf16 %v7429_v12  ;;  %v7430_v20 = vunpack.i.l.bf16 %v7429_v12  ;;  %7104 = vmatprep.subr.bf16.mxu0 %v7103_v35  ;;  %7114 = vmatpush3.bf16.msra.mxu1 %v7111_v29  ;;  %v7135_v29 = vpack.c.bf16 %v4483_v43, %v4482_v59  ;;  %v4484_v12 = vld [vmem:[#allocation17 + $0x30] sm:$0xff]  ;;  %v6034_v43 = vld [vmem:[#allocation28 + $0x1] ss:$0 sm:$0xff] }
0x1cde   :  { %v9280_v40 = vpop.eup %7577  ;;  %7106 = vmatpush3.bf16.msra.mxu0 %v7103_v35  ;;  %v7119_v45 = vpack.c.bf16 %v7441_v18, %v7440_v11  ;;  %v4485_v18 = vld [vmem:[#allocation17 + $0x38] sm:$0xff] }
0x1cdf   :  { %v9282_v32 = vpop.eup %7579  ;;  %v7107_v52 = vpack.c.bf16 %v7431_v10, %v7430_v20  ;;  %v4953_v46 = vsel %vm442_vm0, %v9280_v40, 0.0  ;;  %v7139_v11 = vpack.c.bf16 %v4485_v18, %v4484_v12 }
0x1ce0   :  { %4954 = vadd.xlane.f32.xlu0 %v4953_v46  ;;  %v7434_v0 = vpop.permute.xlu1 %7433  ;;  %v4950_v53 = vsel %vm442_vm0, %v9282_v32, 0.0 }
0x1ce1   :  { %v7436_v19 = vunpack.i.h.bf16 %v7434_v0  ;;  %v7435_v49 = vunpack.i.l.bf16 %v7434_v0  ;;  %4951 = vadd.xlane.f32.xlu1 %v4950_v53  ;;  %7108 = vmatprep.subr.bf16.mxu0 %v7107_v52 }
0x1ce2   :  { %v9288_v55 = vpop.eup %7581  ;;  %7110 = vmatpush3.bf16.msra.mxu0 %v7107_v52 }
0x1ce3   :  { %v9290_v60 = vpop.eup %7583  ;;  %v7115_v14 = vpack.c.bf16 %v7436_v19, %v7435_v49  ;;  %7120 = vmatprep.subr.bf16.mxu0 %v7119_v45  ;;  %v4959_v39 = vsel %vm442_vm0, %v9288_v55, 0.0 }
0x1ce4   :  { %4960 = vadd.xlane.f32.xlu0 %v4959_v39  ;;  %v7444_v34 = vpop.permute.xlu1 %7443  ;;  %v4956_v22 = vsel %vm442_vm0, %v9290_v60, 0.0 }
0x1ce5   :  { %v7446_v27 = vunpack.i.h.bf16 %v7444_v34  ;;  %v7445_v38 = vunpack.i.l.bf16 %v7444_v34  ;;  %4957 = vadd.xlane.f32.xlu1 %v4956_v22  ;;  %7116 = vmatprep.subr.bf16.mxu1 %v7115_v14  ;;  %v6031_v22 = vld [vmem:[#allocation19 + $0x1] ss:$0 sm:$0xff] }
0x1ce6   :  { %7118 = vmatpush3.bf16.msra.mxu1 %v7115_v14 }
0x1ce7   :  { %v7127_v41 = vpack.c.bf16 %v7446_v27, %v7445_v38 }
0x1ce9   :  { %7128 = vmatprep.subr.bf16.mxu1 %v7127_v41 }
0x1cf6   :  { %7453 = vrot.lane.b32.xlu1 %v8638_v5, %s8204_s19 }
0x1cfa   :  { %7448 = vrot.lane.b32.xlu0 %v8638_v5, %s8202_s15 }
0x1d0c   :  { %v4943_v36 = vpop.xlane.xlu0 %4942 }
0x1d0d   :  { %7585 = vrcp.f32 %v4943_v36 }
0x1d15   :  { %v4940_v31 = vpop.xlane.xlu1 %4939 }
0x1d16   :  { %7587 = vrcp.f32 %v4940_v31 }
0x1d17   :  { %v7586_v57 = vpop.eup %7585 }
0x1d18   :  { %v4971_v62 = vmul.f32 %v7586_v57, %v9264_v63 }
0x1d20   :  { %v7588_v4 = vpop.eup %7587 }
0x1d21   :  { %v4970_v58 = vmul.f32 %v7588_v4, %v9268_v1 }
0x1d23   :  { %6714 = vmatprep.mubr.msk.f32.mxu0 %vm442_vm0, %v4970_v58 }
0x1d24   :  { %6715 = vmatmul.mubr.msk.f32.vlgmr.msra.gmra.mrb[36].mxu0 %vm442_vm0, %v4971_v62 }
0x1d25   :  { %7122 = vmatpush3.bf16.msra.mxu0 %v7119_v45 }
0x1d5e   :  { %v4949_v16 = vpop.xlane.xlu0 %4948 }
0x1d5f   :  { %7589 = vrcp.f32 %v4949_v16 }
0x1d62   :  { %v4946_v61 = vpop.xlane.xlu1 %4945 }
0x1d63   :  { %7591 = vrcp.f32 %v4946_v61 }
0x1d69   :  { %v7590_v5 = vpop.eup %7589 }
0x1d6a   :  { %v4973_v1 = vmul.f32 %v7590_v5, %v9272_v2 }
0x1d6d   :  { %v7592_v24 = vpop.eup %7591  ;;  %v4955_v9 = vpop.xlane.xlu0 %4954 }
0x1d6e   :  { %7593 = vrcp.f32 %v4955_v9  ;;  %v4952_v42 = vpop.xlane.xlu1 %4951  ;;  %v4972_v26 = vmul.f32 %v7592_v24, %v9276_v17 }
0x1d6f   :  { %7595 = vrcp.f32 %v4952_v42 }
0x1d70   :  { %6725 = vmatprep.mubr.msk.f32.mxu1 %vm442_vm0, %v4972_v26 }
0x1d71   :  { %v4961_v63 = vpop.xlane.xlu0 %4960  ;;  %6726 = vmatmul.mubr.msk.f32.vlgmr.msra.gmra.mrb[48].mxu1 %vm442_vm0, %v4973_v1  ;;  %v5516_v1 = vld [vmem:[#allocation20 + $0x20] sm:$0xff] }
0x1d72   :  { %7597 = vrcp.f32 %v4961_v63  ;;  %7130 = vmatpush3.bf16.msra.mxu1 %v7127_v41  ;;  %v4958_v21 = vpop.xlane.xlu1 %4957  ;;  %v5517_v63 = vld [vmem:[#allocation20 + $0x28] sm:$0xff] }
0x1d73   :  { %7599 = vrcp.f32 %v4958_v21  ;;  %v7143_v21 = vpack.c.bf16 %v5517_v63, %v5516_v1 }
0x1d75   :  { %v7449_v44 = vpop.permute.xlu0 %7448 }
0x1d76   :  { %v7451_v15 = vunpack.i.h.bf16 %v7449_v44  ;;  %v7450_v50 = vunpack.i.l.bf16 %v7449_v44  ;;  %v7454_v7 = vpop.permute.xlu1 %7453  ;;  %v5518_v44 = vld [vmem:[#allocation20 + $0x30] sm:$0xff] }
0x1d77   :  { %v7456_v23 = vunpack.i.h.bf16 %v7454_v7  ;;  %v7455_v47 = vunpack.i.l.bf16 %v7454_v7  ;;  %v6039_v7 = vld [vmem:[%s9402_s24 + $0x40] sm:$0xff] }
0x1d78   :  { %v7594_v25 = vpop.eup %7593  ;;  %v7123_v17 = vpack.c.bf16 %v7451_v15, %v7450_v50  ;;  %v5519_v15 = vld [vmem:[#allocation20 + $0x38] sm:$0xff] }
0x1d79   :  { %v7596_v56 = vpop.eup %7595  ;;  %v7131_v2 = vpack.c.bf16 %v7456_v23, %v7455_v47  ;;  %v4975_v8 = vmul.f32 %v7594_v25, %v9280_v40  ;;  %v7147_v50 = vpack.c.bf16 %v5519_v15, %v5518_v44  ;;  %v6040_v23 = vld [vmem:[%s9402_s24 + $0x48] sm:$0xff]  ;;  %v6041_v47 = vld [vmem:[%s9402_s24 + $0x50] sm:$0xff]  ;;  %v6050_v44 = vld [vmem:[#allocation31 + $0x1] ss:$0 sm:$0xff] }
0x1d7a   :  { %7124 = vmatprep.subr.bf16.mxu0 %v7123_v17  ;;  %v4974_v3 = vmul.f32 %v7596_v56, %v9282_v32  ;;  %v7151_v25 = vpack.c.bf16 %v6040_v23, %v6039_v7  ;;  %v6051_v7 = vld [vmem:[#allocation32 + $0x1] ss:$0 sm:$0xff] }
0x1d7b   :  { %7126 = vmatpush3.bf16.msra.mxu0 %v7123_v17  ;;  %7132 = vmatprep.subr.bf16.mxu1 %v7131_v2  ;;  %v6042_v17 = vld [vmem:[%s9402_s24 + $0x58] sm:$0xff] }
0x1d7c   :  { %v7598_v28 = vpop.eup %7597  ;;  %6736 = vmatprep.mubr.msk.f32.mxu0 %vm442_vm0, %v4974_v3  ;;  %7134 = vmatpush3.bf16.msra.mxu1 %v7131_v2  ;;  %v7155_v56 = vpack.c.bf16 %v6042_v17, %v6041_v47  ;;  %v6043_v2 = vld [vmem:[%s9402_s24 + $0x60] sm:$0xff]  ;;  %v6044_v3 = vld [vmem:[%s9402_s24 + $0x68] sm:$0xff] }
0x1d7d   :  { %v7600_v54 = vpop.eup %7599  ;;  %v4977_v13 = vmul.f32 %v7598_v28, %v9288_v55  ;;  %7136 = vmatprep.subr.bf16.mxu0 %v7135_v29  ;;  %7144 = vmatprep.subr.bf16.mxu1 %v7143_v21  ;;  %v7159_v28 = vpack.c.bf16 %v6044_v3, %v6043_v2 }
0x1d7e   :  { %6737 = vmatmul.mubr.msk.f32.vlgmr.msra.gmra.mrb[38].mxu0 %vm442_vm0, %v4975_v8  ;;  %v4976_v30 = vmul.f32 %v7600_v54, %v9290_v60 }
0x1d7f   :  { %7138 = vmatpush3.bf16.msra.mxu0 %v7135_v29 }
0x1d80   :  { %6747 = vmatprep.mubr.msk.f32.mxu1 %vm442_vm0, %v4976_v30  ;;  %7140 = vmatprep.subr.bf16.mxu0 %v7139_v11 }
0x1d81   :  { %6748 = vmatmul.mubr.msk.f32.vlgmr.msra.gmra.mrb[50].mxu1 %vm442_vm0, %v4977_v13 }
0x1d82   :  { %7146 = vmatpush3.bf16.msra.mxu1 %v7143_v21 }
0x1d83   :  { %7142 = vmatpush3.bf16.msra.mxu0 %v7139_v11  ;;  %7148 = vmatprep.subr.bf16.mxu1 %v7147_v50 }
0x1d84   :  { %7152 = vmatprep.subr.bf16.mxu0 %v7151_v25 }
0x1d86   :  { %7150 = vmatpush3.bf16.msra.mxu1 %v7147_v50 }
0x1df7   :  { %v6716_v6 = vpop.f32.mrb[36].mxu0 }
0x1df8   :  { %v5062_v48 = vpop.f32.mrb[37].mxu0 }
0x1e44   :  { %v6727_v35 = vpop.f32.mrb[48].mxu1 }
0x1e45   :  { %5354 = vrot.lane.b32.xlu1 %v6727_v35, %s8179_s22  ;;  %v5155_v37 = vpop.f32.mrb[49].mxu1  ;;  %v6035_v35 = vld [vmem:[#allocation29 + $0x1] ss:$0 sm:$0xff] }
0x1e46   :  { %5352 = vrot.lane.b32.xlu0 %v5155_v37, %s8179_s22 }
0x1e51   :  { %v6738_v10 = vpop.f32.mrb[38].mxu0 }
0x1e52   :  { %5362 = vrot.lane.b32.xlu1 %v6738_v10, %s8182_s29  ;;  %v5248_v20 = vpop.f32.mrb[39].mxu0 }
0x1e53   :  { %5360 = vrot.lane.b32.xlu0 %v5248_v20, %s8182_s29  ;;  %s8216_s29 = smov [#allocation37]  }
0x1e54   :  { %v6749_v40 = vpop.f32.mrb[50].mxu1  ;;  %s5808_s20 = sshll.u32 %s8216_s29, 4  ;;  %s5809_s20 = int_to_ptr.vmem [resolvable:$true] %s5808_s20 }
0x1e55   :  { %v5341_v32 = vpop.f32.mrb[51].mxu1  ;;  %s8099_s12 = scalar_lea.vmem %s5809_s20, 256  ;;  %p8104_p9 = scmp.lt.s32.totalorder %s5809_s20, %s5809_s20 }
0x1e56   :  { %5370 = vrot.lane.b32.xlu1 %v6749_v40, %s8214_s6  ;;  %v6045_v40 = vld [vmem:[%s9402_s24 + $0x70] sm:$0xff]  ;;  %p8100_p8 = scmp.ne.s32.totalorder %s5809_s20, %s8099_s12  ;;  %p8105_p10 = scmp.lt.s32.totalorder %s8099_s12, %s8099_s12 }
0x1e57   :  { %5368 = vrot.lane.b32.xlu0 %v5341_v32, %s8214_s6  ;;  %v6046_v32 = vld [vmem:[%s9402_s24 + $0x78] sm:$0xff] }
0x1e58   :  { %p8106_p11 = por %p8105_p10, %p8104_p9 }
0x1e5a   :  { %p8107_p12 = pnand %p8106_p11, %p8100_p8 }
0x1eb7   :  { %v5355_v52 = vpop.permute.xlu1 %5354 }
0x1eb8   :  { %v5353_v46 = vpop.permute.xlu0 %5352  ;;  %v5375_v49 = vsel %vm983_vm1, %v6716_v6, %v5355_v52  ;;  %v7163_v52 = vpack.c.bf16 %v6046_v32, %v6045_v40  ;;  %v6052_v40 = vld [vmem:[#allocation34] ss:$0 sm:$0xff] }
0x1eb9   :  { %v5374_v45 = vsel %vm983_vm1, %v5062_v48, %v5353_v46  ;;  %v6036_v46 = vld [vmem:[#allocation22 + $0x1] ss:$0 sm:$0xff] }
0x1ec4   :  { %v5363_v0 = vpop.permute.xlu1 %5362 }
0x1ec5   :  { %v5361_v53 = vpop.permute.xlu0 %5360  ;;  %v5377_v14 = vsel %vm1348_vm5, %v5375_v49, %v5363_v0 }
0x1ec6   :  { %v5376_v55 = vsel %vm1348_vm5, %v5374_v45, %v5361_v53 }
0x1ec8   :  { %v5371_v19 = vpop.permute.xlu1 %5370 }
0x1ec9   :  { %v5369_v60 = vpop.permute.xlu0 %5368  ;;  %v5379_v34 = vsel %vm1815_vm12, %v5377_v14, %v5371_v19 }
0x1eca   :  { %v5378_v39 = vsel %vm1815_vm12, %v5376_v55, %v5369_v60  ;;  %v6047_v60 = vld [vmem:[#allocation23 + $0x1] ss:$0 sm:$0xff] }
0x1ecb   :  { %6758 = vmatprep.mubr.msk.f32.mxu0 %vm442_vm0, %v5378_v39 }
0x1ecc   :  { %6759 = vmatmul.mubr.msk.f32.vlgmr.msra.gmra.mrb[40].mxu0 %vm442_vm0, %v5379_v34 }
0x1ecd   :  { %7154 = vmatpush3.bf16.msra.mxu0 %v7151_v25 }
0x1ece   :  { %7156 = vmatprep.subr.bf16.mxu0 %v7155_v56 }
0x1ed1   :  { %7158 = vmatpush3.bf16.msra.mxu0 %v7155_v56 }
0x1ed2   :  { %7160 = vmatprep.subr.bf16.mxu0 %v7159_v28 }
0x1ed5   :  { %7162 = vmatpush3.bf16.msra.mxu0 %v7159_v28 }
0x1ed6   :  { %7164 = vmatprep.subr.bf16.mxu0 %v7163_v52 }
0x1ed9   :  { %7166 = vmatpush3.bf16.msra.mxu0 %v7163_v52 }
0x1f9f   :  { %v6760_v27 = vpop.f32.mrb[40].mxu0 }
0x1fa0   :  { %v5464_v38 = vadd.f32 %v6760_v27, %v6031_v22  ;;  %v5458_v41 = vpop.f32.mrb[41].mxu0 }
0x1fa1   :  { %v5459_v36 = vadd.f32 %v6031_v22, %v5458_v41 }
0x1fa2   :  { %v5468_v31 = vadd.f32 %v5464_v38, %v9192_v33 }
0x1fa3   :  { %v5467_v57 = vadd.f32 %v5459_v36, %v9188_v51 }
0x1fa4   :  { %v5476_v4 = vsel %vm442_vm0, %v5468_v31, 0.0 }
0x1fa5   :  { %5477 = vadd.xlane.f32.xlu1 %v5476_v4  ;;  %v5473_v58 = vsel %vm442_vm0, %v5467_v57, 0.0 }
0x1fa6   :  { %5474 = vadd.xlane.f32.xlu0 %v5473_v58 }
0x2032   :  { %v5478_v62 = vpop.xlane.xlu1 %5477 }
0x2033   :  { %v5480_v16 = vmul.f32 0.03125, %v5478_v62  ;;  %v5475_v61 = vpop.xlane.xlu0 %5474 }
0x2034   :  { %v5479_v5 = vmul.f32 0.03125, %v5475_v61 }
0x2035   :  { %v5482_v24 = vsub.f32 %v5468_v31, %v5480_v16 }
0x2036   :  { %v5481_v9 = vsub.f32 %v5467_v57, %v5479_v5 }
0x2037   :  { %v5484_v33 = vmul.f32 %v5482_v24, %v5482_v24 }
0x2038   :  { %v5483_v42 = vmul.f32 %v5481_v9, %v5481_v9 }
0x2039   :  { %v5488_v51 = vsel %vm442_vm0, %v5484_v33, 0.0 }
0x203a   :  { %v5485_v26 = vsel %vm442_vm0, %v5483_v42, 0.0 }
0x203b   :  { %5486 = vadd.xlane.f32.xlu0 %v5485_v26 }
0x203f   :  { %5489 = vadd.xlane.f32.xlu0 %v5488_v51 }
0x20c8   :  { %v5487_v8 = vpop.xlane.xlu0 %5486 }
0x20c9   :  { %v5491_v54 = vmul.f32 0.03125, %v5487_v8 }
0x20cb   :  { %v5493_v30 = vadd.f32 1e-05, %v5491_v54 }
0x20cc   :  { %v5490_v13 = vpop.xlane.xlu0 %5489 }
0x20cd   :  { %7601 = vrsqrt.f32 %v5493_v30  ;;  %v5492_v6 = vmul.f32 0.03125, %v5490_v13 }
0x20cf   :  { %v5494_v48 = vadd.f32 1e-05, %v5492_v6 }
0x20d1   :  { %7603 = vrsqrt.f32 %v5494_v48 }
0x20d7   :  { %v7602_v59 = vpop.eup %7601 }
0x20d8   :  { %v5497_v29 = vmul.f32 %v7602_v59, %v5481_v9 }
0x20da   :  { %v5505_v37 = vmul.f32 %v6034_v43, %v5497_v29 }
0x20db   :  { %v7604_v12 = vpop.eup %7603 }
0x20dc   :  { %v5498_v18 = vmul.f32 %v7604_v12, %v5482_v24  ;;  %v5513_v11 = vadd.f32 %v6035_v35, %v5505_v37 }
0x20de   :  { %v5506_v10 = vmul.f32 %v6034_v43, %v5498_v18  ;;  %6769 = vmatprep.mubr.msk.f32.mxu1 %vm442_vm0, %v5513_v11 }
0x20e0   :  { %v5514_v20 = vadd.f32 %v6035_v35, %v5506_v10 }
0x20e2   :  { %6770 = vmatmul.mubr.msk.f32.vlgmr.msra.gmra.mrb[52].mxu1 %vm442_vm0, %v5514_v20 }
0x21b5   :  { %v6771_v0 = vpop.f32.mrb[52].mxu1 }
0x21b6   :  { %v5606_v53 = vadd.f32 %v6771_v0, %v6036_v46  ;;  %v5600_v45 = vpop.f32.mrb[53].mxu1  ;;  %v6053_v0 = vld [vmem:[#allocation35] ss:$0 sm:$0xff] }
0x21b7   :  { %v5601_v19 = vadd.f32 %v6036_v46, %v5600_v45 }
0x21b8   :  { %v5610_v55 = vmax.f32 %v5606_v53, 0.0 }
0x21b9   :  { %v5609_v49 = vmax.f32 %v5601_v19, 0.0 }
0x21bb   :  { %6788 = vmatprep.mubr.msk.f32.mxu0 %vm3173_vm13, %v5609_v49 }
0x21bc   :  { %6789 = vmatmul.mubr.msk.f32.vlgmr.msra.gmra.mrb[42].mxu0 %vm3173_vm13, %v5610_v55 }
0x228f   :  { %v6790_v14 = vpop.f32.mrb[42].mxu0 }
0x2290   :  { %v5706_v39 = vadd.f32 %v6790_v14, %v6047_v60  ;;  %v5700_v34 = vpop.f32.mrb[43].mxu0 }
0x2291   :  { %v5701_v22 = vadd.f32 %v6047_v60, %v5700_v34 }
0x2292   :  { %v5710_v27 = vadd.f32 %v5706_v39, %v5514_v20 }
0x2293   :  { %v5709_v38 = vadd.f32 %v5701_v22, %v5513_v11 }
0x2294   :  { %v5718_v41 = vsel %vm442_vm0, %v5710_v27, 0.0 }
0x2295   :  { %5719 = vadd.xlane.f32.xlu0 %v5718_v41  ;;  %v5715_v36 = vsel %vm442_vm0, %v5709_v38, 0.0 }
0x2296   :  { %5716 = vadd.xlane.f32.xlu1 %v5715_v36 }
0x2322   :  { %v5720_v31 = vpop.xlane.xlu0 %5719 }
0x2323   :  { %v5722_v57 = vmul.f32 0.03125, %v5720_v31  ;;  %v5717_v4 = vpop.xlane.xlu1 %5716 }
0x2324   :  { %v5721_v58 = vmul.f32 0.03125, %v5717_v4 }
0x2325   :  { %v5724_v62 = vsub.f32 %v5710_v27, %v5722_v57 }
0x2326   :  { %v5723_v16 = vsub.f32 %v5709_v38, %v5721_v58 }
0x2327   :  { %v5726_v61 = vmul.f32 %v5724_v62, %v5724_v62 }
0x2328   :  { %v5725_v5 = vmul.f32 %v5723_v16, %v5723_v16 }
0x2329   :  { %v5730_v24 = vsel %vm442_vm0, %v5726_v61, 0.0 }
0x232a   :  { %5731 = vadd.xlane.f32.xlu0 %v5730_v24  ;;  %v5727_v9 = vsel %vm442_vm0, %v5725_v5, 0.0 }
0x232b   :  { %5728 = vadd.xlane.f32.xlu1 %v5727_v9 }
0x23b7   :  { %v5732_v42 = vpop.xlane.xlu0 %5731 }
0x23b8   :  { %v5734_v26 = vmul.f32 0.03125, %v5732_v42  ;;  %v5729_v33 = vpop.xlane.xlu1 %5728 }
0x23b9   :  { %v5733_v51 = vmul.f32 0.03125, %v5729_v33 }
0x23ba   :  { %v5736_v1 = vadd.f32 1e-05, %v5734_v26 }
0x23bb   :  { %v5735_v63 = vadd.f32 1e-05, %v5733_v51 }
0x23bc   :  { %7605 = vrsqrt.f32 %v5736_v1 }
0x23bd   :  { %7607 = vrsqrt.f32 %v5735_v63 }
0x23c6   :  { %v7606_v21 = vpop.eup %7605 }
0x23c7   :  { %v7608_v15 = vpop.eup %7607  ;;  %v5740_v50 = vmul.f32 %v7606_v21, %v5724_v62 }
0x23c8   :  { %v5739_v23 = vmul.f32 %v7608_v15, %v5723_v16 }
0x23c9   :  { %v5748_v47 = vmul.f32 %v6050_v44, %v5740_v50 }
0x23ca   :  { %v5747_v25 = vmul.f32 %v6050_v44, %v5739_v23 }
0x23cb   :  { %v5756_v17 = vadd.f32 %v6051_v7, %v5748_v47 }
0x23cc   :  { %v5755_v56 = vadd.f32 %v6051_v7, %v5747_v25 }
0x23cd   :  { %v5762_v2 = vsel %vm442_vm0, %v5756_v17, 0.0 }
0x23ce   :  { %5763 = vadd.xlane.f32.xlu0 %v5762_v2  ;;  %v5759_v3 = vsel %vm442_vm0, %v5755_v56, 0.0 }
0x23cf   :  { %5760 = vadd.xlane.f32.xlu1 %v5759_v3 }
0x245b   :  { %v5764_v28 = vpop.xlane.xlu0 %5763 }
0x245c   :  { %v5766_v8 = vmul.f32 0.03125, %v5764_v28  ;;  %v5761_v54 = vpop.xlane.xlu1 %5760 }
0x245d   :  { %v5765_v30 = vmul.f32 0.03125, %v5761_v54 }
0x245e   :  { %v5768_v13 = vsub.f32 %v5756_v17, %v5766_v8 }
0x245f   :  { %v5767_v6 = vsub.f32 %v5755_v56, %v5765_v30 }
0x2460   :  { %v5770_v48 = vmul.f32 %v5768_v13, %v5768_v13 }
0x2461   :  { %v5769_v59 = vmul.f32 %v5767_v6, %v5767_v6 }
0x2462   :  { %v5774_v43 = vsel %vm442_vm0, %v5770_v48, 0.0 }
0x2463   :  { %5775 = vadd.xlane.f32.xlu0 %v5774_v43  ;;  %v5771_v29 = vsel %vm442_vm0, %v5769_v59, 0.0 }
0x2464   :  { %5772 = vadd.xlane.f32.xlu1 %v5771_v29 }
0x24f0   :  { %v5776_v35 = vpop.xlane.xlu0 %5775 }
0x24f1   :  { %v5778_v37 = vmul.f32 0.03125, %v5776_v35  ;;  %v5773_v12 = vpop.xlane.xlu1 %5772 }
0x24f2   :  { %v5777_v18 = vmul.f32 0.03125, %v5773_v12 }
0x24f3   :  { %v5780_v11 = vadd.f32 1e-05, %v5778_v37 }
0x24f4   :  { %v5779_v10 = vadd.f32 1e-05, %v5777_v18 }
0x24f5   :  { %7609 = vrsqrt.f32 %v5780_v11 }
0x24f6   :  { %7611 = vrsqrt.f32 %v5779_v10 }
0x24ff   :  { %v7610_v20 = vpop.eup %7609 }
0x2500   :  { %v7612_v32 = vpop.eup %7611  ;;  %v5784_v52 = vmul.f32 %v7610_v20, %v5768_v13 }
0x2501   :  { %v5783_v46 = vmul.f32 %v7612_v32, %v5767_v6 }
0x2502   :  { %v5792_v53 = vmul.f32 %v6052_v40, %v5784_v52 }
0x2503   :  { %v5791_v45 = vmul.f32 %v6052_v40, %v5783_v46 }
0x2504   :  { %v5800_v19 = vadd.f32 %v6053_v0, %v5792_v53 }
0x2505   :  { %v5799_v49 = vadd.f32 %v6053_v0, %v5791_v45 }
0x2506   :  { %5802 = vst.msk [vmem:[#allocation37 + $0x8] sm:$0xff] %vm442_vm0, %v5800_v19 }
0x2507   :  { %5801 = vst.msk [vmem:[#allocation37] sm:$0xff] %vm442_vm0, %v5799_v49 }
0x2508   :  { %8110 = shalt.err (!%p8107_p12)
}
0x2509   :  { %s8111_s2 = scalar_lea.hbm %s8370_s21, 256 }
0x250a   :  { %p8112_p13 = scmp.ne.s32.totalorder %s8370_s21, %s8111_s2  ;;  %p8115_p0 = scmp.lt.u32.totalorder %s8111_s2, %s8370_s21 }
0x250c   :  { %p8117_p1 = pnand %p8115_p0, %p8112_p13 }
0x250e   :  { %8120 = shalt.err (!%p8117_p1)
}
0x250f   :  { %5814 = dma.vmem_to_hbm [thread:$0]  %s5809_s20, 256, %s8370_s21, [#allocation4], %s8178_s18, %s8178_s18, %s8179_s22  }
0x2510   :  { %8145 = dma.done.wait [#allocation4], 256  }
0x2511   :  { %8146 = vsyncadd [#allocation4], 4294967040 }
0x2512   :  { %5818 = vsyncpa [#allocation3], 1 }
0x2513   :  { %5819 = vsyncpa [#allocation6], 1 }
0x2514   :  { %5820 = vsyncpa [#allocation9], 1 }
0x2515   :  { %5821 = vsyncpa [#allocation12], 1 }
0x2516   :  { %5822 = vsyncpa [#allocation15], 1 }
0x2517   :  { %5823 = vsyncpa [#allocation18], 1 }
0x2518   :  { %5824 = vsyncpa [#allocation21], 1 }
0x2519   :  { %5825 = vsyncpa [#allocation24], 1 }
0x251a   :  { %5826 = vsyncpa [#allocation27], 1 }
0x251b   :  { %5827 = vsyncpa [#allocation30], 1 }
0x251c   :  { %5828 = vsyncpa [#allocation33], 1 }
0x251d   :  { %5829 = vsyncpa [#allocation36], 1 }
0x251e   :  { %5830 = vsyncpa [#allocation4], 1 }

</bundles_post_ra>
